<compile_context>
chip_gen: v7x
topology: tpu7x:2x2x1
jax: 0.10.0
libtpu: 0.0.40
codegen_flags: <defaults>
</compile_context>

<pallas_src>
import functools

import jax
import jax.numpy as jnp
from jax.experimental import pallas as pl
from jax.experimental.pallas import tpu as pltpu

N_CLASSES = 2
OUT_PAD = 128      # lane-dense padded logits width (real logits in [:, :2])
SUBLANE_PAD = 8    # sublane-dense padded logits rows per grid step


# ----------------------------------------------------------------------------
# Fused whole-network kernel: one grid step == `bps` batch rows through all
# encoder layers + classifier head.
# ----------------------------------------------------------------------------
def neural_log_kernel(
    x_ref,                                   # (bps, S, D) f32
    wqkv_ref, bqkv_ref,                      # (L, D, 3D) bf16, (L, 1, 3D) f32
    wo_ref, bo_ref,                          # (L, D, D) bf16, (L, 1, D) f32
    ln1g_ref, ln1b_ref,                      # (L, 1, D) f32
    w1_ref, b1_ref,                          # (L, D, dff) bf16, (L, 1, dff) f32
    w2_ref, b2_ref,                          # (L, dff, D) bf16, (L, 1, D) f32
    ln2g_ref, ln2b_ref,                      # (L, 1, D) f32
    fcw_ref, fcb_ref,                        # (D, OUT_PAD) bf16, (1, OUT_PAD) f32 (fc1.fc2 folded)
    out_ref,                                 # (1, ROWS, OUT_PAD) f32
    *, num_heads,
):
    f32, bf16 = jnp.float32, jnp.bfloat16
    bps, S, D = x_ref.shape
    L = wqkv_ref.shape[0]
    H = num_heads
    dk = D // H
    T = bps * S
    inv_scale = 1.0 / (float(dk) ** 0.5)
    eps = 1e-6

    def layer_norm(v, g, b):                 # f32 stats, biased variance
        mu = jnp.mean(v, axis=-1, keepdims=True)
        var = jnp.mean((v - mu) ** 2, axis=-1, keepdims=True)
        return (v - mu) * jax.lax.rsqrt(var + eps) * g + b

    def split_heads(t):                      # (T, D) -> (H*bps, S, dk); g = h*bps + b
        t3 = t.reshape(bps, S, D)            # major-dim split only
        return jnp.concatenate(
            [t3[:, :, h * dk:(h + 1) * dk] for h in range(H)], axis=0)

    def merge_heads(t):                      # (H*bps, S, dk) -> (T, D) lanes = (h, dk)
        return jnp.concatenate(
            [t[h * bps:(h + 1) * bps] for h in range(H)], axis=-1
        ).reshape(T, D)

    # Batch rows folded into the token dim: all token-parallel matmuls run on
    # (T, D) = (bps*S, D).
    x = x_ref[...].reshape(T, D).astype(f32)

    for l in range(L):                       # static unroll over layers
        # --- fused Q/K/V projection: one (T, D) x (D, 3D) MXU matmul ---
        x_bf = x.astype(bf16)
        qkv = jnp.dot(x_bf, wqkv_ref[l], preferred_element_type=f32) + bqkv_ref[l]
        qkv_bf = qkv.astype(bf16)            # single hoisted cast

        # --- attention batched over (batch row, head): one scores einsum,
        #     one fused softmax pass, one PV einsum ---
        qh = split_heads(qkv_bf[:, :D])
        kh = split_heads(qkv_bf[:, D:2 * D])
        vh = split_heads(qkv_bf[:, 2 * D:])
        s = jnp.einsum("gqd,gkd->gqk", qh, kh,
                       preferred_element_type=f32) * inv_scale
        s = s - jnp.max(s, axis=-1, keepdims=True)
        p = jnp.exp(s)
        p = p * pl.reciprocal(jnp.sum(p, axis=-1, keepdims=True), approx=True)
        o = jnp.einsum("gqk,gkd->gqd", p.astype(bf16), vh,
                       preferred_element_type=f32)

        # --- output projection: heads merged back -> single (T,D)x(D,D) matmul
        attn = jnp.dot(merge_heads(o.astype(bf16)), wo_ref[l],
                       preferred_element_type=f32) + bo_ref[l]

        # --- residual + LayerNorm 1 ---
        y = layer_norm(x + attn, ln1g_ref[l], ln1b_ref[l])

        # --- feed forward: Linear -> ReLU -> Linear ---
        hid = jnp.dot(y.astype(bf16), w1_ref[l],
                      preferred_element_type=f32) + b1_ref[l]
        hid = jnp.maximum(hid, 0.0)
        ff = jnp.dot(hid.astype(bf16), w2_ref[l],
                     preferred_element_type=f32) + b2_ref[l]

        # --- residual + LayerNorm 2 ---
        x = layer_norm(y + ff, ln2g_ref[l], ln2b_ref[l])

    # --- classifier head: seq-sum pool + single folded fc1.fc2 matmul ---
    pooled = jnp.sum(x.reshape(bps, S, D), axis=1)                 # (bps, D)
    rows = out_ref.shape[1]
    if bps < rows:                             # pad to a sublane-dense store
        pooled = jnp.concatenate(
            [pooled, jnp.zeros((rows - bps, D), f32)], axis=0)
    logits = jnp.dot(pooled.astype(bf16), fcw_ref[...],
                     preferred_element_type=f32) + fcb_ref[...]
    # lane-dense (rows, 128) store; batch-row b's logits live in [b, :N_CLASSES]
    out_ref[0] = logits.astype(out_ref.dtype)


_WEIGHT_NAMES = (
    "wqkv", "bqkv", "wo", "bo", "ln1_g", "ln1_b",
    "w1", "b1", "w2", "b2", "ln2_g", "ln2_b",
    "fcw", "fcb",
)


def _neural_log_pallas(inp, params, num_heads, batch_per_step=None):
    B, S, D = inp.shape
    # Default: whole batch in one grid step (best for single-TC v5e/v6e).
    # On v7x pass batch_per_step=1 to split the batch across the two TCs.
    bps = B if batch_per_step is None else batch_per_step
    assert B % bps == 0
    G = B // bps
    rows = max(SUBLANE_PAD, ((bps + SUBLANE_PAD - 1) // SUBLANE_PAD) * SUBLANE_PAD)

    kernel = functools.partial(neural_log_kernel, num_heads=num_heads)
    vmem_spec = pl.BlockSpec(memory_space=pltpu.MemorySpace.VMEM)
    out_pad = pl.pallas_call(
        kernel,
        out_shape=jax.ShapeDtypeStruct((G, rows, OUT_PAD), jnp.float32),
        grid=(G,),
        in_specs=[pl.BlockSpec((bps, S, D), lambda g: (g, 0, 0))]
        + [vmem_spec] * len(_WEIGHT_NAMES),
        out_specs=pl.BlockSpec((1, rows, OUT_PAD), lambda g: (g, 0, 0)),
        compiler_params=pltpu.CompilerParams(
            dimension_semantics=("parallel",),
            vmem_limit_bytes=32 * 1024 * 1024),
    )(inp, *(params[n] for n in _WEIGHT_NAMES))
    return out_pad[:, :bps, :N_CLASSES].reshape(B, N_CLASSES)


@functools.partial(jax.jit, static_argnames=("num_heads", "batch_per_step"))
def neural_log_forward(inp, params, num_heads, batch_per_step=None):
    logits = _neural_log_pallas(inp, params, num_heads, batch_per_step)
    return logits, logits                     # module returns (x, x)


# ----------------------------------------------------------------------------
# Parameter init (deterministic, synthetic); matmul weights stored in bf16,
# biases / LayerNorm params in f32.  Raw fc1/fc2 kept (f32) for the reference;
# the kernel uses the host-folded fc = fc1 . fc2 (valid: dropout is identity
# in eval and there is no activation between them).
# ----------------------------------------------------------------------------
def init_params(key, num_layers, D, H, dff, n_hidden=32, n_classes=N_CLASSES):
    acc = {k: [] for k in ("wqkv", "bqkv", "wo", "bo", "ln1_g", "ln1_b",
                           "w1", "b1", "w2", "b2", "ln2_g", "ln2_b")}
    for layer in range(num_layers):
        ks = jax.random.split(jax.random.fold_in(key, layer), 8)
        acc["wqkv"].append(0.05 * jax.random.normal(ks[0], (D, 3 * D), jnp.float32))
        acc["bqkv"].append(0.01 * jax.random.normal(ks[1], (1, 3 * D), jnp.float32))
        acc["wo"].append(0.05 * jax.random.normal(ks[2], (D, D), jnp.float32))
        acc["bo"].append(0.01 * jax.random.normal(ks[3], (1, D), jnp.float32))
        acc["ln1_g"].append(jnp.ones((1, D), jnp.float32))
        acc["ln1_b"].append(jnp.zeros((1, D), jnp.float32))
        acc["w1"].append(0.05 * jax.random.normal(ks[4], (D, dff), jnp.float32))
        acc["b1"].append(0.01 * jax.random.normal(ks[5], (1, dff), jnp.float32))
        acc["w2"].append(0.05 * jax.random.normal(ks[6], (dff, D), jnp.float32))
        acc["b2"].append(0.01 * jax.random.normal(ks[7], (1, D), jnp.float32))
        acc["ln2_g"].append(jnp.ones((1, D), jnp.float32))
        acc["ln2_b"].append(jnp.zeros((1, D), jnp.float32))
    params = {k: jnp.stack(v) for k, v in acc.items()}
    for k in ("wqkv", "wo", "w1", "w2"):      # bf16 MXU operands, f32 accumulate
        params[k] = params[k].astype(jnp.bfloat16)

    kh = jax.random.split(jax.random.fold_in(key, 10_000), 4)
    fc1_w = 0.05 * jax.random.normal(kh[0], (D, n_hidden), jnp.float32)
    fc1_b = 0.01 * jax.random.normal(kh[1], (1, n_hidden), jnp.float32)
    fc2_w = 0.05 * jax.random.normal(kh[2], (n_hidden, n_classes), jnp.float32)
    fc2_b = 0.01 * jax.random.normal(kh[3], (1, n_classes), jnp.float32)
    params["fc1_w"], params["fc1_b"] = fc1_w, fc1_b
    params["fc2_w"], params["fc2_b"] = fc2_w, fc2_b

    # Host-side fold of fc1 . fc2, zero-padded to 128 output lanes.
    fc2_w_pad = jnp.zeros((n_hidden, OUT_PAD), jnp.float32).at[:, :n_classes].set(fc2_w)
    fc2_b_pad = jnp.zeros((1, OUT_PAD), jnp.float32).at[:, :n_classes].set(fc2_b)
    params["fcw"] = (fc1_w @ fc2_w_pad).astype(jnp.bfloat16)
    params["fcb"] = fc1_b @ fc2_w_pad + fc2_b_pad
    return params


# ----------------------------------------------------------------------------
# Pure-JAX reference structured like the original PyTorch module (per-head
# loop, concat -> Wo, separate fc1/fc2, exact softmax).  Matmuls use bf16
# operands like the kernel so the check validates the kernel's structural
# transforms (batched heads, folded fc head, approx reciprocal).
# ----------------------------------------------------------------------------
def _mm(a, w):
    return jnp.dot(a.astype(jnp.bfloat16), w.astype(jnp.bfloat16),
                   preferred_element_type=jnp.float32)


def neural_log_reference(inp, params, num_heads):
    B, S, D = inp.shape
    L = params["wqkv"].shape[0]
    dk = D // num_heads
    inv_scale = 1.0 / (float(dk) ** 0.5)

    def ln(v, g, b):
        mu = jnp.mean(v, axis=-1, keepdims=True)
        var = jnp.mean((v - mu) ** 2, axis=-1, keepdims=True)
        return (v - mu) * jax.lax.rsqrt(var + 1e-6) * g + b

    outs = []
    for b in range(B):
        x = inp[b].astype(jnp.float32)
        for l in range(L):
            qkv = _mm(x, params["wqkv"][l]) + params["bqkv"][l]
            heads = []
            for h in range(num_heads):
                q_h = qkv[:, h * dk:(h + 1) * dk]
                k_h = qkv[:, D + h * dk:D + (h + 1) * dk]
                v_h = qkv[:, 2 * D + h * dk:2 * D + (h + 1) * dk]
                s = _mm(q_h, k_h.T) * inv_scale
                s = s - jnp.max(s, axis=-1, keepdims=True)
                p = jnp.exp(s)
                p = p / jnp.sum(p, axis=-1, keepdims=True)
                heads.append(_mm(p, v_h))
            attn = _mm(jnp.concatenate(heads, axis=-1), params["wo"][l]) + params["bo"][l]
            y = ln(x + attn, params["ln1_g"][l], params["ln1_b"][l])
            hid = jnp.maximum(_mm(y, params["w1"][l]) + params["b1"][l], 0.0)
            ff = _mm(hid, params["w2"][l]) + params["b2"][l]
            x = ln(y + ff, params["ln2_g"][l], params["ln2_b"][l])
        pooled = jnp.sum(x, axis=0, keepdims=True)
        h1 = _mm(pooled, params["fc1_w"]) + params["fc1_b"]
        logits = _mm(h1, params["fc2_w"]) + params["fc2_b"]
        outs.append(logits[0])
    return jnp.stack(outs)


if __name__ == "__main__":
    B, S, D = 2, 8, 128
    H, DFF, LAYERS = 4, 256, 2                # dim_model % num_heads == 0

    key = jax.random.PRNGKey(0)
    k_in, k_param = jax.random.split(key)
    inp = jax.random.normal(k_in, (B, S, D), jnp.float32)
    features = [None, None, inp]              # NeuralLog reads features[2]

    params = init_params(k_param, LAYERS, D, H, DFF)

    out1, out2 = neural_log_forward(features[2], params, num_heads=H)
    jax.block_until_ready(out1)
    jax.block_until_ready(out2)

    assert out1.shape == (B, N_CLASSES) and out2.shape == (B, N_CLASSES)
    assert bool(jnp.all(jnp.isfinite(out1)))

    ref = neural_log_reference(features[2], params, H)
    assert bool(jnp.allclose(out1, ref, atol=5e-2, rtol=5e-2)), (out1, ref)

    print("KERNEL_OK")
</pallas_src>

<mosaic_0001>
module attributes {stable_mosaic.version = 11 : i64} {
  func.func @neural_log_kernel(%arg0: i32, %arg1: memref<2x8x128xf32, #tpu.memory_space<vmem>>, %arg2: memref<2x128x384xbf16, #tpu.memory_space<vmem>>, %arg3: memref<2x1x384xf32, #tpu.memory_space<vmem>>, %arg4: memref<2x128x128xbf16, #tpu.memory_space<vmem>>, %arg5: memref<2x1x128xf32, #tpu.memory_space<vmem>>, %arg6: memref<2x1x128xf32, #tpu.memory_space<vmem>>, %arg7: memref<2x1x128xf32, #tpu.memory_space<vmem>>, %arg8: memref<2x128x256xbf16, #tpu.memory_space<vmem>>, %arg9: memref<2x1x256xf32, #tpu.memory_space<vmem>>, %arg10: memref<2x256x128xbf16, #tpu.memory_space<vmem>>, %arg11: memref<2x1x128xf32, #tpu.memory_space<vmem>>, %arg12: memref<2x1x128xf32, #tpu.memory_space<vmem>>, %arg13: memref<2x1x128xf32, #tpu.memory_space<vmem>>, %arg14: memref<128x128xbf16, #tpu.memory_space<vmem>>, %arg15: memref<1x128xf32, #tpu.memory_space<vmem>>, %arg16: memref<1x8x128xf32, #tpu.memory_space<vmem>>) attributes {dimension_semantics = [#tpu.dimension_semantics<parallel>], iteration_bounds = array<i64: 1>, scalar_prefetch = 0 : i64, scratch_operands = 0 : i64, tpu.core_type = #tpu.core_type<tc>, window_params = [{transform_indices = @transform_0, window_bounds = array<i64: 2, 8, 128>}, {pipeline_mode = #tpu.pipeline_mode<synchronous>, transform_indices = @transform_1, window_bounds = array<i64: 2, 128, 384>}, {pipeline_mode = #tpu.pipeline_mode<synchronous>, transform_indices = @transform_2, window_bounds = array<i64: 2, 1, 384>}, {pipeline_mode = #tpu.pipeline_mode<synchronous>, transform_indices = @transform_3, window_bounds = array<i64: 2, 128, 128>}, {pipeline_mode = #tpu.pipeline_mode<synchronous>, transform_indices = @transform_4, window_bounds = array<i64: 2, 1, 128>}, {pipeline_mode = #tpu.pipeline_mode<synchronous>, transform_indices = @transform_5, window_bounds = array<i64: 2, 1, 128>}, {pipeline_mode = #tpu.pipeline_mode<synchronous>, transform_indices = @transform_6, window_bounds = array<i64: 2, 1, 128>}, {pipeline_mode = #tpu.pipeline_mode<synchronous>, transform_indices = @transform_7, window_bounds = array<i64: 2, 128, 256>}, {pipeline_mode = #tpu.pipeline_mode<synchronous>, transform_indices = @transform_8, window_bounds = array<i64: 2, 1, 256>}, {pipeline_mode = #tpu.pipeline_mode<synchronous>, transform_indices = @transform_9, window_bounds = array<i64: 2, 256, 128>}, {pipeline_mode = #tpu.pipeline_mode<synchronous>, transform_indices = @transform_10, window_bounds = array<i64: 2, 1, 128>}, {pipeline_mode = #tpu.pipeline_mode<synchronous>, transform_indices = @transform_11, window_bounds = array<i64: 2, 1, 128>}, {pipeline_mode = #tpu.pipeline_mode<synchronous>, transform_indices = @transform_12, window_bounds = array<i64: 2, 1, 128>}, {pipeline_mode = #tpu.pipeline_mode<synchronous>, transform_indices = @transform_13, window_bounds = array<i64: 128, 128>}, {pipeline_mode = #tpu.pipeline_mode<synchronous>, transform_indices = @transform_14, window_bounds = array<i64: 1, 128>}, {transform_indices = @transform_15, window_bounds = array<i64: 1, 8, 128>}]} {
    %c0 = arith.constant 0 : index
    %c0_0 = arith.constant 0 : index
    %c0_1 = arith.constant 0 : index
    %0 = vector.load %arg1[%c0, %c0_0, %c0_1] : memref<2x8x128xf32, #tpu.memory_space<vmem>>, vector<2x8x128xf32>
    %1 = vector.shape_cast %0 : vector<2x8x128xf32> to vector<16x128xf32>
    %2 = arith.truncf %1 : vector<16x128xf32> to vector<16x128xbf16>
    %c0_2 = arith.constant 0 : index
    %c0_3 = arith.constant 0 : index
    %c0_4 = arith.constant 0 : index
    %3 = vector.load %arg2[%c0_2, %c0_3, %c0_4] : memref<2x128x384xbf16, #tpu.memory_space<vmem>>, vector<1x128x384xbf16>
    %4 = vector.shape_cast %3 : vector<1x128x384xbf16> to vector<128x384xbf16>
    %cst = arith.constant dense<0.000000e+00> : vector<16x384xf32>
    %5 = tpu.matmul %2, %4, %cst {dimension_numbers = #tpu.dot_dimension_numbers<[1], [0], [0], [1], [0, 0, 1, 1], [], []>} : vector<16x128xbf16>, vector<128x384xbf16>, vector<16x384xf32> -> vector<16x384xf32>
    %c0_5 = arith.constant 0 : index
    %c0_6 = arith.constant 0 : index
    %c0_7 = arith.constant 0 : index
    %6 = vector.load %arg3[%c0_5, %c0_6, %c0_7] : memref<2x1x384xf32, #tpu.memory_space<vmem>>, vector<1x1x384xf32>
    %7 = vector.shape_cast %6 : vector<1x1x384xf32> to vector<1x384xf32>
    %8 = vector.broadcast %7 : vector<1x384xf32> to vector<16x384xf32>
    %9 = arith.addf %5, %8 : vector<16x384xf32>
    %10 = arith.truncf %9 : vector<16x384xf32> to vector<16x384xbf16>
    %11 = vector.extract_strided_slice %10 {offsets = [0, 0], sizes = [16, 128], strides = [1, 1]} : vector<16x384xbf16> to vector<16x128xbf16>
    %12 = vector.shape_cast %11 : vector<16x128xbf16> to vector<2x8x128xbf16>
    %13 = vector.extract_strided_slice %12 {offsets = [0, 0, 0], sizes = [2, 8, 32], strides = [1, 1, 1]} : vector<2x8x128xbf16> to vector<2x8x32xbf16>
    %14 = vector.extract_strided_slice %12 {offsets = [0, 0, 32], sizes = [2, 8, 32], strides = [1, 1, 1]} : vector<2x8x128xbf16> to vector<2x8x32xbf16>
    %15 = vector.extract_strided_slice %12 {offsets = [0, 0, 64], sizes = [2, 8, 32], strides = [1, 1, 1]} : vector<2x8x128xbf16> to vector<2x8x32xbf16>
    %16 = vector.extract_strided_slice %12 {offsets = [0, 0, 96], sizes = [2, 8, 32], strides = [1, 1, 1]} : vector<2x8x128xbf16> to vector<2x8x32xbf16>
    %17 = tpu.concatenate %13, %14, %15, %16 in 0 : vector<2x8x32xbf16>, vector<2x8x32xbf16>, vector<2x8x32xbf16>, vector<2x8x32xbf16> -> vector<8x8x32xbf16>
    %18 = vector.extract_strided_slice %10 {offsets = [0, 128], sizes = [16, 128], strides = [1, 1]} : vector<16x384xbf16> to vector<16x128xbf16>
    %19 = vector.shape_cast %18 : vector<16x128xbf16> to vector<2x8x128xbf16>
    %20 = vector.extract_strided_slice %19 {offsets = [0, 0, 0], sizes = [2, 8, 32], strides = [1, 1, 1]} : vector<2x8x128xbf16> to vector<2x8x32xbf16>
    %21 = vector.extract_strided_slice %19 {offsets = [0, 0, 32], sizes = [2, 8, 32], strides = [1, 1, 1]} : vector<2x8x128xbf16> to vector<2x8x32xbf16>
    %22 = vector.extract_strided_slice %19 {offsets = [0, 0, 64], sizes = [2, 8, 32], strides = [1, 1, 1]} : vector<2x8x128xbf16> to vector<2x8x32xbf16>
    %23 = vector.extract_strided_slice %19 {offsets = [0, 0, 96], sizes = [2, 8, 32], strides = [1, 1, 1]} : vector<2x8x128xbf16> to vector<2x8x32xbf16>
    %24 = tpu.concatenate %20, %21, %22, %23 in 0 : vector<2x8x32xbf16>, vector<2x8x32xbf16>, vector<2x8x32xbf16>, vector<2x8x32xbf16> -> vector<8x8x32xbf16>
    %25 = vector.extract_strided_slice %10 {offsets = [0, 256], sizes = [16, 128], strides = [1, 1]} : vector<16x384xbf16> to vector<16x128xbf16>
    %26 = vector.shape_cast %25 : vector<16x128xbf16> to vector<2x8x128xbf16>
    %27 = vector.extract_strided_slice %26 {offsets = [0, 0, 0], sizes = [2, 8, 32], strides = [1, 1, 1]} : vector<2x8x128xbf16> to vector<2x8x32xbf16>
    %28 = vector.extract_strided_slice %26 {offsets = [0, 0, 32], sizes = [2, 8, 32], strides = [1, 1, 1]} : vector<2x8x128xbf16> to vector<2x8x32xbf16>
    %29 = vector.extract_strided_slice %26 {offsets = [0, 0, 64], sizes = [2, 8, 32], strides = [1, 1, 1]} : vector<2x8x128xbf16> to vector<2x8x32xbf16>
    %30 = vector.extract_strided_slice %26 {offsets = [0, 0, 96], sizes = [2, 8, 32], strides = [1, 1, 1]} : vector<2x8x128xbf16> to vector<2x8x32xbf16>
    %31 = tpu.concatenate %27, %28, %29, %30 in 0 : vector<2x8x32xbf16>, vector<2x8x32xbf16>, vector<2x8x32xbf16>, vector<2x8x32xbf16> -> vector<8x8x32xbf16>
    "tpu.trace_start"() <{level = 10 : i32, message = "gqd,gkd->gqk"}> : () -> ()
    %cst_8 = arith.constant dense<0.000000e+00> : vector<8x8x8xf32>
    %32 = tpu.matmul %17, %24, %cst_8 {dimension_numbers = #tpu.dot_dimension_numbers<[2], [2], [1], [1], [0, 0, 0, 1, 1, 1], [0], [0]>} : vector<8x8x32xbf16>, vector<8x8x32xbf16>, vector<8x8x8xf32> -> vector<8x8x8xf32>
    "tpu.trace_stop"() : () -> ()
    %cst_9 = arith.constant 0.176776692 : f32
    %33 = vector.broadcast %cst_9 : f32 to vector<8x8x8xf32>
    %34 = arith.mulf %32, %33 : vector<8x8x8xf32>
    %cst_10 = arith.constant dense<0xFF800000> : vector<8x8xf32>
    %35 = vector.multi_reduction <maximumf>, %34, %cst_10 [2] : vector<8x8x8xf32> to vector<8x8xf32>
    %36 = vector.shape_cast %35 : vector<8x8xf32> to vector<8x8x1xf32>
    %37 = vector.broadcast %36 : vector<8x8x1xf32> to vector<8x8x8xf32>
    %38 = arith.subf %34, %37 : vector<8x8x8xf32>
    %39 = math.exp %38 : vector<8x8x8xf32>
    %cst_11 = arith.constant dense<0.000000e+00> : vector<8x8xf32>
    %40 = vector.multi_reduction <add>, %39, %cst_11 [2] : vector<8x8x8xf32> to vector<8x8xf32>
    %41 = vector.shape_cast %40 : vector<8x8xf32> to vector<8x8x1xf32>
    %42 = tpu.reciprocal %41 {approx = true} : vector<8x8x1xf32> -> vector<8x8x1xf32>
    %43 = vector.broadcast %42 : vector<8x8x1xf32> to vector<8x8x8xf32>
    %44 = arith.mulf %39, %43 : vector<8x8x8xf32>
    %45 = arith.truncf %44 : vector<8x8x8xf32> to vector<8x8x8xbf16>
    "tpu.trace_start"() <{level = 10 : i32, message = "gqk,gkd->gqd"}> : () -> ()
    %cst_12 = arith.constant dense<0.000000e+00> : vector<8x8x32xf32>
    %46 = tpu.matmul %45, %31, %cst_12 {dimension_numbers = #tpu.dot_dimension_numbers<[2], [1], [1], [2], [0, 0, 0, 1, 1, 2], [0], [0]>} : vector<8x8x8xbf16>, vector<8x8x32xbf16>, vector<8x8x32xf32> -> vector<8x8x32xf32>
    "tpu.trace_stop"() : () -> ()
    %47 = arith.truncf %46 : vector<8x8x32xf32> to vector<8x8x32xbf16>
    %48 = vector.extract_strided_slice %47 {offsets = [0, 0, 0], sizes = [2, 8, 32], strides = [1, 1, 1]} : vector<8x8x32xbf16> to vector<2x8x32xbf16>
    %49 = vector.extract_strided_slice %47 {offsets = [2, 0, 0], sizes = [2, 8, 32], strides = [1, 1, 1]} : vector<8x8x32xbf16> to vector<2x8x32xbf16>
    %50 = vector.extract_strided_slice %47 {offsets = [4, 0, 0], sizes = [2, 8, 32], strides = [1, 1, 1]} : vector<8x8x32xbf16> to vector<2x8x32xbf16>
    %51 = vector.extract_strided_slice %47 {offsets = [6, 0, 0], sizes = [2, 8, 32], strides = [1, 1, 1]} : vector<8x8x32xbf16> to vector<2x8x32xbf16>
    %52 = tpu.concatenate %48, %49, %50, %51 in 2 : vector<2x8x32xbf16>, vector<2x8x32xbf16>, vector<2x8x32xbf16>, vector<2x8x32xbf16> -> vector<2x8x128xbf16>
    %53 = vector.shape_cast %52 : vector<2x8x128xbf16> to vector<16x128xbf16>
    %c0_13 = arith.constant 0 : index
    %c0_14 = arith.constant 0 : index
    %c0_15 = arith.constant 0 : index
    %54 = vector.load %arg4[%c0_13, %c0_14, %c0_15] : memref<2x128x128xbf16, #tpu.memory_space<vmem>>, vector<1x128x128xbf16>
    %55 = vector.shape_cast %54 : vector<1x128x128xbf16> to vector<128x128xbf16>
    %cst_16 = arith.constant dense<0.000000e+00> : vector<16x128xf32>
    %56 = tpu.matmul %53, %55, %cst_16 {dimension_numbers = #tpu.dot_dimension_numbers<[1], [0], [0], [1], [0, 0, 1, 1], [], []>} : vector<16x128xbf16>, vector<128x128xbf16>, vector<16x128xf32> -> vector<16x128xf32>
    %c0_17 = arith.constant 0 : index
    %c0_18 = arith.constant 0 : index
    %c0_19 = arith.constant 0 : index
    %57 = vector.load %arg5[%c0_17, %c0_18, %c0_19] : memref<2x1x128xf32, #tpu.memory_space<vmem>>, vector<1x1x128xf32>
    %58 = vector.shape_cast %57 : vector<1x1x128xf32> to vector<1x128xf32>
    %59 = vector.broadcast %58 : vector<1x128xf32> to vector<16x128xf32>
    %60 = arith.addf %56, %59 : vector<16x128xf32>
    %61 = arith.addf %1, %60 : vector<16x128xf32>
    %c0_20 = arith.constant 0 : index
    %c0_21 = arith.constant 0 : index
    %c0_22 = arith.constant 0 : index
    %62 = vector.load %arg6[%c0_20, %c0_21, %c0_22] : memref<2x1x128xf32, #tpu.memory_space<vmem>>, vector<1x1x128xf32>
    %63 = vector.shape_cast %62 : vector<1x1x128xf32> to vector<1x128xf32>
    %c0_23 = arith.constant 0 : index
    %c0_24 = arith.constant 0 : index
    %c0_25 = arith.constant 0 : index
    %64 = vector.load %arg7[%c0_23, %c0_24, %c0_25] : memref<2x1x128xf32, #tpu.memory_space<vmem>>, vector<1x1x128xf32>
    %65 = vector.shape_cast %64 : vector<1x1x128xf32> to vector<1x128xf32>
    %cst_26 = arith.constant dense<0.000000e+00> : vector<16xf32>
    %66 = vector.multi_reduction <add>, %61, %cst_26 [1] : vector<16x128xf32> to vector<16xf32>
    %67 = vector.shape_cast %66 : vector<16xf32> to vector<16x1xf32>
    %cst_27 = arith.constant 1.280000e+02 : f32
    %68 = vector.broadcast %cst_27 : f32 to vector<16x1xf32>
    %69 = arith.divf %67, %68 : vector<16x1xf32>
    %70 = vector.broadcast %69 : vector<16x1xf32> to vector<16x128xf32>
    %71 = arith.subf %61, %70 : vector<16x128xf32>
    %72 = arith.mulf %71, %71 : vector<16x128xf32>
    %cst_28 = arith.constant dense<0.000000e+00> : vector<16xf32>
    %73 = vector.multi_reduction <add>, %72, %cst_28 [1] : vector<16x128xf32> to vector<16xf32>
    %74 = vector.shape_cast %73 : vector<16xf32> to vector<16x1xf32>
    %cst_29 = arith.constant 1.280000e+02 : f32
    %75 = vector.broadcast %cst_29 : f32 to vector<16x1xf32>
    %76 = arith.divf %74, %75 : vector<16x1xf32>
    %77 = vector.broadcast %69 : vector<16x1xf32> to vector<16x128xf32>
    %78 = arith.subf %61, %77 : vector<16x128xf32>
    %cst_30 = arith.constant 9.99999997E-7 : f32
    %79 = vector.broadcast %cst_30 : f32 to vector<16x1xf32>
    %80 = arith.addf %76, %79 : vector<16x1xf32>
    %81 = math.rsqrt %80 : vector<16x1xf32>
    %82 = vector.broadcast %81 : vector<16x1xf32> to vector<16x128xf32>
    %83 = arith.mulf %78, %82 : vector<16x128xf32>
    %84 = vector.broadcast %63 : vector<1x128xf32> to vector<16x128xf32>
    %85 = arith.mulf %83, %84 : vector<16x128xf32>
    %86 = vector.broadcast %65 : vector<1x128xf32> to vector<16x128xf32>
    %87 = arith.addf %85, %86 : vector<16x128xf32>
    %88 = arith.truncf %87 : vector<16x128xf32> to vector<16x128xbf16>
    %c0_31 = arith.constant 0 : index
    %c0_32 = arith.constant 0 : index
    %c0_33 = arith.constant 0 : index
    %89 = vector.load %arg8[%c0_31, %c0_32, %c0_33] : memref<2x128x256xbf16, #tpu.memory_space<vmem>>, vector<1x128x256xbf16>
    %90 = vector.shape_cast %89 : vector<1x128x256xbf16> to vector<128x256xbf16>
    %cst_34 = arith.constant dense<0.000000e+00> : vector<16x256xf32>
    %91 = tpu.matmul %88, %90, %cst_34 {dimension_numbers = #tpu.dot_dimension_numbers<[1], [0], [0], [1], [0, 0, 1, 1], [], []>} : vector<16x128xbf16>, vector<128x256xbf16>, vector<16x256xf32> -> vector<16x256xf32>
    %c0_35 = arith.constant 0 : index
    %c0_36 = arith.constant 0 : index
    %c0_37 = arith.constant 0 : index
    %92 = vector.load %arg9[%c0_35, %c0_36, %c0_37] : memref<2x1x256xf32, #tpu.memory_space<vmem>>, vector<1x1x256xf32>
    %93 = vector.shape_cast %92 : vector<1x1x256xf32> to vector<1x256xf32>
    %94 = vector.broadcast %93 : vector<1x256xf32> to vector<16x256xf32>
    %95 = arith.addf %91, %94 : vector<16x256xf32>
    %cst_38 = arith.constant 0.000000e+00 : f32
    %96 = vector.broadcast %cst_38 : f32 to vector<16x256xf32>
    %97 = arith.maximumf %95, %96 : vector<16x256xf32>
    %98 = arith.truncf %97 : vector<16x256xf32> to vector<16x256xbf16>
    %c0_39 = arith.constant 0 : index
    %c0_40 = arith.constant 0 : index
    %c0_41 = arith.constant 0 : index
    %99 = vector.load %arg10[%c0_39, %c0_40, %c0_41] : memref<2x256x128xbf16, #tpu.memory_space<vmem>>, vector<1x256x128xbf16>
    %100 = vector.shape_cast %99 : vector<1x256x128xbf16> to vector<256x128xbf16>
    %cst_42 = arith.constant dense<0.000000e+00> : vector<16x128xf32>
    %101 = tpu.matmul %98, %100, %cst_42 {dimension_numbers = #tpu.dot_dimension_numbers<[1], [0], [0], [1], [0, 0, 1, 1], [], []>} : vector<16x256xbf16>, vector<256x128xbf16>, vector<16x128xf32> -> vector<16x128xf32>
    %c0_43 = arith.constant 0 : index
    %c0_44 = arith.constant 0 : index
    %c0_45 = arith.constant 0 : index
    %102 = vector.load %arg11[%c0_43, %c0_44, %c0_45] : memref<2x1x128xf32, #tpu.memory_space<vmem>>, vector<1x1x128xf32>
    %103 = vector.shape_cast %102 : vector<1x1x128xf32> to vector<1x128xf32>
    %104 = vector.broadcast %103 : vector<1x128xf32> to vector<16x128xf32>
    %105 = arith.addf %101, %104 : vector<16x128xf32>
    %106 = arith.addf %87, %105 : vector<16x128xf32>
    %c0_46 = arith.constant 0 : index
    %c0_47 = arith.constant 0 : index
    %c0_48 = arith.constant 0 : index
    %107 = vector.load %arg12[%c0_46, %c0_47, %c0_48] : memref<2x1x128xf32, #tpu.memory_space<vmem>>, vector<1x1x128xf32>
    %108 = vector.shape_cast %107 : vector<1x1x128xf32> to vector<1x128xf32>
    %c0_49 = arith.constant 0 : index
    %c0_50 = arith.constant 0 : index
    %c0_51 = arith.constant 0 : index
    %109 = vector.load %arg13[%c0_49, %c0_50, %c0_51] : memref<2x1x128xf32, #tpu.memory_space<vmem>>, vector<1x1x128xf32>
    %110 = vector.shape_cast %109 : vector<1x1x128xf32> to vector<1x128xf32>
    %cst_52 = arith.constant dense<0.000000e+00> : vector<16xf32>
    %111 = vector.multi_reduction <add>, %106, %cst_52 [1] : vector<16x128xf32> to vector<16xf32>
    %112 = vector.shape_cast %111 : vector<16xf32> to vector<16x1xf32>
    %cst_53 = arith.constant 1.280000e+02 : f32
    %113 = vector.broadcast %cst_53 : f32 to vector<16x1xf32>
    %114 = arith.divf %112, %113 : vector<16x1xf32>
    %115 = vector.broadcast %114 : vector<16x1xf32> to vector<16x128xf32>
    %116 = arith.subf %106, %115 : vector<16x128xf32>
    %117 = arith.mulf %116, %116 : vector<16x128xf32>
    %cst_54 = arith.constant dense<0.000000e+00> : vector<16xf32>
    %118 = vector.multi_reduction <add>, %117, %cst_54 [1] : vector<16x128xf32> to vector<16xf32>
    %119 = vector.shape_cast %118 : vector<16xf32> to vector<16x1xf32>
    %cst_55 = arith.constant 1.280000e+02 : f32
    %120 = vector.broadcast %cst_55 : f32 to vector<16x1xf32>
    %121 = arith.divf %119, %120 : vector<16x1xf32>
    %122 = vector.broadcast %114 : vector<16x1xf32> to vector<16x128xf32>
    %123 = arith.subf %106, %122 : vector<16x128xf32>
    %cst_56 = arith.constant 9.99999997E-7 : f32
    %124 = vector.broadcast %cst_56 : f32 to vector<16x1xf32>
    %125 = arith.addf %121, %124 : vector<16x1xf32>
    %126 = math.rsqrt %125 : vector<16x1xf32>
    %127 = vector.broadcast %126 : vector<16x1xf32> to vector<16x128xf32>
    %128 = arith.mulf %123, %127 : vector<16x128xf32>
    %129 = vector.broadcast %108 : vector<1x128xf32> to vector<16x128xf32>
    %130 = arith.mulf %128, %129 : vector<16x128xf32>
    %131 = vector.broadcast %110 : vector<1x128xf32> to vector<16x128xf32>
    %132 = arith.addf %130, %131 : vector<16x128xf32>
    %133 = arith.truncf %132 : vector<16x128xf32> to vector<16x128xbf16>
    %c1 = arith.constant 1 : index
    %c0_57 = arith.constant 0 : index
    %c0_58 = arith.constant 0 : index
    %134 = vector.load %arg2[%c1, %c0_57, %c0_58] : memref<2x128x384xbf16, #tpu.memory_space<vmem>>, vector<1x128x384xbf16>
    %135 = vector.shape_cast %134 : vector<1x128x384xbf16> to vector<128x384xbf16>
    %cst_59 = arith.constant dense<0.000000e+00> : vector<16x384xf32>
    %136 = tpu.matmul %133, %135, %cst_59 {dimension_numbers = #tpu.dot_dimension_numbers<[1], [0], [0], [1], [0, 0, 1, 1], [], []>} : vector<16x128xbf16>, vector<128x384xbf16>, vector<16x384xf32> -> vector<16x384xf32>
    %c1_60 = arith.constant 1 : index
    %c0_61 = arith.constant 0 : index
    %c0_62 = arith.constant 0 : index
    %137 = vector.load %arg3[%c1_60, %c0_61, %c0_62] : memref<2x1x384xf32, #tpu.memory_space<vmem>>, vector<1x1x384xf32>
    %138 = vector.shape_cast %137 : vector<1x1x384xf32> to vector<1x384xf32>
    %139 = vector.broadcast %138 : vector<1x384xf32> to vector<16x384xf32>
    %140 = arith.addf %136, %139 : vector<16x384xf32>
    %141 = arith.truncf %140 : vector<16x384xf32> to vector<16x384xbf16>
    %142 = vector.extract_strided_slice %141 {offsets = [0, 0], sizes = [16, 128], strides = [1, 1]} : vector<16x384xbf16> to vector<16x128xbf16>
    %143 = vector.shape_cast %142 : vector<16x128xbf16> to vector<2x8x128xbf16>
    %144 = vector.extract_strided_slice %143 {offsets = [0, 0, 0], sizes = [2, 8, 32], strides = [1, 1, 1]} : vector<2x8x128xbf16> to vector<2x8x32xbf16>
    %145 = vector.extract_strided_slice %143 {offsets = [0, 0, 32], sizes = [2, 8, 32], strides = [1, 1, 1]} : vector<2x8x128xbf16> to vector<2x8x32xbf16>
    %146 = vector.extract_strided_slice %143 {offsets = [0, 0, 64], sizes = [2, 8, 32], strides = [1, 1, 1]} : vector<2x8x128xbf16> to vector<2x8x32xbf16>
    %147 = vector.extract_strided_slice %143 {offsets = [0, 0, 96], sizes = [2, 8, 32], strides = [1, 1, 1]} : vector<2x8x128xbf16> to vector<2x8x32xbf16>
    %148 = tpu.concatenate %144, %145, %146, %147 in 0 : vector<2x8x32xbf16>, vector<2x8x32xbf16>, vector<2x8x32xbf16>, vector<2x8x32xbf16> -> vector<8x8x32xbf16>
    %149 = vector.extract_strided_slice %141 {offsets = [0, 128], sizes = [16, 128], strides = [1, 1]} : vector<16x384xbf16> to vector<16x128xbf16>
    %150 = vector.shape_cast %149 : vector<16x128xbf16> to vector<2x8x128xbf16>
    %151 = vector.extract_strided_slice %150 {offsets = [0, 0, 0], sizes = [2, 8, 32], strides = [1, 1, 1]} : vector<2x8x128xbf16> to vector<2x8x32xbf16>
    %152 = vector.extract_strided_slice %150 {offsets = [0, 0, 32], sizes = [2, 8, 32], strides = [1, 1, 1]} : vector<2x8x128xbf16> to vector<2x8x32xbf16>
    %153 = vector.extract_strided_slice %150 {offsets = [0, 0, 64], sizes = [2, 8, 32], strides = [1, 1, 1]} : vector<2x8x128xbf16> to vector<2x8x32xbf16>
    %154 = vector.extract_strided_slice %150 {offsets = [0, 0, 96], sizes = [2, 8, 32], strides = [1, 1, 1]} : vector<2x8x128xbf16> to vector<2x8x32xbf16>
    %155 = tpu.concatenate %151, %152, %153, %154 in 0 : vector<2x8x32xbf16>, vector<2x8x32xbf16>, vector<2x8x32xbf16>, vector<2x8x32xbf16> -> vector<8x8x32xbf16>
    %156 = vector.extract_strided_slice %141 {offsets = [0, 256], sizes = [16, 128], strides = [1, 1]} : vector<16x384xbf16> to vector<16x128xbf16>
    %157 = vector.shape_cast %156 : vector<16x128xbf16> to vector<2x8x128xbf16>
    %158 = vector.extract_strided_slice %157 {offsets = [0, 0, 0], sizes = [2, 8, 32], strides = [1, 1, 1]} : vector<2x8x128xbf16> to vector<2x8x32xbf16>
    %159 = vector.extract_strided_slice %157 {offsets = [0, 0, 32], sizes = [2, 8, 32], strides = [1, 1, 1]} : vector<2x8x128xbf16> to vector<2x8x32xbf16>
    %160 = vector.extract_strided_slice %157 {offsets = [0, 0, 64], sizes = [2, 8, 32], strides = [1, 1, 1]} : vector<2x8x128xbf16> to vector<2x8x32xbf16>
    %161 = vector.extract_strided_slice %157 {offsets = [0, 0, 96], sizes = [2, 8, 32], strides = [1, 1, 1]} : vector<2x8x128xbf16> to vector<2x8x32xbf16>
    %162 = tpu.concatenate %158, %159, %160, %161 in 0 : vector<2x8x32xbf16>, vector<2x8x32xbf16>, vector<2x8x32xbf16>, vector<2x8x32xbf16> -> vector<8x8x32xbf16>
    "tpu.trace_start"() <{level = 10 : i32, message = "gqd,gkd->gqk"}> : () -> ()
    %cst_63 = arith.constant dense<0.000000e+00> : vector<8x8x8xf32>
    %163 = tpu.matmul %148, %155, %cst_63 {dimension_numbers = #tpu.dot_dimension_numbers<[2], [2], [1], [1], [0, 0, 0, 1, 1, 1], [0], [0]>} : vector<8x8x32xbf16>, vector<8x8x32xbf16>, vector<8x8x8xf32> -> vector<8x8x8xf32>
    "tpu.trace_stop"() : () -> ()
    %cst_64 = arith.constant 0.176776692 : f32
    %164 = vector.broadcast %cst_64 : f32 to vector<8x8x8xf32>
    %165 = arith.mulf %163, %164 : vector<8x8x8xf32>
    %cst_65 = arith.constant dense<0xFF800000> : vector<8x8xf32>
    %166 = vector.multi_reduction <maximumf>, %165, %cst_65 [2] : vector<8x8x8xf32> to vector<8x8xf32>
    %167 = vector.shape_cast %166 : vector<8x8xf32> to vector<8x8x1xf32>
    %168 = vector.broadcast %167 : vector<8x8x1xf32> to vector<8x8x8xf32>
    %169 = arith.subf %165, %168 : vector<8x8x8xf32>
    %170 = math.exp %169 : vector<8x8x8xf32>
    %cst_66 = arith.constant dense<0.000000e+00> : vector<8x8xf32>
    %171 = vector.multi_reduction <add>, %170, %cst_66 [2] : vector<8x8x8xf32> to vector<8x8xf32>
    %172 = vector.shape_cast %171 : vector<8x8xf32> to vector<8x8x1xf32>
    %173 = tpu.reciprocal %172 {approx = true} : vector<8x8x1xf32> -> vector<8x8x1xf32>
    %174 = vector.broadcast %173 : vector<8x8x1xf32> to vector<8x8x8xf32>
    %175 = arith.mulf %170, %174 : vector<8x8x8xf32>
    %176 = arith.truncf %175 : vector<8x8x8xf32> to vector<8x8x8xbf16>
    "tpu.trace_start"() <{level = 10 : i32, message = "gqk,gkd->gqd"}> : () -> ()
    %cst_67 = arith.constant dense<0.000000e+00> : vector<8x8x32xf32>
    %177 = tpu.matmul %176, %162, %cst_67 {dimension_numbers = #tpu.dot_dimension_numbers<[2], [1], [1], [2], [0, 0, 0, 1, 1, 2], [0], [0]>} : vector<8x8x8xbf16>, vector<8x8x32xbf16>, vector<8x8x32xf32> -> vector<8x8x32xf32>
    "tpu.trace_stop"() : () -> ()
    %178 = arith.truncf %177 : vector<8x8x32xf32> to vector<8x8x32xbf16>
    %179 = vector.extract_strided_slice %178 {offsets = [0, 0, 0], sizes = [2, 8, 32], strides = [1, 1, 1]} : vector<8x8x32xbf16> to vector<2x8x32xbf16>
    %180 = vector.extract_strided_slice %178 {offsets = [2, 0, 0], sizes = [2, 8, 32], strides = [1, 1, 1]} : vector<8x8x32xbf16> to vector<2x8x32xbf16>
    %181 = vector.extract_strided_slice %178 {offsets = [4, 0, 0], sizes = [2, 8, 32], strides = [1, 1, 1]} : vector<8x8x32xbf16> to vector<2x8x32xbf16>
    %182 = vector.extract_strided_slice %178 {offsets = [6, 0, 0], sizes = [2, 8, 32], strides = [1, 1, 1]} : vector<8x8x32xbf16> to vector<2x8x32xbf16>
    %183 = tpu.concatenate %179, %180, %181, %182 in 2 : vector<2x8x32xbf16>, vector<2x8x32xbf16>, vector<2x8x32xbf16>, vector<2x8x32xbf16> -> vector<2x8x128xbf16>
    %184 = vector.shape_cast %183 : vector<2x8x128xbf16> to vector<16x128xbf16>
    %c1_68 = arith.constant 1 : index
    %c0_69 = arith.constant 0 : index
    %c0_70 = arith.constant 0 : index
    %185 = vector.load %arg4[%c1_68, %c0_69, %c0_70] : memref<2x128x128xbf16, #tpu.memory_space<vmem>>, vector<1x128x128xbf16>
    %186 = vector.shape_cast %185 : vector<1x128x128xbf16> to vector<128x128xbf16>
    %cst_71 = arith.constant dense<0.000000e+00> : vector<16x128xf32>
    %187 = tpu.matmul %184, %186, %cst_71 {dimension_numbers = #tpu.dot_dimension_numbers<[1], [0], [0], [1], [0, 0, 1, 1], [], []>} : vector<16x128xbf16>, vector<128x128xbf16>, vector<16x128xf32> -> vector<16x128xf32>
    %c1_72 = arith.constant 1 : index
    %c0_73 = arith.constant 0 : index
    %c0_74 = arith.constant 0 : index
    %188 = vector.load %arg5[%c1_72, %c0_73, %c0_74] : memref<2x1x128xf32, #tpu.memory_space<vmem>>, vector<1x1x128xf32>
    %189 = vector.shape_cast %188 : vector<1x1x128xf32> to vector<1x128xf32>
    %190 = vector.broadcast %189 : vector<1x128xf32> to vector<16x128xf32>
    %191 = arith.addf %187, %190 : vector<16x128xf32>
    %192 = arith.addf %132, %191 : vector<16x128xf32>
    %c1_75 = arith.constant 1 : index
    %c0_76 = arith.constant 0 : index
    %c0_77 = arith.constant 0 : index
    %193 = vector.load %arg6[%c1_75, %c0_76, %c0_77] : memref<2x1x128xf32, #tpu.memory_space<vmem>>, vector<1x1x128xf32>
    %194 = vector.shape_cast %193 : vector<1x1x128xf32> to vector<1x128xf32>
    %c1_78 = arith.constant 1 : index
    %c0_79 = arith.constant 0 : index
    %c0_80 = arith.constant 0 : index
    %195 = vector.load %arg7[%c1_78, %c0_79, %c0_80] : memref<2x1x128xf32, #tpu.memory_space<vmem>>, vector<1x1x128xf32>
    %196 = vector.shape_cast %195 : vector<1x1x128xf32> to vector<1x128xf32>
    %cst_81 = arith.constant dense<0.000000e+00> : vector<16xf32>
    %197 = vector.multi_reduction <add>, %192, %cst_81 [1] : vector<16x128xf32> to vector<16xf32>
    %198 = vector.shape_cast %197 : vector<16xf32> to vector<16x1xf32>
    %cst_82 = arith.constant 1.280000e+02 : f32
    %199 = vector.broadcast %cst_82 : f32 to vector<16x1xf32>
    %200 = arith.divf %198, %199 : vector<16x1xf32>
    %201 = vector.broadcast %200 : vector<16x1xf32> to vector<16x128xf32>
    %202 = arith.subf %192, %201 : vector<16x128xf32>
    %203 = arith.mulf %202, %202 : vector<16x128xf32>
    %cst_83 = arith.constant dense<0.000000e+00> : vector<16xf32>
    %204 = vector.multi_reduction <add>, %203, %cst_83 [1] : vector<16x128xf32> to vector<16xf32>
    %205 = vector.shape_cast %204 : vector<16xf32> to vector<16x1xf32>
    %cst_84 = arith.constant 1.280000e+02 : f32
    %206 = vector.broadcast %cst_84 : f32 to vector<16x1xf32>
    %207 = arith.divf %205, %206 : vector<16x1xf32>
    %208 = vector.broadcast %200 : vector<16x1xf32> to vector<16x128xf32>
    %209 = arith.subf %192, %208 : vector<16x128xf32>
    %cst_85 = arith.constant 9.99999997E-7 : f32
    %210 = vector.broadcast %cst_85 : f32 to vector<16x1xf32>
    %211 = arith.addf %207, %210 : vector<16x1xf32>
    %212 = math.rsqrt %211 : vector<16x1xf32>
    %213 = vector.broadcast %212 : vector<16x1xf32> to vector<16x128xf32>
    %214 = arith.mulf %209, %213 : vector<16x128xf32>
    %215 = vector.broadcast %194 : vector<1x128xf32> to vector<16x128xf32>
    %216 = arith.mulf %214, %215 : vector<16x128xf32>
    %217 = vector.broadcast %196 : vector<1x128xf32> to vector<16x128xf32>
    %218 = arith.addf %216, %217 : vector<16x128xf32>
    %219 = arith.truncf %218 : vector<16x128xf32> to vector<16x128xbf16>
    %c1_86 = arith.constant 1 : index
    %c0_87 = arith.constant 0 : index
    %c0_88 = arith.constant 0 : index
    %220 = vector.load %arg8[%c1_86, %c0_87, %c0_88] : memref<2x128x256xbf16, #tpu.memory_space<vmem>>, vector<1x128x256xbf16>
    %221 = vector.shape_cast %220 : vector<1x128x256xbf16> to vector<128x256xbf16>
    %cst_89 = arith.constant dense<0.000000e+00> : vector<16x256xf32>
    %222 = tpu.matmul %219, %221, %cst_89 {dimension_numbers = #tpu.dot_dimension_numbers<[1], [0], [0], [1], [0, 0, 1, 1], [], []>} : vector<16x128xbf16>, vector<128x256xbf16>, vector<16x256xf32> -> vector<16x256xf32>
    %c1_90 = arith.constant 1 : index
    %c0_91 = arith.constant 0 : index
    %c0_92 = arith.constant 0 : index
    %223 = vector.load %arg9[%c1_90, %c0_91, %c0_92] : memref<2x1x256xf32, #tpu.memory_space<vmem>>, vector<1x1x256xf32>
    %224 = vector.shape_cast %223 : vector<1x1x256xf32> to vector<1x256xf32>
    %225 = vector.broadcast %224 : vector<1x256xf32> to vector<16x256xf32>
    %226 = arith.addf %222, %225 : vector<16x256xf32>
    %cst_93 = arith.constant 0.000000e+00 : f32
    %227 = vector.broadcast %cst_93 : f32 to vector<16x256xf32>
    %228 = arith.maximumf %226, %227 : vector<16x256xf32>
    %229 = arith.truncf %228 : vector<16x256xf32> to vector<16x256xbf16>
    %c1_94 = arith.constant 1 : index
    %c0_95 = arith.constant 0 : index
    %c0_96 = arith.constant 0 : index
    %230 = vector.load %arg10[%c1_94, %c0_95, %c0_96] : memref<2x256x128xbf16, #tpu.memory_space<vmem>>, vector<1x256x128xbf16>
    %231 = vector.shape_cast %230 : vector<1x256x128xbf16> to vector<256x128xbf16>
    %cst_97 = arith.constant dense<0.000000e+00> : vector<16x128xf32>
    %232 = tpu.matmul %229, %231, %cst_97 {dimension_numbers = #tpu.dot_dimension_numbers<[1], [0], [0], [1], [0, 0, 1, 1], [], []>} : vector<16x256xbf16>, vector<256x128xbf16>, vector<16x128xf32> -> vector<16x128xf32>
    %c1_98 = arith.constant 1 : index
    %c0_99 = arith.constant 0 : index
    %c0_100 = arith.constant 0 : index
    %233 = vector.load %arg11[%c1_98, %c0_99, %c0_100] : memref<2x1x128xf32, #tpu.memory_space<vmem>>, vector<1x1x128xf32>
    %234 = vector.shape_cast %233 : vector<1x1x128xf32> to vector<1x128xf32>
    %235 = vector.broadcast %234 : vector<1x128xf32> to vector<16x128xf32>
    %236 = arith.addf %232, %235 : vector<16x128xf32>
    %237 = arith.addf %218, %236 : vector<16x128xf32>
    %c1_101 = arith.constant 1 : index
    %c0_102 = arith.constant 0 : index
    %c0_103 = arith.constant 0 : index
    %238 = vector.load %arg12[%c1_101, %c0_102, %c0_103] : memref<2x1x128xf32, #tpu.memory_space<vmem>>, vector<1x1x128xf32>
    %239 = vector.shape_cast %238 : vector<1x1x128xf32> to vector<1x128xf32>
    %c1_104 = arith.constant 1 : index
    %c0_105 = arith.constant 0 : index
    %c0_106 = arith.constant 0 : index
    %240 = vector.load %arg13[%c1_104, %c0_105, %c0_106] : memref<2x1x128xf32, #tpu.memory_space<vmem>>, vector<1x1x128xf32>
    %241 = vector.shape_cast %240 : vector<1x1x128xf32> to vector<1x128xf32>
    %cst_107 = arith.constant dense<0.000000e+00> : vector<16xf32>
    %242 = vector.multi_reduction <add>, %237, %cst_107 [1] : vector<16x128xf32> to vector<16xf32>
    %243 = vector.shape_cast %242 : vector<16xf32> to vector<16x1xf32>
    %cst_108 = arith.constant 1.280000e+02 : f32
    %244 = vector.broadcast %cst_108 : f32 to vector<16x1xf32>
    %245 = arith.divf %243, %244 : vector<16x1xf32>
    %246 = vector.broadcast %245 : vector<16x1xf32> to vector<16x128xf32>
    %247 = arith.subf %237, %246 : vector<16x128xf32>
    %248 = arith.mulf %247, %247 : vector<16x128xf32>
    %cst_109 = arith.constant dense<0.000000e+00> : vector<16xf32>
    %249 = vector.multi_reduction <add>, %248, %cst_109 [1] : vector<16x128xf32> to vector<16xf32>
    %250 = vector.shape_cast %249 : vector<16xf32> to vector<16x1xf32>
    %cst_110 = arith.constant 1.280000e+02 : f32
    %251 = vector.broadcast %cst_110 : f32 to vector<16x1xf32>
    %252 = arith.divf %250, %251 : vector<16x1xf32>
    %253 = vector.broadcast %245 : vector<16x1xf32> to vector<16x128xf32>
    %254 = arith.subf %237, %253 : vector<16x128xf32>
    %cst_111 = arith.constant 9.99999997E-7 : f32
    %255 = vector.broadcast %cst_111 : f32 to vector<16x1xf32>
    %256 = arith.addf %252, %255 : vector<16x1xf32>
    %257 = math.rsqrt %256 : vector<16x1xf32>
    %258 = vector.broadcast %257 : vector<16x1xf32> to vector<16x128xf32>
    %259 = arith.mulf %254, %258 : vector<16x128xf32>
    %260 = vector.broadcast %239 : vector<1x128xf32> to vector<16x128xf32>
    %261 = arith.mulf %259, %260 : vector<16x128xf32>
    %262 = vector.broadcast %241 : vector<1x128xf32> to vector<16x128xf32>
    %263 = arith.addf %261, %262 : vector<16x128xf32>
    %264 = vector.shape_cast %263 : vector<16x128xf32> to vector<2x8x128xf32>
    %cst_112 = arith.constant dense<0.000000e+00> : vector<2x128xf32>
    %265 = vector.multi_reduction <add>, %264, %cst_112 [1] : vector<2x8x128xf32> to vector<2x128xf32>
    %cst_113 = arith.constant 0.000000e+00 : f32
    %266 = vector.broadcast %cst_113 : f32 to vector<6x128xf32>
    %267 = tpu.concatenate %265, %266 in 0 : vector<2x128xf32>, vector<6x128xf32> -> vector<8x128xf32>
    %268 = arith.truncf %267 : vector<8x128xf32> to vector<8x128xbf16>
    %c0_114 = arith.constant 0 : index
    %c0_115 = arith.constant 0 : index
    %269 = vector.load %arg14[%c0_114, %c0_115] : memref<128x128xbf16, #tpu.memory_space<vmem>>, vector<128x128xbf16>
    %cst_116 = arith.constant dense<0.000000e+00> : vector<8x128xf32>
    %270 = tpu.matmul %268, %269, %cst_116 {dimension_numbers = #tpu.dot_dimension_numbers<[1], [0], [0], [1], [0, 0, 1, 1], [], []>} : vector<8x128xbf16>, vector<128x128xbf16>, vector<8x128xf32> -> vector<8x128xf32>
    %c0_117 = arith.constant 0 : index
    %c0_118 = arith.constant 0 : index
    %271 = vector.load %arg15[%c0_117, %c0_118] : memref<1x128xf32, #tpu.memory_space<vmem>>, vector<1x128xf32>
    %272 = vector.broadcast %271 : vector<1x128xf32> to vector<8x128xf32>
    %273 = arith.addf %270, %272 : vector<8x128xf32>
    %c0_119 = arith.constant 0 : index
    %c0_120 = arith.constant 0 : index
    %c0_121 = arith.constant 0 : index
    %274 = vector.load %arg16[%c0_119, %c0_120, %c0_121] : memref<1x8x128xf32, #tpu.memory_space<vmem>>, vector<1x8x128xf32>
    %275 = vector.shape_cast %274 : vector<1x8x128xf32> to vector<8x128xf32>
    %276 = vector.shape_cast %273 : vector<8x128xf32> to vector<1x8x128xf32>
    tpu.vector_store %arg16[%c0_119, %c0_120, %c0_121], %276 {strides = array<i32>} : memref<1x8x128xf32, #tpu.memory_space<vmem>>, vector<1x8x128xf32>,
    return
  }
  func.func @transform_0(%arg0: i32) -> (i32, i32, i32) {
    %c0_i32 = arith.constant 0 : i32
    %c0_i32_0 = arith.constant 0 : i32
    %c0_i32_1 = arith.constant 0 : i32
    return %arg0, %c0_i32, %c0_i32_0 : i32, i32, i32
  }
  func.func @transform_1(%arg0: i32) -> (i32, i32, i32) {
    %c0_i32 = arith.constant 0 : i32
    %c0_i32_0 = arith.constant 0 : i32
    %c0_i32_1 = arith.constant 0 : i32
    %c0_i32_2 = arith.constant 0 : i32
    return %c0_i32, %c0_i32_0, %c0_i32_1 : i32, i32, i32
  }
  func.func @transform_2(%arg0: i32) -> (i32, i32, i32) {
    %c0_i32 = arith.constant 0 : i32
    %c0_i32_0 = arith.constant 0 : i32
    %c0_i32_1 = arith.constant 0 : i32
    %c0_i32_2 = arith.constant 0 : i32
    return %c0_i32, %c0_i32_0, %c0_i32_1 : i32, i32, i32
  }
  func.func @transform_3(%arg0: i32) -> (i32, i32, i32) {
    %c0_i32 = arith.constant 0 : i32
    %c0_i32_0 = arith.constant 0 : i32
    %c0_i32_1 = arith.constant 0 : i32
    %c0_i32_2 = arith.constant 0 : i32
    return %c0_i32, %c0_i32_0, %c0_i32_1 : i32, i32, i32
  }
  func.func @transform_4(%arg0: i32) -> (i32, i32, i32) {
    %c0_i32 = arith.constant 0 : i32
    %c0_i32_0 = arith.constant 0 : i32
    %c0_i32_1 = arith.constant 0 : i32
    %c0_i32_2 = arith.constant 0 : i32
    return %c0_i32, %c0_i32_0, %c0_i32_1 : i32, i32, i32
  }
  func.func @transform_5(%arg0: i32) -> (i32, i32, i32) {
    %c0_i32 = arith.constant 0 : i32
    %c0_i32_0 = arith.constant 0 : i32
    %c0_i32_1 = arith.constant 0 : i32
    %c0_i32_2 = arith.constant 0 : i32
    return %c0_i32, %c0_i32_0, %c0_i32_1 : i32, i32, i32
  }
  func.func @transform_6(%arg0: i32) -> (i32, i32, i32) {
    %c0_i32 = arith.constant 0 : i32
    %c0_i32_0 = arith.constant 0 : i32
    %c0_i32_1 = arith.constant 0 : i32
    %c0_i32_2 = arith.constant 0 : i32
    return %c0_i32, %c0_i32_0, %c0_i32_1 : i32, i32, i32
  }
  func.func @transform_7(%arg0: i32) -> (i32, i32, i32) {
    %c0_i32 = arith.constant 0 : i32
    %c0_i32_0 = arith.constant 0 : i32
    %c0_i32_1 = arith.constant 0 : i32
    %c0_i32_2 = arith.constant 0 : i32
    return %c0_i32, %c0_i32_0, %c0_i32_1 : i32, i32, i32
  }
  func.func @transform_8(%arg0: i32) -> (i32, i32, i32) {
    %c0_i32 = arith.constant 0 : i32
    %c0_i32_0 = arith.constant 0 : i32
    %c0_i32_1 = arith.constant 0 : i32
    %c0_i32_2 = arith.constant 0 : i32
    return %c0_i32, %c0_i32_0, %c0_i32_1 : i32, i32, i32
  }
  func.func @transform_9(%arg0: i32) -> (i32, i32, i32) {
    %c0_i32 = arith.constant 0 : i32
    %c0_i32_0 = arith.constant 0 : i32
    %c0_i32_1 = arith.constant 0 : i32
    %c0_i32_2 = arith.constant 0 : i32
    return %c0_i32, %c0_i32_0, %c0_i32_1 : i32, i32, i32
  }
  func.func @transform_10(%arg0: i32) -> (i32, i32, i32) {
    %c0_i32 = arith.constant 0 : i32
    %c0_i32_0 = arith.constant 0 : i32
    %c0_i32_1 = arith.constant 0 : i32
    %c0_i32_2 = arith.constant 0 : i32
    return %c0_i32, %c0_i32_0, %c0_i32_1 : i32, i32, i32
  }
  func.func @transform_11(%arg0: i32) -> (i32, i32, i32) {
    %c0_i32 = arith.constant 0 : i32
    %c0_i32_0 = arith.constant 0 : i32
    %c0_i32_1 = arith.constant 0 : i32
    %c0_i32_2 = arith.constant 0 : i32
    return %c0_i32, %c0_i32_0, %c0_i32_1 : i32, i32, i32
  }
  func.func @transform_12(%arg0: i32) -> (i32, i32, i32) {
    %c0_i32 = arith.constant 0 : i32
    %c0_i32_0 = arith.constant 0 : i32
    %c0_i32_1 = arith.constant 0 : i32
    %c0_i32_2 = arith.constant 0 : i32
    return %c0_i32, %c0_i32_0, %c0_i32_1 : i32, i32, i32
  }
  func.func @transform_13(%arg0: i32) -> (i32, i32) {
    %c0_i32 = arith.constant 0 : i32
    %c0_i32_0 = arith.constant 0 : i32
    %c0_i32_1 = arith.constant 0 : i32
    return %c0_i32, %c0_i32_0 : i32, i32
  }
  func.func @transform_14(%arg0: i32) -> (i32, i32) {
    %c0_i32 = arith.constant 0 : i32
    %c0_i32_0 = arith.constant 0 : i32
    %c0_i32_1 = arith.constant 0 : i32
    return %c0_i32, %c0_i32_0 : i32, i32
  }
  func.func @transform_15(%arg0: i32) -> (i32, i32, i32) {
    %c0_i32 = arith.constant 0 : i32
    %c0_i32_0 = arith.constant 0 : i32
    %c0_i32_1 = arith.constant 0 : i32
    return %arg0, %c0_i32, %c0_i32_0 : i32, i32, i32
  }
}

</mosaic_0001>

<bundles_post_ra>
// kernel: neural_log_forward.1
= control target key start
LH: loop header
LB: loop body
LE: loop exit
PB: predicated region body
PF: predicated region fallthrough
CT: control target
= control target key end

     0   :  { %20 = vsyncpa [#allocation3], 0  ;;  %s5620_s0 = inlined_call_operand.hbm [shape: f32[2,8,128], index: 0, kind: input, shape index: {}]   ;;  %s5621_s1 = inlined_call_operand.hbm [shape: bf16[2,128,384], index: 1, kind: input, shape index: {}]   ;;  %s5622_s2 = inlined_call_operand.vmem [shape: f32[2,1,384], index: 2, kind: input, shape index: {}]   ;;  %s5623_s3 = inlined_call_operand.hbm [shape: bf16[2,128,128], index: 3, kind: input, shape index: {}]   ;;  %s5624_s4 = inlined_call_operand.vmem [shape: f32[2,1,128], index: 4, kind: input, shape index: {}]   ;;  %s5625_s5 = inlined_call_operand.vmem [shape: f32[2,1,128], index: 5, kind: input, shape index: {}]   ;;  %s5626_s6 = inlined_call_operand.vmem [shape: f32[2,1,128], index: 6, kind: input, shape index: {}]   ;;  %s5627_s7 = inlined_call_operand.hbm [shape: bf16[2,128,256], index: 7, kind: input, shape index: {}]   ;;  %s5628_s8 = inlined_call_operand.hbm [shape: f32[2,1,256], index: 8, kind: input, shape index: {}]   ;;  %s5629_s9 = inlined_call_operand.hbm [shape: bf16[2,256,128], index: 9, kind: input, shape index: {}]   ;;  %s5630_s10 = inlined_call_operand.hbm [shape: f32[2,1,128], index: 10, kind: input, shape index: {}]   ;;  %s5631_s11 = inlined_call_operand.vmem [shape: f32[2,1,128], index: 11, kind: input, shape index: {}]   ;;  %s5632_s12 = inlined_call_operand.vmem [shape: f32[2,1,128], index: 12, kind: input, shape index: {}]   ;;  %s5633_s13 = inlined_call_operand.hbm [shape: bf16[128,128], index: 13, kind: input, shape index: {}]   ;;  %s5634_s14 = inlined_call_operand.vmem [shape: f32[1,128], index: 14, kind: input, shape index: {}]   ;;  %s5635_s15 = inlined_call_operand.vmem [shape: f32[1,8,128], index: 15, kind: output, shape index: {}]  }
   0x1   :  { %21 = vsyncpa [#allocation5], 0 }
   0x2   :  { %22 = vsyncpa [#allocation8], 0 }
   0x3   :  { %23 = vsyncpa [#allocation11], 0 }
   0x4   :  { %24 = vsyncpa [#allocation14], 0  ;;  %s4904_s18 = smov [#allocation4]   ;;  %s4718_s22 = scalar_lea.hbm %s5621_s1, 6144 }
   0x5   :  { %s42_s19 = sshll.u32 %s4904_s18, 4  ;;  %p4719_p0 = scmp.ne.s32.totalorder %s5621_s1, %s4718_s22  ;;  %s43_s19 = int_to_ptr.vmem [resolvable:$true] %s42_s19 }
   0x6   :  { %p4722_p1 = scmp.lt.u32.totalorder %s4718_s22, %s5621_s1 }
   0x8   :  { %p4724_p2 = pnand %p4722_p1, %p4719_p0 }
   0xa   :  { %4727 = shalt.err (!%p4724_p2)
}
   0xb   :  { %s4728_s27 = scalar_lea.vmem %s43_s19, 6144  ;;  %p4733_p4 = scmp.lt.s32.totalorder %s43_s19, %s43_s19 }
   0xc   :  { %p4729_p3 = scmp.ne.s32.totalorder %s43_s19, %s4728_s27  ;;  %p4734_p5 = scmp.lt.s32.totalorder %s4728_s27, %s4728_s27 }
   0xe   :  { %p4735_p6 = por %p4734_p5, %p4733_p4 }
  0x10   :  { %p4736_p7 = pnand %p4735_p6, %p4729_p3 }
  0x12   :  { %4739 = shalt.err (!%p4736_p7)
}
  0x13   :  { %s4905_s28 = smov 192   ;;  %s4906_s29 = smov 12  }
  0x14   :  { %48 = dma.hbm_to_vmem [thread:$0]  %s5621_s1, 6144, %s43_s19, [#allocation5], %s4905_s28, %s4905_s28, %s4906_s29  }
  0x15   :  { %s4907_s17 = smov [#allocation7]   ;;  %s4740_s22 = scalar_lea.hbm %s5627_s7, 4096 }
  0x16   :  { %s74_s18 = sshll.u32 %s4907_s17, 4  ;;  %p4741_p8 = scmp.ne.s32.totalorder %s5627_s7, %s4740_s22  ;;  %s75_s18 = int_to_ptr.vmem [resolvable:$true] %s74_s18 }
  0x17   :  { %p4744_p9 = scmp.lt.u32.totalorder %s4740_s22, %s5627_s7 }
  0x19   :  { %p4746_p10 = pnand %p4744_p9, %p4741_p8 }
  0x1b   :  { %4749 = shalt.err (!%p4746_p10)
}
  0x1c   :  { %s4750_s27 = scalar_lea.vmem %s75_s18, 4096  ;;  %p4755_p12 = scmp.lt.s32.totalorder %s75_s18, %s75_s18 }
  0x1d   :  { %p4751_p11 = scmp.ne.s32.totalorder %s75_s18, %s4750_s27  ;;  %p4756_p13 = scmp.lt.s32.totalorder %s4750_s27, %s4750_s27 }
  0x1f   :  { %p4757_p0 = por %p4756_p13, %p4755_p12 }
  0x21   :  { %p4758_p1 = pnand %p4757_p0, %p4751_p11 }
  0x23   :  { %4761 = shalt.err (!%p4758_p1)
}
  0x24   :  { %s4908_s1 = smov 128   ;;  %s4909_s19 = smov 8  }
  0x25   :  { %80 = dma.hbm_to_vmem [thread:$0]  %s5627_s7, 4096, %s75_s18, [#allocation8], %s4908_s1, %s4908_s1, %s4909_s19  }
  0x26   :  { %s4910_s30 = smov [#allocation10]   ;;  %s4911_s17 = smov [#allocation2]  }
  0x27   :  { %s98_s16 = sshll.u32 %s4910_s30, 4  ;;  %s30_s20 = sshll.u32 %s4911_s17, 4  ;;  %s99_s16 = int_to_ptr.vmem [resolvable:$true] %s98_s16  ;;  %s5033_s20 = int_to_ptr.vmem [resolvable:$true] %s30_s20 }
  0x28   :  { %s4762_s23 = scalar_lea.hbm %s5629_s9, 4096 }
  0x29   :  { %p4763_p2 = scmp.ne.s32.totalorder %s5629_s9, %s4762_s23  ;;  %p4766_p3 = scmp.lt.u32.totalorder %s4762_s23, %s5629_s9 }
  0x2b   :  { %p4768_p4 = pnand %p4766_p3, %p4763_p2 }
  0x2d   :  { %4771 = shalt.err (!%p4768_p4)
}
  0x2e   :  { %s4772_s7 = scalar_lea.vmem %s99_s16, 4096  ;;  %p4777_p6 = scmp.lt.s32.totalorder %s99_s16, %s99_s16 }
  0x2f   :  { %p4773_p5 = scmp.ne.s32.totalorder %s99_s16, %s4772_s7  ;;  %p4778_p7 = scmp.lt.s32.totalorder %s4772_s7, %s4772_s7 }
  0x31   :  { %p4779_p8 = por %p4778_p7, %p4777_p6 }
  0x33   :  { %p4780_p9 = pnand %p4779_p8, %p4773_p5 }
  0x35   :  { %4783 = shalt.err (!%p4780_p9)
}
  0x36   :  { %s4912_s18 = smov 64   ;;  %s4913_s28 = smov 4  }
  0x37   :  { %104 = dma.hbm_to_vmem [thread:$0]  %s5629_s9, 4096, %s99_s16, [#allocation11], %s4912_s18, %s4912_s18, %s4913_s28  }
  0x38   :  { %s4784_s22 = scalar_lea.hbm %s5620_s0, 256 }
  0x39   :  { %p4785_p10 = scmp.ne.s32.totalorder %s5620_s0, %s4784_s22  ;;  %p4788_p11 = scmp.lt.u32.totalorder %s4784_s22, %s5620_s0 }
  0x3b   :  { %p4790_p12 = pnand %p4788_p11, %p4785_p10 }
  0x3d   :  { %4793 = shalt.err (!%p4790_p12)
}
  0x3e   :  { %s4794_s27 = scalar_lea.vmem %s5033_s20, 256  ;;  %p4799_p0 = scmp.lt.s32.totalorder %s5033_s20, %s5033_s20 }
  0x3f   :  { %p4795_p13 = scmp.ne.s32.totalorder %s5033_s20, %s4794_s27  ;;  %p4800_p1 = scmp.lt.s32.totalorder %s4794_s27, %s4794_s27 }
  0x41   :  { %p4801_p2 = por %p4800_p1, %p4799_p0 }
  0x43   :  { %p4802_p3 = pnand %p4801_p2, %p4795_p13 }
  0x45   :  { %4805 = shalt.err (!%p4802_p3)
}
  0x46   :  { %36 = dma.hbm_to_vmem [thread:$0]  %s5620_s0, 256, %s5033_s20, [#allocation3], %s4908_s1, %s4908_s1, %s4909_s19  }
  0x47   :  { %s4914_s7 = smov [#allocation6]   ;;  %s4915_s30 = smov [#allocation9]  }
  0x48   :  { %s56_s29 = sshll.u32 %s4914_s7, 4  ;;  %s86_s17 = sshll.u32 %s4915_s30, 4  ;;  %s57_s29 = int_to_ptr.vmem [resolvable:$true] %s56_s29  ;;  %s5070_s17 = int_to_ptr.vmem [resolvable:$true] %s86_s17 }
  0x49   :  { %s4806_s23 = scalar_lea.hbm %s5623_s3, 2048 }
  0x4a   :  { %p4807_p4 = scmp.ne.s32.totalorder %s5623_s3, %s4806_s23  ;;  %p4810_p5 = scmp.lt.u32.totalorder %s4806_s23, %s5623_s3 }
  0x4c   :  { %p4812_p6 = pnand %p4810_p5, %p4807_p4 }
  0x4e   :  { %4815 = shalt.err (!%p4812_p6)
}
  0x4f   :  { %s4816_s0 = scalar_lea.vmem %s57_s29, 2048  ;;  %p4821_p8 = scmp.lt.s32.totalorder %s57_s29, %s57_s29 }
  0x50   :  { %p4817_p7 = scmp.ne.s32.totalorder %s57_s29, %s4816_s0  ;;  %p4822_p9 = scmp.lt.s32.totalorder %s4816_s0, %s4816_s0 }
  0x52   :  { %p4823_p10 = por %p4822_p9, %p4821_p8 }
  0x54   :  { %p4824_p11 = pnand %p4823_p10, %p4817_p7 }
  0x56   :  { %4827 = shalt.err (!%p4824_p11)
}
  0x57   :  { %62 = dma.hbm_to_vmem [thread:$0]  %s5623_s3, 2048, %s57_s29, [#allocation5], %s4912_s18, %s4912_s18, %s4913_s28  }
  0x58   :  { %s4828_s16 = scalar_lea.hbm %s5628_s8, 64 }
  0x59   :  { %p4829_p12 = scmp.ne.s32.totalorder %s5628_s8, %s4828_s16  ;;  %p4832_p13 = scmp.lt.u32.totalorder %s4828_s16, %s5628_s8 }
  0x5b   :  { %p4834_p0 = pnand %p4832_p13, %p4829_p12 }
  0x5d   :  { %4837 = shalt.err (!%p4834_p0)
}
  0x5e   :  { %s4838_s23 = scalar_lea.vmem %s5070_s17, 64  ;;  %p4843_p2 = scmp.lt.s32.totalorder %s5070_s17, %s5070_s17 }
  0x5f   :  { %p4839_p1 = scmp.ne.s32.totalorder %s5070_s17, %s4838_s23  ;;  %p4844_p3 = scmp.lt.s32.totalorder %s4838_s23, %s4838_s23 }
  0x61   :  { %p4845_p4 = por %p4844_p3, %p4843_p2 }
  0x63   :  { %p4846_p5 = pnand %p4845_p4, %p4839_p1 }
  0x65   :  { %4849 = shalt.err (!%p4846_p5)
}
  0x66   :  { %s4916_s3 = smov 32   ;;  %s4917_s29 = smov 2  }
  0x67   :  { %92 = dma.hbm_to_vmem [thread:$0]  %s5628_s8, 64, %s5070_s17, [#allocation8], %s4916_s3, %s4916_s3, %s4917_s29  }
  0x68   :  { %s4918_s26 = smov [#allocation12]   ;;  %s4850_s19 = scalar_lea.hbm %s5630_s10, 32 }
  0x69   :  { %s110_s27 = sshll.u32 %s4918_s26, 4  ;;  %p4851_p6 = scmp.ne.s32.totalorder %s5630_s10, %s4850_s19  ;;  %s111_s27 = int_to_ptr.vmem [resolvable:$true] %s110_s27 }
  0x6a   :  { %p4854_p7 = scmp.lt.u32.totalorder %s4850_s19, %s5630_s10 }
  0x6c   :  { %p4856_p8 = pnand %p4854_p7, %p4851_p6 }
  0x6e   :  { %4859 = shalt.err (!%p4856_p8)
}
  0x6f   :  { %s4860_s30 = scalar_lea.vmem %s111_s27, 32  ;;  %p4865_p10 = scmp.lt.s32.totalorder %s111_s27, %s111_s27 }
  0x70   :  { %p4861_p9 = scmp.ne.s32.totalorder %s111_s27, %s4860_s30  ;;  %p4866_p11 = scmp.lt.s32.totalorder %s4860_s30, %s4860_s30 }
  0x72   :  { %p4867_p12 = por %p4866_p11, %p4865_p10 }
  0x74   :  { %p4868_p13 = pnand %p4867_p12, %p4861_p9 }
  0x76   :  { %4871 = shalt.err (!%p4868_p13)
}
  0x77   :  { %s4919_s8 = smov 16   ;;  %s4920_s17 = smov 1  }
  0x78   :  { %116 = dma.hbm_to_vmem [thread:$0]  %s5630_s10, 32, %s111_s27, [#allocation11], %s4919_s8, %s4919_s8, %s4920_s17  }
  0x79   :  { %s4921_s23 = smov [#allocation13]   ;;  %s4872_s26 = scalar_lea.hbm %s5633_s13, 1024 }
  0x7a   :  { %s126_s29 = sshll.u32 %s4921_s23, 4  ;;  %p4873_p0 = scmp.ne.s32.totalorder %s5633_s13, %s4872_s26  ;;  %s127_s29 = int_to_ptr.vmem [resolvable:$true] %s126_s29 }
  0x7b   :  { %p4876_p1 = scmp.lt.u32.totalorder %s4872_s26, %s5633_s13 }
  0x7d   :  { %p4878_p2 = pnand %p4876_p1, %p4873_p0 }
  0x7f   :  { %4881 = shalt.err (!%p4878_p2)
}
  0x80   :  { %s4882_s9 = scalar_lea.vmem %s127_s29, 1024  ;;  %p4887_p4 = scmp.lt.s32.totalorder %s127_s29, %s127_s29 }
  0x81   :  { %p4883_p3 = scmp.ne.s32.totalorder %s127_s29, %s4882_s9  ;;  %p4888_p5 = scmp.lt.s32.totalorder %s4882_s9, %s4882_s9 }
  0x83   :  { %p4889_p6 = por %p4888_p5, %p4887_p4 }
  0x85   :  { %p4890_p7 = pnand %p4889_p6, %p4883_p3 }
  0x87   :  { %4893 = shalt.err (!%p4890_p7)
}
  0x88   :  { %132 = dma.hbm_to_vmem [thread:$0]  %s5633_s13, 1024, %s127_s29, [#allocation14], %s4912_s18, %s4912_s18, %s4913_s28  }
  0x89   :  { %4894 = dma.done.wait [#allocation3], 256  }
  0x8a   :  { %4895 = vsyncadd [#allocation3], 4294967040 }
  0x8b   :  { %4896 = dma.done.wait [#allocation5], 8192  }
  0x8c   :  { %4897 = vsyncadd [#allocation5], 4294959104 }
  0x8d   :  { %4898 = dma.done.wait [#allocation8], 4160  }
  0x8e   :  { %4899 = vsyncadd [#allocation8], 4294963136 }
  0x8f   :  { %4900 = dma.done.wait [#allocation11], 4128  }
  0x90   :  { %4901 = vsyncadd [#allocation11], 4294963168 }
  0x91   :  { %4902 = dma.done.wait [#allocation14], 1024  }
  0x92   :  { %4903 = vsyncadd [#allocation14], 4294966272  ;;  %v4922_v0 = vmov 0   ;;  %v4923_v1 = vmov 0.0   ;;  %v4468_v2 = vld [vmem:[#allocation4 + $0x4] ss:$12 sps:$4 sm:$0xff]   ;;  %v197_v29 = vlaneseq }
  0x93   :  { %372 = vmatprep.mubr.bf16.mxu0 %v4922_v0  ;;  %4154 = vmatprep.subr.bf16.mxu1 %v4923_v1  ;;  %v4470_v3 = vld [vmem:[#allocation4] ss:$12 sps:$4 sm:$0xff]   ;;  %v4471_v4 = vld [vmem:[#allocation4 + $0x1c] ss:$12 sps:$4 sm:$0xff]   ;;  %v4473_v5 = vld [vmem:[#allocation4 + $0x18] ss:$12 sps:$4 sm:$0xff]  }
  0x94   :  { %340 = vmatprep.subr.bf16.mxu0 %v4468_v2  ;;  %v4474_v6 = vld [vmem:[#allocation4 + $0x34] ss:$12 sps:$4 sm:$0xff]   ;;  %v4476_v7 = vld [vmem:[#allocation4 + $0x30] ss:$12 sps:$4 sm:$0xff]   ;;  %v4477_v8 = vld [vmem:[#allocation4 + $0x4c] ss:$12 sps:$4 sm:$0xff]  }
  0x95   :  { %341 = vmatpush1.bf16.msra.mxu0 %v4470_v3  ;;  %v4479_v9 = vld [vmem:[#allocation4 + $0x48] ss:$12 sps:$4 sm:$0xff]   ;;  %v4480_v10 = vld [vmem:[#allocation4 + $0x64] ss:$12 sps:$4 sm:$0xff]   ;;  %v4493_v12 = vld [vmem:[#allocation4 + $0x20] ss:$12 sps:$4 sm:$0xff]  }
  0x96   :  { %342 = vmatprep.subr.bf16.mxu0 %v4471_v4  ;;  %v4492_v11 = vld [vmem:[#allocation4 + $0x8] ss:$12 sps:$4 sm:$0xff]   ;;  %v4482_v13 = vld [vmem:[#allocation4 + $0x60] ss:$12 sps:$4 sm:$0xff]   ;;  %v4485_v15 = vld [vmem:[#allocation4 + $0x78] ss:$12 sps:$4 sm:$0xff]  }
  0x97   :  { %4155 = vmatpush3.bf16.msra.mxu1 %v4492_v11  ;;  %v4483_v14 = vld [vmem:[#allocation4 + $0x7c] ss:$12 sps:$4 sm:$0xff]   ;;  %v4486_v16 = vld [vmem:[#allocation4 + $0x94] ss:$12 sps:$4 sm:$0xff]   ;;  %v4494_v17 = vld [vmem:[#allocation4 + $0x38] ss:$12 sps:$4 sm:$0xff]  }
  0x98   :  { %4156 = vmatprep.subr.bf16.mxu1 %v4923_v1  ;;  %v4495_v18 = vld [vmem:[#allocation4 + $0x50] ss:$12 sps:$4 sm:$0xff]   ;;  %v4489_v20 = vld [vmem:[#allocation4 + $0xac] ss:$12 sps:$4 sm:$0xff]   ;;  %v4496_v21 = vld [vmem:[#allocation4 + $0x68] ss:$12 sps:$4 sm:$0xff]  }
  0x99   :  { %343 = vmatpush1.bf16.msra.mxu0 %v4473_v5  ;;  %v4488_v19 = vld [vmem:[#allocation4 + $0x90] ss:$12 sps:$4 sm:$0xff]   ;;  %v4491_v22 = vld [vmem:[#allocation4 + $0xa8] ss:$12 sps:$4 sm:$0xff]   ;;  %v4497_v25 = vld [vmem:[#allocation4 + $0x80] ss:$12 sps:$4 sm:$0xff]  }
  0x9a   :  { %344 = vmatprep.subr.bf16.mxu0 %v4474_v6  ;;  %v160_v23 = vld [vmem:[#allocation2] sm:$0xff]  ;;  %v161_v24 = vld [vmem:[#allocation2 + $0x8] sm:$0xff]  ;;  %vm4924_vm0 = vmmov 0   ;;  %v5150_v30 = vshrl.u32 %v197_v29, 7  ;;  %vm478_vm1 = vcmask 261120   ;;  %s4925_s16 = smov 96  }
  0x9b   :  { %4157 = vmatpush3.bf16.msra.mxu1 %v4493_v12  ;;  %v162_v26 = vpack.c.bf16 %v161_v24, %v160_v23  ;;  %v4498_v27 = vld [vmem:[#allocation4 + $0x98] ss:$12 sps:$4 sm:$0xff]   ;;  %v4499_v28 = vld [vmem:[#allocation4 + $0xb0] ss:$12 sps:$4 sm:$0xff]   ;;  %4170 = vmatprep.mubr.msk.bf16.mxu1 %vm4924_vm0, %v4923_v1  ;;  %vm955_vm2 = vcmask 1043456   ;;  %vm855_vm3 = vcmask 64512  }
  0x9c   :  { %4158 = vmatprep.subr.bf16.mxu1 %v4923_v1  ;;  %v5153_v31 = vsub.s32 0, %v5150_v30  ;;  %v195_v32 = vld [vmem:[%s5622_s2] sm:$0x7]  ;;  %v5159_v33 = vsub.s32 1, %v5150_v30  ;;  %v207_v61 = vsub.s32 2, %v5150_v30  ;;  %vm1353_vm4 = vcmask 523264  }
  0x9d   :  { %345 = vmatpush1.bf16.msra.mxu0 %v4476_v7  ;;  %vm1358_vm5 = vcmask 785408   ;;  %vm3658_vm6 = vcmask 1041409   ;;  %vm3661_vm7 = vcmask 1041408  }
  0x9e   :  { %346 = vmatprep.subr.bf16.mxu0 %v4477_v8  ;;  %v200_v34 = vrot.slane %v195_v32, %v5153_v31  ;;  %v204_v35 = vrot.slane %v195_v32, %v5159_v33  ;;  %v208_v2 = vrot.slane %v195_v32, %v207_v61  ;;  %vm3986_vm8 = vmpackc.low %vm3661_vm7, %vm3661_vm7 }
  0x9f   :  { %4159 = vmatpush3.bf16.msra.mxu1 %v4494_v17 }
  0xa0   :  { %4160 = vmatprep.subr.bf16.mxu1 %v4923_v1 }
  0xa1   :  { %347 = vmatpush1.bf16.msra.mxu0 %v4479_v9 }
  0xa2   :  { %348 = vmatprep.subr.bf16.mxu0 %v4480_v10 }
  0xa3   :  { %4161 = vmatpush3.bf16.msra.mxu1 %v4495_v18 }
  0xa4   :  { %4162 = vmatprep.subr.bf16.mxu1 %v4923_v1 }
  0xa5   :  { %349 = vmatpush1.bf16.msra.mxu0 %v4482_v13 }
  0xa6   :  { %350 = vmatprep.subr.bf16.mxu0 %v4483_v14 }
  0xa7   :  { %4163 = vmatpush3.bf16.msra.mxu1 %v4496_v21 }
  0xa8   :  { %4164 = vmatprep.subr.bf16.mxu1 %v4923_v1 }
  0xa9   :  { %351 = vmatpush1.bf16.msra.mxu0 %v4485_v15 }
  0xaa   :  { %352 = vmatprep.subr.bf16.mxu0 %v4486_v16 }
  0xab   :  { %4165 = vmatpush3.bf16.msra.mxu1 %v4497_v25 }
  0xac   :  { %4166 = vmatprep.subr.bf16.mxu1 %v4923_v1 }
  0xad   :  { %353 = vmatpush1.bf16.msra.mxu0 %v4488_v19 }
  0xae   :  { %354 = vmatprep.subr.bf16.mxu0 %v4489_v20 }
  0xaf   :  { %4167 = vmatpush3.bf16.msra.mxu1 %v4498_v27 }
  0xb0   :  { %4168 = vmatprep.subr.bf16.mxu1 %v4923_v1 }
  0xb1   :  { %355 = vmatpush1.bf16.msra.mxu0 %v4491_v22 }
  0xb2   :  { %4174 = vmatprep.subr.bf16.mxu0 %v4923_v1 }
  0xb3   :  { %4169 = vmatpush3.bf16.msra.mxu1 %v4499_v28 }
  0xb4   :  { %373 = vmatmul.mubr.bf16.vlgmr.msra.gmra.mrb[0].mxu0 %v162_v26  ;;  %4180 = vmatprep.subr.bf16.mxu1 %v4923_v1 }
  0xb5   :  { %4176 = vmatprep.mubr.msk.bf16.mxu0 %vm4924_vm0, %v4923_v1 }
  0xb6   :  { %4171 = vmatmul.mubr.bf16.vlgmr.msra.gmra.mrb[0].mxu1 %v162_v26 }
  0xb7   :  { %4182 = vmatprep.mubr.msk.bf16.mxu1 %vm4924_vm0, %v4923_v1 }
 0x187   :  { %v374_v36 = vpop.f32.mrb[0].mxu0 }
 0x188   :  { %v375_v37 = vadd.f32 %v374_v36, %v200_v34  ;;  %v376_v38 = vpop.f32.mrb[1].mxu0 }
 0x189   :  { %v377_v39 = vadd.f32 %v376_v38, %v204_v35  ;;  %v378_v40 = vpop.f32.mrb[2].mxu0  ;;  %v417_v50 = vpop.f32.mrb[0].mxu1 }
 0x18a   :  { %v3989_v41 = vpack.c.bf16 %v375_v37, %v375_v37  ;;  %v379_v42 = vadd.f32 %v378_v40, %v200_v34  ;;  %v380_v43 = vpop.f32.mrb[3].mxu0  ;;  %v4172_v51 = vpop.f32.mrb[1].mxu1  ;;  %v418_v6 = vadd.f32 %v417_v50, %v208_v2 }
 0x18b   :  { %v3991_v44 = vpack.c.bf16 %v377_v39, %v377_v39  ;;  %v381_v45 = vadd.f32 %v380_v43, %v204_v35  ;;  %v420_v52 = vpop.f32.mrb[2].mxu1 }
 0x18c   :  { %432 = vrot.lane.b32.xlu1 %v3989_v41, %s4925_s16  ;;  %v3990_v48 = vpack.c.bf16 %v379_v42, %v379_v42  ;;  %v4173_v53 = vpop.f32.mrb[3].mxu1  ;;  %v5206_v10 = vpack.c.bf16 %v418_v6, %v418_v6  ;;  %v421_v11 = vadd.f32 %v420_v52, %v208_v2 }
 0x18d   :  { %v3992_v46 = vpack.c.bf16 %v381_v45, %v381_v45  ;;  %449 = vrot.lane.b32.xlu0 %v3991_v44, %s4925_s16  ;;  %v483_v47 = vsel %vm478_vm1, %v3991_v44, 0 }
 0x18e   :  { %4175 = vmatpush3.bf16.xpose.msra.mxu0 %v483_v47  ;;  %v5213_v13 = vpack.c.bf16 %v421_v11, %v421_v11  ;;  %v957_v14 = vsel %vm955_vm2, %v5206_v10, 0 }
 0x18f   :  { %v529_v49 = vsel %vm478_vm1, %v3992_v46, 0  ;;  %4186 = vmatprep.subr.bf16.mxu0 %v4923_v1 }
 0x190   :  { %4181 = vmatpush3.bf16.xpose.msra.mxu1 %v529_v49  ;;  %434 = vrot.lane.b32.xlu1 %v3990_v48, %s4925_s16  ;;  %v1003_v16 = vsel %vm955_vm2, %v5213_v13, 0 }
 0x191   :  { %451 = vrot.lane.b32.xlu0 %v3992_v46, %s4925_s16  ;;  %4192 = vmatprep.subr.bf16.mxu1 %v4923_v1 }
 0x194   :  { %455 = vrot.lane.b32.xlu1 %v3992_v46, %s4912_s18 }
 0x195   :  { %453 = vrot.lane.b32.xlu0 %v3991_v44, %s4912_s18  ;;  %4177 = vmatmul.mubr.msk.bf16.vlgmr.msra.gmra.mrb[4].mxu0 %vm478_vm1, %v3989_v41 }
 0x196   :  { %4188 = vmatprep.mubr.msk.bf16.mxu0 %vm4924_vm0, %v4923_v1 }
 0x197   :  { %4183 = vmatmul.mubr.msk.bf16.vlgmr.msra.gmra.mrb[4].mxu1 %vm478_vm1, %v3990_v48 }
 0x198   :  { %438 = vrot.lane.b32.xlu1 %v3990_v48, %s4912_s18  ;;  %4194 = vmatprep.mubr.msk.bf16.mxu1 %vm4924_vm0, %v4923_v1 }
 0x199   :  { %436 = vrot.lane.b32.xlu0 %v3989_v41, %s4912_s18 }
 0x19c   :  { %459 = vrot.lane.b32.xlu1 %v3992_v46, %s4916_s3 }
 0x19d   :  { %457 = vrot.lane.b32.xlu0 %v3991_v44, %s4916_s3 }
 0x1a0   :  { %442 = vrot.lane.b32.xlu1 %v3990_v48, %s4916_s3 }
 0x1a1   :  { %440 = vrot.lane.b32.xlu0 %v3989_v41, %s4916_s3 }
 0x1fe   :  { %v433_v54 = vpop.permute.xlu1 %432 }
 0x1ff   :  { %v450_v55 = vpop.permute.xlu0 %449 }
 0x200   :  { %v575_v56 = vsel %vm478_vm1, %v450_v55, 0 }
 0x201   :  { %4187 = vmatpush3.bf16.xpose.msra.mxu0 %v575_v56 }
 0x202   :  { %v435_v57 = vpop.permute.xlu1 %434  ;;  %4198 = vmatprep.subr.bf16.mxu0 %v4923_v1 }
 0x203   :  { %v452_v58 = vpop.permute.xlu0 %451 }
 0x204   :  { %v621_v59 = vsel %vm478_vm1, %v452_v58, 0 }
 0x205   :  { %4193 = vmatpush3.bf16.xpose.msra.mxu1 %v621_v59 }
 0x206   :  { %v456_v60 = vpop.permute.xlu1 %455  ;;  %4204 = vmatprep.subr.bf16.mxu1 %v4923_v1 }
 0x207   :  { %v454_v62 = vpop.permute.xlu0 %453  ;;  %v713_v5 = vsel %vm478_vm1, %v456_v60, 0 }
 0x208   :  { %v667_v63 = vsel %vm478_vm1, %v454_v62, 0  ;;  %4189 = vmatmul.mubr.msk.bf16.vlgmr.msra.gmra.mrb[8].mxu0 %vm478_vm1, %v433_v54 }
 0x209   :  { %4199 = vmatpush3.bf16.xpose.msra.mxu0 %v667_v63  ;;  %4200 = vmatprep.mubr.msk.bf16.mxu0 %vm4924_vm0, %v4923_v1 }
 0x20a   :  { %4210 = vmatprep.subr.bf16.mxu0 %v4923_v1  ;;  %v439_v3 = vpop.permute.xlu1 %438 }
 0x20b   :  { %v437_v4 = vpop.permute.xlu0 %436 }
 0x20c   :  { %4195 = vmatmul.mubr.msk.bf16.vlgmr.msra.gmra.mrb[8].mxu1 %vm478_vm1, %v435_v57 }
 0x20d   :  { %4205 = vmatpush3.bf16.xpose.msra.mxu1 %v713_v5  ;;  %4206 = vmatprep.mubr.msk.bf16.mxu1 %vm4924_vm0, %v4923_v1 }
 0x20e   :  { %4216 = vmatprep.subr.bf16.mxu1 %v4923_v1  ;;  %v460_v9 = vpop.permute.xlu1 %459 }
 0x20f   :  { %v458_v7 = vpop.permute.xlu0 %457  ;;  %v805_v12 = vsel %vm478_vm1, %v460_v9, 0 }
 0x210   :  { %v759_v8 = vsel %vm478_vm1, %v458_v7, 0  ;;  %4201 = vmatmul.mubr.msk.bf16.vlgmr.msra.gmra.mrb[12].mxu0 %vm478_vm1, %v437_v4 }
 0x211   :  { %4211 = vmatpush3.bf16.xpose.msra.mxu0 %v759_v8  ;;  %4212 = vmatprep.mubr.msk.bf16.mxu0 %vm4924_vm0, %v4923_v1 }
 0x212   :  { %4222 = vmatprep.subr.bf16.mxu0 %v4923_v1  ;;  %v443_v17 = vpop.permute.xlu1 %442 }
 0x213   :  { %v441_v15 = vpop.permute.xlu0 %440 }
 0x214   :  { %4207 = vmatmul.mubr.msk.bf16.vlgmr.msra.gmra.mrb[12].mxu1 %vm478_vm1, %v439_v3 }
 0x215   :  { %4217 = vmatpush3.bf16.xpose.msra.mxu1 %v805_v12  ;;  %4218 = vmatprep.mubr.msk.bf16.mxu1 %vm4924_vm0, %v4923_v1 }
 0x216   :  { %4228 = vmatprep.subr.bf16.mxu1 %v4923_v1 }
 0x218   :  { %4213 = vmatmul.mubr.msk.bf16.vlgmr.msra.gmra.mrb[16].mxu0 %vm478_vm1, %v441_v15 }
 0x219   :  { %4223 = vmatpush3.bf16.msra.mxu0 %v957_v14  ;;  %4224 = vmatprep.mubr.msk.bf16.mxu0 %vm4924_vm0, %v4923_v1 }
 0x21a   :  { %4234 = vmatprep.subr.bf16.mxu0 %v4923_v1 }
 0x21c   :  { %4219 = vmatmul.mubr.msk.bf16.vlgmr.msra.gmra.mrb[16].mxu1 %vm478_vm1, %v443_v17 }
 0x21d   :  { %4229 = vmatpush3.bf16.msra.mxu1 %v1003_v16  ;;  %4230 = vmatprep.mubr.msk.bf16.mxu1 %vm4924_vm0, %v4923_v1 }
 0x21e   :  { %4240 = vmatprep.subr.bf16.mxu1 %v4923_v1 }
 0x268   :  { %v519_v18 = vpop.f32.mrb[4].mxu0 }
 0x269   :  { %v5228_v19 = vmul.f32 0.17677669, %v519_v18  ;;  %v4178_v20 = vpop.f32.mrb[5].mxu0 }
 0x26a   :  { %v522_v21 = vpop.f32.mrb[6].mxu0  ;;  %v565_v22 = vpop.f32.mrb[4].mxu1 }
 0x26b   :  { %v848_v23 = vmul.f32 0.17677669, %v565_v22  ;;  %v4179_v24 = vpop.f32.mrb[7].mxu0  ;;  %v4184_v25 = vpop.f32.mrb[5].mxu1  ;;  %v856_v26 = vsel %vm855_vm3, %v5228_v19, -inf }
 0x26c   :  { %v568_v27 = vpop.f32.mrb[6].mxu1  ;;  %857 = vmax.xlane.f32.xlu0 %v856_v26 }
 0x26d   :  { %v4185_v28 = vpop.f32.mrb[7].mxu1  ;;  %v859_v29 = vsel %vm855_vm3, %v848_v23, -inf }
 0x26e   :  { %860 = vmax.xlane.f32.xlu1 %v859_v29 }
 0x2db   :  { %v611_v32 = vpop.f32.mrb[8].mxu0 }
 0x2dc   :  { %v849_v34 = vmul.f32 0.17677669, %v611_v32  ;;  %v4190_v35 = vpop.f32.mrb[9].mxu0 }
 0x2dd   :  { %v614_v36 = vpop.f32.mrb[10].mxu0 }
 0x2de   :  { %v4191_v37 = vpop.f32.mrb[11].mxu0  ;;  %v862_v38 = vsel %vm855_vm3, %v849_v34, -inf }
 0x2df   :  { %v657_v39 = vpop.f32.mrb[8].mxu1  ;;  %863 = vmax.xlane.f32.xlu0 %v862_v38 }
 0x2e0   :  { %v850_v40 = vmul.f32 0.17677669, %v657_v39  ;;  %v4196_v41 = vpop.f32.mrb[9].mxu1 }
 0x2e1   :  { %v660_v42 = vpop.f32.mrb[10].mxu1 }
 0x2e2   :  { %v4197_v43 = vpop.f32.mrb[11].mxu1  ;;  %v865_v44 = vsel %vm855_vm3, %v850_v40, -inf }
 0x2e3   :  { %866 = vmax.xlane.f32.xlu0 %v865_v44  ;;  %v703_v45 = vpop.f32.mrb[12].mxu0 }
 0x2e4   :  { %v5235_v46 = vmul.f32 0.17677669, %v703_v45  ;;  %v4202_v47 = vpop.f32.mrb[13].mxu0 }
 0x2e5   :  { %v706_v48 = vpop.f32.mrb[14].mxu0 }
 0x2e6   :  { %v4203_v49 = vpop.f32.mrb[15].mxu0  ;;  %v868_v50 = vsel %vm855_vm3, %v5235_v46, -inf }
 0x2e7   :  { %v749_v51 = vpop.f32.mrb[12].mxu1  ;;  %869 = vmax.xlane.f32.xlu1 %v868_v50 }
 0x2e8   :  { %v5239_v52 = vmul.f32 0.17677669, %v749_v51  ;;  %v4208_v53 = vpop.f32.mrb[13].mxu1 }
 0x2e9   :  { %v752_v54 = vpop.f32.mrb[14].mxu1 }
 0x2ea   :  { %v4209_v55 = vpop.f32.mrb[15].mxu1  ;;  %v871_v56 = vsel %vm855_vm3, %v5239_v52, -inf }
 0x2eb   :  { %872 = vmax.xlane.f32.xlu0 %v871_v56  ;;  %v795_v57 = vpop.f32.mrb[16].mxu0 }
 0x2ec   :  { %v853_v58 = vmul.f32 0.17677669, %v795_v57  ;;  %v4214_v59 = vpop.f32.mrb[17].mxu0 }
 0x2ed   :  { %v798_v60 = vpop.f32.mrb[18].mxu0 }
 0x2ee   :  { %v4215_v62 = vpop.f32.mrb[19].mxu0  ;;  %v874_v63 = vsel %vm855_vm3, %v853_v58, -inf }
 0x2ef   :  { %v841_v2 = vpop.f32.mrb[16].mxu1  ;;  %875 = vmax.xlane.f32.xlu1 %v874_v63 }
 0x2f0   :  { %v854_v3 = vmul.f32 0.17677669, %v841_v2  ;;  %v4220_v4 = vpop.f32.mrb[17].mxu1 }
 0x2f1   :  { %v844_v5 = vpop.f32.mrb[18].mxu1 }
 0x2f2   :  { %v4221_v6 = vpop.f32.mrb[19].mxu1  ;;  %v877_v7 = vsel %vm855_vm3, %v854_v3, -inf }
 0x2f3   :  { %878 = vmax.xlane.f32.xlu0 %v877_v7 }
 0x2f9   :  { %v858_v14 = vpop.xlane.xlu0 %857 }
 0x2fa   :  { %v880_v16 = vsub.f32 %v5228_v19, %v858_v14 }
 0x2fb   :  { %v861_v8 = vpop.xlane.xlu1 %860 }
 0x2fc   :  { %v881_v9 = vsub.f32 %v848_v23, %v861_v8  ;;  %v888_v17 = vmul.f32 1.442695, %v880_v16 }
 0x2fe   :  { %v890_v11 = vmul.f32 1.442695, %v881_v9 }
 0x300   :  { %4636 = vpow2.f32 %v890_v11  ;;  %466 = vrot.lane.b32.xlu1 %v5206_v10, %s4925_s16 }
 0x301   :  { %4638 = vpow2.f32 %v888_v17 }
 0x30a   :  { %v4637_v12 = vpop.eup %4636 }
 0x30b   :  { %v907_v15 = vsel %vm855_vm3, %v4637_v12, 0.0  ;;  %v4639_v18 = vpop.eup %4638 }
 0x30c   :  { %908 = vadd.xlane.f32.xlu0 %v907_v15  ;;  %v904_v20 = vsel %vm855_vm3, %v4639_v18, 0.0 }
 0x324   :  { %905 = vadd.xlane.f32.xlu1 %v904_v20 }
 0x36c   :  { %v864_v21 = vpop.xlane.xlu0 %863 }
 0x36d   :  { %v882_v22 = vsub.f32 %v849_v34, %v864_v21 }
 0x36f   :  { %v892_v23 = vmul.f32 1.442695, %v882_v22 }
 0x370   :  { %v867_v24 = vpop.xlane.xlu0 %866 }
 0x371   :  { %4640 = vpow2.f32 %v892_v23  ;;  %v883_v25 = vsub.f32 %v850_v40, %v867_v24 }
 0x373   :  { %v894_v26 = vmul.f32 1.442695, %v883_v25 }
 0x374   :  { %v870_v36 = vpop.xlane.xlu1 %869 }
 0x375   :  { %4642 = vpow2.f32 %v894_v26  ;;  %v884_v37 = vsub.f32 %v5235_v46, %v870_v36 }
 0x377   :  { %v896_v40 = vmul.f32 1.442695, %v884_v37 }
 0x378   :  { %v873_v32 = vpop.xlane.xlu0 %872 }
 0x379   :  { %v885_v38 = vsub.f32 %v5239_v52, %v873_v32 }
 0x37b   :  { %v5250_v27 = vpop.eup %4640  ;;  %v898_v43 = vmul.f32 1.442695, %v885_v38 }
 0x37c   :  { %v910_v28 = vsel %vm855_vm3, %v5250_v27, 0.0  ;;  %v876_v39 = vpop.xlane.xlu1 %875 }
 0x37d   :  { %911 = vadd.xlane.f32.xlu1 %v910_v28  ;;  %v886_v41 = vsub.f32 %v853_v58, %v876_v39 }
 0x37f   :  { %v5254_v19 = vpop.eup %4642  ;;  %v900_v47 = vmul.f32 1.442695, %v886_v41 }
 0x380   :  { %v913_v29 = vsel %vm855_vm3, %v5254_v19, 0.0  ;;  %v879_v34 = vpop.xlane.xlu0 %878  ;;  %v467_v46 = vpop.permute.xlu1 %466 }
 0x381   :  { %914 = vadd.xlane.f32.xlu0 %v913_v29  ;;  %v887_v44 = vsub.f32 %v854_v3, %v879_v34  ;;  %v1049_v63 = vsel %vm955_vm2, %v467_v46, 0 }
 0x383   :  { %v902_v49 = vmul.f32 1.442695, %v887_v44 }
 0x38e   :  { %470 = vrot.lane.b32.xlu1 %v5206_v10, %s4912_s18 }
 0x392   :  { %472 = vrot.lane.b32.xlu1 %v5213_v13, %s4912_s18 }
 0x397   :  { %468 = vrot.lane.b32.xlu0 %v5213_v13, %s4925_s16 }
 0x399   :  { %v909_v35 = vpop.xlane.xlu0 %908 }
 0x39a   :  { %4644 = vrcp.f32 %v909_v35 }
 0x39b   :  { %4646 = vpow2.f32 %v896_v40 }
 0x39c   :  { %4648 = vpow2.f32 %v898_v43 }
 0x39d   :  { %4650 = vpow2.f32 %v900_v47 }
 0x39e   :  { %4652 = vpow2.f32 %v902_v49  ;;  %v4501_v49 = vld [vmem:[#allocation6 + $0x8] sm:$0xff]  }
 0x3a4   :  { %v4645_v42 = vpop.eup %4644 }
 0x3a5   :  { %v937_v45 = vmul.f32 %v4645_v42, %v4637_v12  ;;  %v4647_v50 = vpop.eup %4646 }
 0x3a6   :  { %v4649_v52 = vpop.eup %4648  ;;  %v916_v55 = vsel %vm855_vm3, %v4647_v50, 0.0 }
 0x3a7   :  { %v945_v48 = vpack.c.bf16 %v937_v45, %v937_v45  ;;  %v5269_v53 = vpop.eup %4650  ;;  %v919_v54 = vsel %vm855_vm3, %v4649_v52, 0.0 }
 0x3a8   :  { %v5273_v56 = vpop.eup %4652  ;;  %v922_v58 = vsel %vm855_vm3, %v5269_v53, 0.0 }
 0x3a9   :  { %4231 = vmatmul.mubr.msk.bf16.vlgmr.msra.gmra.mrb[20].mxu1 %vm855_vm3, %v945_v48  ;;  %v925_v57 = vsel %vm855_vm3, %v5273_v56, 0.0  ;;  %v4500_v48 = vld [vmem:[#allocation6] sm:$0xff]  }
 0x3aa   :  { %4242 = vmatprep.mubr.msk.bf16.mxu1 %vm4924_vm0, %v4923_v1 }
 0x3b1   :  { %v906_v51 = vpop.xlane.xlu1 %905 }
 0x3b2   :  { %4654 = vrcp.f32 %v906_v51 }
 0x3b6   :  { %920 = vadd.xlane.f32.xlu0 %v919_v54  ;;  %917 = vadd.xlane.f32.xlu1 %v916_v55 }
 0x3ba   :  { %926 = vadd.xlane.f32.xlu0 %v925_v57  ;;  %923 = vadd.xlane.f32.xlu1 %v922_v58 }
 0x3bc   :  { %v4655_v59 = vpop.eup %4654 }
 0x3bd   :  { %v936_v60 = vmul.f32 %v4655_v59, %v4639_v18 }
 0x3bf   :  { %v944_v62 = vpack.c.bf16 %v936_v60, %v936_v60 }
 0x3c1   :  { %4225 = vmatmul.mubr.msk.bf16.vlgmr.msra.gmra.mrb[20].mxu0 %vm855_vm3, %v944_v62  ;;  %v4504_v62 = vld [vmem:[#allocation6 + $0x20] sm:$0xff]  }
 0x3c2   :  { %4235 = vmatpush3.bf16.msra.mxu0 %v1049_v63  ;;  %4236 = vmatprep.mubr.msk.bf16.mxu0 %vm4924_vm0, %v4923_v1  ;;  %v4505_v63 = vld [vmem:[#allocation6 + $0x28] sm:$0xff]  }
 0x3c3   :  { %4246 = vmatprep.subr.bf16.mxu0 %v4923_v1 }
 0x3cb   :  { %476 = vrot.lane.b32.xlu1 %v5213_v13, %s4916_s3 }
 0x3d0   :  { %474 = vrot.lane.b32.xlu0 %v5206_v10, %s4916_s3 }
 0x40a   :  { %v912_v2 = vpop.xlane.xlu1 %911 }
 0x40b   :  { %4656 = vrcp.f32 %v912_v2  ;;  %v4506_v2 = vld [vmem:[#allocation6 + $0x30] sm:$0xff]  }
 0x40e   :  { %v915_v3 = vpop.xlane.xlu0 %914  ;;  %v471_v7 = vpop.permute.xlu1 %470 }
 0x40f   :  { %4658 = vrcp.f32 %v915_v3  ;;  %v1141_v10 = vsel %vm955_vm2, %v471_v7, 0  ;;  %v4507_v3 = vld [vmem:[#allocation6 + $0x38] sm:$0xff]  }
 0x412   :  { %v469_v4 = vpop.permute.xlu0 %468  ;;  %v473_v12 = vpop.permute.xlu1 %472 }
 0x413   :  { %v1095_v5 = vsel %vm955_vm2, %v469_v4, 0  ;;  %v1187_v15 = vsel %vm955_vm2, %v473_v12, 0 }
 0x414   :  { %4241 = vmatpush3.bf16.msra.mxu1 %v1095_v5 }
 0x415   :  { %v4657_v6 = vpop.eup %4656  ;;  %4252 = vmatprep.subr.bf16.mxu1 %v4923_v1 }
 0x416   :  { %v938_v8 = vmul.f32 %v4657_v6, %v5250_v27 }
 0x418   :  { %v946_v9 = vpack.c.bf16 %v938_v8, %v938_v8 }
 0x419   :  { %v4659_v11 = vpop.eup %4658 }
 0x41a   :  { %v939_v13 = vmul.f32 %v4659_v11, %v5254_v19  ;;  %4237 = vmatmul.mubr.msk.bf16.vlgmr.msra.gmra.mrb[24].mxu0 %vm855_vm3, %v946_v9 }
 0x41b   :  { %4247 = vmatpush3.bf16.msra.mxu0 %v1141_v10  ;;  %4248 = vmatprep.mubr.msk.bf16.mxu0 %vm4924_vm0, %v4923_v1 }
 0x41c   :  { %v947_v14 = vpack.c.bf16 %v939_v13, %v939_v13  ;;  %4258 = vmatprep.subr.bf16.mxu0 %v4923_v1 }
 0x41e   :  { %4243 = vmatmul.mubr.msk.bf16.vlgmr.msra.gmra.mrb[24].mxu1 %vm855_vm3, %v947_v14 }
 0x41f   :  { %4253 = vmatpush3.bf16.msra.mxu1 %v1187_v15  ;;  %4254 = vmatprep.mubr.msk.bf16.mxu1 %vm4924_vm0, %v4923_v1 }
 0x420   :  { %4264 = vmatprep.subr.bf16.mxu1 %v4923_v1 }
 0x443   :  { %v921_v16 = vpop.xlane.xlu0 %920  ;;  %v918_v17 = vpop.xlane.xlu1 %917 }
 0x444   :  { %4660 = vrcp.f32 %v921_v16 }
 0x445   :  { %4662 = vrcp.f32 %v918_v17 }
 0x447   :  { %v927_v18 = vpop.xlane.xlu0 %926  ;;  %v924_v20 = vpop.xlane.xlu1 %923 }
 0x448   :  { %4664 = vrcp.f32 %v927_v18 }
 0x449   :  { %4666 = vrcp.f32 %v924_v20 }
 0x44b   :  { %v477_v25 = vpop.permute.xlu1 %476  ;;  %v475_v26 = vpop.permute.xlu0 %474 }
 0x44c   :  { %v1279_v32 = vsel %vm955_vm2, %v477_v25, 0  ;;  %v1233_v34 = vsel %vm955_vm2, %v475_v26, 0 }
 0x44e   :  { %v4661_v21 = vpop.eup %4660 }
 0x44f   :  { %v4663_v22 = vpop.eup %4662  ;;  %v941_v23 = vmul.f32 %v4661_v21, %v4649_v52 }
 0x450   :  { %v940_v24 = vmul.f32 %v4663_v22, %v4647_v50  ;;  %v4502_v50 = vld [vmem:[#allocation6 + $0x10] sm:$0xff]  }
 0x451   :  { %v949_v27 = vpack.c.bf16 %v941_v23, %v941_v23 }
 0x452   :  { %v4665_v28 = vpop.eup %4664  ;;  %v948_v19 = vpack.c.bf16 %v940_v24, %v940_v24 }
 0x453   :  { %v4667_v29 = vpop.eup %4666  ;;  %4255 = vmatmul.mubr.msk.bf16.vlgmr.msra.gmra.mrb[28].mxu1 %vm855_vm3, %v949_v27  ;;  %v943_v35 = vmul.f32 %v4665_v28, %v5273_v56  ;;  %v4503_v56 = vld [vmem:[#allocation6 + $0x18] sm:$0xff]  }
 0x454   :  { %4249 = vmatmul.mubr.msk.bf16.vlgmr.msra.gmra.mrb[28].mxu0 %vm855_vm3, %v948_v19  ;;  %4265 = vmatpush3.bf16.msra.mxu1 %v1279_v32  ;;  %v942_v36 = vmul.f32 %v4667_v29, %v5269_v53 }
 0x455   :  { %4259 = vmatpush3.bf16.msra.mxu0 %v1233_v34  ;;  %4260 = vmatprep.mubr.msk.bf16.mxu0 %vm4924_vm0, %v4923_v1  ;;  %v951_v37 = vpack.c.bf16 %v943_v35, %v943_v35 }
 0x456   :  { %4266 = vmatprep.mubr.msk.bf16.mxu1 %vm4924_vm0, %v4923_v1  ;;  %4270 = vmatprep.subr.bf16.mxu0 %v4923_v1  ;;  %v950_v38 = vpack.c.bf16 %v942_v36, %v942_v36 }
 0x45b   :  { %4267 = vmatmul.mubr.msk.bf16.vlgmr.msra.gmra.mrb[32].mxu1 %vm855_vm3, %v951_v37 }
 0x45c   :  { %4261 = vmatmul.mubr.msk.bf16.vlgmr.msra.gmra.mrb[32].mxu0 %vm855_vm3, %v950_v38  ;;  %1665 = vmatprep.mubr.bf16.mxu1 %v4922_v0 }
 0x45d   :  { %4286 = vmatprep.mubr.msk.bf16.mxu0 %vm4924_vm0, %v4923_v1  ;;  %4271 = vmatpush3.bf16.msra.mxu0 %v4500_v48 }
 0x45e   :  { %4272 = vmatprep.subr.bf16.mxu0 %v4923_v1 }
 0x461   :  { %4273 = vmatpush3.bf16.msra.mxu0 %v4501_v49 }
 0x462   :  { %4274 = vmatprep.subr.bf16.mxu0 %v4923_v1 }
 0x465   :  { %4275 = vmatpush3.bf16.msra.mxu0 %v4502_v50 }
 0x466   :  { %4276 = vmatprep.subr.bf16.mxu0 %v4923_v1 }
 0x469   :  { %4277 = vmatpush3.bf16.msra.mxu0 %v4503_v56  ;;  %v4511_v56 = vld [vmem:[#allocation7 + $0x10] ss:$8 sps:$4 sm:$0xff]  }
 0x46a   :  { %4278 = vmatprep.subr.bf16.mxu0 %v4923_v1 }
 0x46d   :  { %4279 = vmatpush3.bf16.msra.mxu0 %v4504_v62 }
 0x46e   :  { %4280 = vmatprep.subr.bf16.mxu0 %v4923_v1 }
 0x471   :  { %4281 = vmatpush3.bf16.msra.mxu0 %v4505_v63 }
 0x472   :  { %4282 = vmatprep.subr.bf16.mxu0 %v4923_v1 }
 0x475   :  { %4283 = vmatpush3.bf16.msra.mxu0 %v4506_v2 }
 0x476   :  { %4284 = vmatprep.subr.bf16.mxu0 %v4923_v1 }
 0x479   :  { %4285 = vmatpush3.bf16.msra.mxu0 %v4507_v3 }
 0x47c   :  { %v5318_v39 = vpop.f32.mrb[20].mxu1 }
 0x47d   :  { %v4232_v40 = vpop.f32.mrb[21].mxu1  ;;  %v1322_v28 = vpack.c.bf16 %v5318_v39, %v5318_v39 }
 0x47e   :  { %v1042_v41 = vpop.f32.mrb[22].mxu1 }
 0x47f   :  { %v4233_v42 = vpop.f32.mrb[23].mxu1 }
 0x480   :  { %v3831_v42 = vld [vmem:[%s5624_s4] ss:$0 sm:$0xff] }
 0x494   :  { %v5320_v43 = vpop.f32.mrb[20].mxu0 }
 0x495   :  { %v4226_v44 = vpop.f32.mrb[21].mxu0  ;;  %v1321_v29 = vpack.c.bf16 %v5320_v43, %v5320_v43 }
 0x496   :  { %v996_v45 = vpop.f32.mrb[22].mxu0 }
 0x497   :  { %v4227_v47 = vpop.f32.mrb[23].mxu0 }
 0x4ed   :  { %v1085_v46 = vpop.f32.mrb[24].mxu0 }
 0x4ee   :  { %v1323_v51 = vpack.c.bf16 %v1085_v46, %v1085_v46  ;;  %v4238_v52 = vpop.f32.mrb[25].mxu0  ;;  %v4716_v46 = vld [vmem:[#allocation2] sm:$0xff] }
 0x4ef   :  { %v1088_v53 = vpop.f32.mrb[26].mxu0 }
 0x4f0   :  { %1331 = vrot.lane.b32.xlu0 %v1323_v51, %s4916_s3  ;;  %v4239_v54 = vpop.f32.mrb[27].mxu0  ;;  %v4717_v51 = vld [vmem:[#allocation2 + $0x8] sm:$0xff]  ;;  %v4508_v53 = vld [vmem:[#allocation7] ss:$8 sps:$4 sm:$0xff]  }
 0x4f1   :  { %v1131_v55 = vpop.f32.mrb[24].mxu1  ;;  %v4510_v54 = vld [vmem:[#allocation7 + $0x4] ss:$8 sps:$4 sm:$0xff]  }
 0x4f2   :  { %v1324_v57 = vpack.c.bf16 %v1131_v55, %v1131_v55  ;;  %v4244_v58 = vpop.f32.mrb[25].mxu1  ;;  %v4513_v55 = vld [vmem:[#allocation7 + $0x14] ss:$8 sps:$4 sm:$0xff]   ;;  %1633 = vmatprep.subr.bf16.mxu1 %v4510_v54 }
 0x4f3   :  { %v1134_v59 = vpop.f32.mrb[26].mxu1  ;;  %1634 = vmatpush1.bf16.msra.mxu1 %v4508_v53 }
 0x4f4   :  { %v4245_v60 = vpop.f32.mrb[27].mxu1  ;;  %1333 = vrot.lane.b32.xlu1 %v1324_v57, %s4916_s3  ;;  %1635 = vmatprep.subr.bf16.mxu1 %v4513_v55 }
 0x4f7   :  { %1636 = vmatpush1.bf16.msra.mxu1 %v4511_v56 }
 0x526   :  { %v1223_v4 = vpop.f32.mrb[28].mxu1 }
 0x527   :  { %v1177_v5 = vpop.f32.mrb[28].mxu0  ;;  %v1326_v6 = vpack.c.bf16 %v1223_v4, %v1223_v4  ;;  %v4256_v7 = vpop.f32.mrb[29].mxu1  ;;  %v4516_v4 = vld [vmem:[#allocation7 + $0x24] ss:$8 sps:$4 sm:$0xff]  }
 0x528   :  { %v1325_v8 = vpack.c.bf16 %v1177_v5, %v1177_v5  ;;  %v4250_v9 = vpop.f32.mrb[29].mxu0  ;;  %v1226_v11 = vpop.f32.mrb[30].mxu1  ;;  %v4514_v5 = vld [vmem:[#allocation7 + $0x20] ss:$8 sps:$4 sm:$0xff]   ;;  %1637 = vmatprep.subr.bf16.mxu1 %v4516_v4  ;;  %v4517_v7 = vld [vmem:[#allocation7 + $0x30] ss:$8 sps:$4 sm:$0xff]  }
 0x529   :  { %v1180_v13 = vpop.f32.mrb[30].mxu0  ;;  %1339 = vrot.lane.b32.xlu1 %v1326_v6, %s4912_s18  ;;  %v4257_v10 = vpop.f32.mrb[31].mxu1  ;;  %1638 = vmatpush1.bf16.msra.mxu1 %v4514_v5  ;;  %v4519_v6 = vld [vmem:[#allocation7 + $0x34] ss:$8 sps:$4 sm:$0xff]   ;;  %v4520_v9 = vld [vmem:[#allocation7 + $0x40] ss:$8 sps:$4 sm:$0xff]  }
 0x52a   :  { %1337 = vrot.lane.b32.xlu0 %v1325_v8, %s4912_s18  ;;  %v4251_v12 = vpop.f32.mrb[31].mxu0  ;;  %1639 = vmatprep.subr.bf16.mxu1 %v4519_v6  ;;  %v4522_v8 = vld [vmem:[#allocation7 + $0x44] ss:$8 sps:$4 sm:$0xff]   ;;  %v4525_v11 = vld [vmem:[#allocation7 + $0x54] ss:$8 sps:$4 sm:$0xff]  }
 0x52b   :  { %v4523_v13 = vld [vmem:[#allocation7 + $0x50] ss:$8 sps:$4 sm:$0xff]   ;;  %v4528_v10 = vld [vmem:[#allocation7 + $0x64] ss:$8 sps:$4 sm:$0xff]   ;;  %v4526_v12 = vld [vmem:[#allocation7 + $0x60] ss:$8 sps:$4 sm:$0xff]  }
 0x52d   :  { %1640 = vmatpush1.bf16.msra.mxu1 %v4517_v7 }
 0x52e   :  { %v1315_v14 = vpop.f32.mrb[32].mxu1  ;;  %1641 = vmatprep.subr.bf16.mxu1 %v4522_v8 }
 0x52f   :  { %v1269_v15 = vpop.f32.mrb[32].mxu0  ;;  %v1328_v16 = vpack.c.bf16 %v1315_v14, %v1315_v14  ;;  %v4268_v17 = vpop.f32.mrb[33].mxu1  ;;  %v4531_v14 = vld [vmem:[#allocation7 + $0x74] ss:$8 sps:$4 sm:$0xff]  }
 0x530   :  { %v1327_v18 = vpack.c.bf16 %v1269_v15, %v1269_v15  ;;  %v4262_v20 = vpop.f32.mrb[33].mxu0  ;;  %v1318_v21 = vpop.f32.mrb[34].mxu1  ;;  %v4529_v15 = vld [vmem:[#allocation7 + $0x70] ss:$8 sps:$4 sm:$0xff]   ;;  %v4533_v17 = vld [vmem:[#allocation10] sm:$0xff]  }
 0x531   :  { %v1272_v22 = vpop.f32.mrb[34].mxu0  ;;  %1345 = vrot.lane.b32.xlu1 %v1328_v16, %s4925_s16  ;;  %v4269_v23 = vpop.f32.mrb[35].mxu1  ;;  %1642 = vmatpush1.bf16.msra.mxu1 %v4520_v9  ;;  %v4532_v16 = vld [vmem:[#allocation10 + $0x40] sm:$0xff]   ;;  %v4535_v20 = vld [vmem:[#allocation10 + $0x8] sm:$0xff]   ;;  %v4536_v21 = vld [vmem:[#allocation10 + $0x50] sm:$0xff]  }
 0x532   :  { %1343 = vrot.lane.b32.xlu0 %v1327_v18, %s4925_s16  ;;  %v4263_v24 = vpop.f32.mrb[35].mxu0  ;;  %1643 = vmatprep.subr.bf16.mxu1 %v4525_v11  ;;  %v4534_v18 = vld [vmem:[#allocation10 + $0x48] sm:$0xff]   ;;  %v4537_v22 = vld [vmem:[#allocation10 + $0x10] sm:$0xff]   ;;  %v4538_v23 = vld [vmem:[#allocation10 + $0x58] sm:$0xff]  }
 0x533   :  { %4051 = vmatprep.subr.bf16.mxu0 %v4532_v16  ;;  %v4539_v24 = vld [vmem:[#allocation10 + $0x18] sm:$0xff]   ;;  %v3859_v9 = vld [vmem:[#allocation12] ss:$0 sm:$0xff] }
 0x535   :  { %1644 = vmatpush1.bf16.msra.mxu1 %v4523_v13 }
 0x536   :  { %1645 = vmatprep.subr.bf16.mxu1 %v4528_v10 }
 0x539   :  { %1646 = vmatpush1.bf16.msra.mxu1 %v4526_v12 }
 0x53a   :  { %1647 = vmatprep.subr.bf16.mxu1 %v4531_v14 }
 0x53d   :  { %1648 = vmatpush1.bf16.msra.mxu1 %v4529_v15 }
 0x562   :  { %v1332_v26 = vpop.permute.xlu0 %1331 }
 0x563   :  { %v1349_v34 = vsel %vm478_vm1, %v1321_v29, %v1332_v26  ;;  %v4541_v26 = vld [vmem:[#allocation10 + $0x20] sm:$0xff]  }
 0x566   :  { %v1334_v25 = vpop.permute.xlu1 %1333 }
 0x567   :  { %v1352_v32 = vsel %vm478_vm1, %v1322_v28, %v1334_v25  ;;  %v4540_v25 = vld [vmem:[#allocation10 + $0x60] sm:$0xff]  }
 0x59b   :  { %v1340_v27 = vpop.permute.xlu1 %1339 }
 0x59c   :  { %v1338_v19 = vpop.permute.xlu0 %1337  ;;  %v1357_v35 = vsel %vm1353_vm4, %v1352_v32, %v1340_v27  ;;  %v4542_v27 = vld [vmem:[#allocation10 + $0x68] sm:$0xff]  }
 0x59d   :  { %v1355_v37 = vsel %vm1353_vm4, %v1349_v34, %v1338_v19 }
 0x5a3   :  { %v1346_v36 = vpop.permute.xlu1 %1345 }
 0x5a4   :  { %v1362_v38 = vsel %vm1358_vm5, %v1357_v35, %v1346_v36  ;;  %v1344_v40 = vpop.permute.xlu0 %1343 }
 0x5a5   :  { %v1360_v39 = vsel %vm1358_vm5, %v1355_v37, %v1344_v40 }
 0x5a6   :  { %v3832_v41 = vcombine.low %v1360_v39, %v1362_v38  ;;  %v3841_v38 = vld [vmem:[%s5625_s5] ss:$0 sm:$0xff] }
 0x5a8   :  { %4287 = vmatmul.mubr.bf16.vlgmr.msra.gmra.mrb[36].mxu0 %v3832_v41 }
 0x5a9   :  { %4052 = vmatpush3.bf16.msra.mxu0 %v4533_v17 }
 0x5aa   :  { %4053 = vmatprep.subr.bf16.mxu0 %v4534_v18 }
 0x5ad   :  { %4054 = vmatpush3.bf16.msra.mxu0 %v4535_v20  ;;  %v4548_v20 = vld [vmem:[#allocation4 + $0xc0] ss:$12 sps:$4 sm:$0xff]  }
 0x5ae   :  { %4055 = vmatprep.subr.bf16.mxu0 %v4536_v21  ;;  %v4550_v21 = vld [vmem:[#allocation4 + $0xc4] ss:$12 sps:$4 sm:$0xff]  }
 0x5af   :  { %2080 = vmatprep.subr.bf16.mxu1 %v4550_v21 }
 0x5b1   :  { %4056 = vmatpush3.bf16.msra.mxu0 %v4537_v22  ;;  %v4551_v22 = vld [vmem:[#allocation4 + $0xc8] ss:$12 sps:$4 sm:$0xff]  }
 0x5b2   :  { %4057 = vmatprep.subr.bf16.mxu0 %v4538_v23  ;;  %v4554_v23 = vld [vmem:[#allocation4 + $0xdc] ss:$12 sps:$4 sm:$0xff]  }
 0x5b5   :  { %4058 = vmatpush3.bf16.msra.mxu0 %v4539_v24  ;;  %v4555_v24 = vld [vmem:[#allocation4 + $0xe0] ss:$12 sps:$4 sm:$0xff]  }
 0x5b6   :  { %4059 = vmatprep.subr.bf16.mxu0 %v4540_v25  ;;  %v4552_v25 = vld [vmem:[#allocation4 + $0xd8] ss:$12 sps:$4 sm:$0xff]  }
 0x5b9   :  { %4060 = vmatpush3.bf16.msra.mxu0 %v4541_v26 }
 0x5ba   :  { %4061 = vmatprep.subr.bf16.mxu0 %v4542_v27 }
 0x67b   :  { %v1474_v43 = vpop.f32.mrb[36].mxu0 }
 0x67c   :  { %v1475_v44 = vadd.f32 %v3831_v42, %v1474_v43  ;;  %v4288_v45 = vpop.f32.mrb[37].mxu0 }
 0x67d   :  { %v1477_v47 = vpop.f32.mrb[38].mxu0 }
 0x67e   :  { %v1478_v48 = vadd.f32 %v3831_v42, %v1477_v47  ;;  %v4289_v49 = vpop.f32.mrb[39].mxu0  ;;  %v1481_v50 = vadd.f32 %v4716_v46, %v1475_v44  ;;  %v3842_v42 = vld [vmem:[%s5626_s6] ss:$0 sm:$0xff]  ;;  %v4545_v46 = vld [vmem:[#allocation10 + $0x30] sm:$0xff]  }
 0x67f   :  { %v4544_v49 = vld [vmem:[#allocation10 + $0x70] sm:$0xff]  }
 0x680   :  { %1485 = vadd.xlane.f32.xlu0 %v1481_v50  ;;  %v1482_v52 = vadd.f32 %v4717_v51, %v1478_v48  ;;  %v4543_v48 = vld [vmem:[#allocation10 + $0x28] sm:$0xff]   ;;  %v4547_v51 = vld [vmem:[#allocation10 + $0x38] sm:$0xff]  }
 0x681   :  { %4062 = vmatpush3.bf16.msra.mxu0 %v4543_v48  ;;  %v4571_v48 = vld [vmem:[#allocation4 + $0x140] ss:$12 sps:$4 sm:$0xff]  }
 0x682   :  { %1487 = vadd.xlane.f32.xlu1 %v1482_v52  ;;  %4063 = vmatprep.subr.bf16.mxu0 %v4544_v49  ;;  %v4574_v49 = vld [vmem:[#allocation4 + $0x154] ss:$12 sps:$4 sm:$0xff]  }
 0x685   :  { %4064 = vmatpush3.bf16.msra.mxu0 %v4545_v46  ;;  %v4572_v46 = vld [vmem:[#allocation4 + $0x150] ss:$12 sps:$4 sm:$0xff]  }
 0x70d   :  { %v1486_v57 = vpop.xlane.xlu0 %1485 }
 0x70e   :  { %v1490_v58 = vmul.f32 0.0078125, %v1486_v57 }
 0x70f   :  { %v1488_v59 = vpop.xlane.xlu1 %1487 }
 0x710   :  { %v1492_v60 = vsub.f32 %v1481_v50, %v1490_v58  ;;  %v1491_v62 = vmul.f32 0.0078125, %v1488_v59  ;;  %v4546_v50 = vld [vmem:[#allocation10 + $0x78] sm:$0xff]  }
 0x711   :  { %4065 = vmatprep.subr.bf16.mxu0 %v4546_v50  ;;  %v4575_v50 = vld [vmem:[#allocation4 + $0x158] ss:$12 sps:$4 sm:$0xff]  }
 0x712   :  { %v5348_v63 = vsub.f32 %v1482_v52, %v1491_v62  ;;  %v1494_v2 = vmul.f32 %v1492_v60, %v1492_v60  ;;  %4066 = vmatpush3.bf16.msra.mxu0 %v4547_v51  ;;  %v1541_v52 = vld [vmem:[#allocation9] sm:$0x3]  ;;  %v4578_v51 = vld [vmem:[#allocation4 + $0x16c] ss:$12 sps:$4 sm:$0xff]  }
 0x713   :  { %4290 = vmatprep.subr.bf16.mxu0 %v4923_v1  ;;  %v1546_v53 = vrot.slane %v1541_v52, %v5153_v31  ;;  %v1550_v54 = vrot.slane %v1541_v52, %v5159_v33  ;;  %v4576_v52 = vld [vmem:[#allocation4 + $0x168] ss:$12 sps:$4 sm:$0xff]  }
 0x714   :  { %1496 = vadd.xlane.f32.xlu0 %v1494_v2  ;;  %v1495_v3 = vmul.f32 %v5348_v63, %v5348_v63 }
 0x718   :  { %1498 = vadd.xlane.f32.xlu0 %v1495_v3 }
 0x7a1   :  { %v1497_v28 = vpop.xlane.xlu0 %1496 }
 0x7a2   :  { %v1500_v19 = vmul.f32 0.0078125, %v1497_v28 }
 0x7a4   :  { %v1502_v29 = vadd.f32 1e-06, %v1500_v19 }
 0x7a5   :  { %v1499_v32 = vpop.xlane.xlu0 %1498 }
 0x7a6   :  { %4668 = vrsqrt.f32 %v1502_v29  ;;  %v1501_v34 = vmul.f32 0.0078125, %v1499_v32 }
 0x7a8   :  { %v1503_v35 = vadd.f32 1e-06, %v1501_v34 }
 0x7aa   :  { %4670 = vrsqrt.f32 %v1503_v35 }
 0x7b0   :  { %v4669_v36 = vpop.eup %4668 }
 0x7b1   :  { %v1506_v37 = vmul.f32 %v4669_v36, %v1492_v60  ;;  %v4558_v36 = vld [vmem:[#allocation4 + $0xf4] ss:$12 sps:$4 sm:$0xff]  }
 0x7b3   :  { %v1514_v41 = vmul.f32 %v3841_v38, %v1506_v37  ;;  %v4556_v37 = vld [vmem:[#allocation4 + $0xf0] ss:$12 sps:$4 sm:$0xff]  }
 0x7b4   :  { %v4671_v40 = vpop.eup %4670 }
 0x7b5   :  { %v1507_v39 = vmul.f32 %v4671_v40, %v5348_v63  ;;  %v1522_v44 = vadd.f32 %v3842_v42, %v1514_v41  ;;  %v4562_v40 = vld [vmem:[#allocation4 + $0x10c] ss:$12 sps:$4 sm:$0xff]   ;;  %v4563_v41 = vld [vmem:[#allocation4 + $0x110] ss:$12 sps:$4 sm:$0xff]  }
 0x7b7   :  { %v1515_v43 = vmul.f32 %v3841_v38, %v1507_v39  ;;  %v4559_v38 = vld [vmem:[#allocation4 + $0xf8] ss:$12 sps:$4 sm:$0xff]   ;;  %v4560_v39 = vld [vmem:[#allocation4 + $0x108] ss:$12 sps:$4 sm:$0xff]  }
 0x7b9   :  { %v1523_v45 = vadd.f32 %v3842_v42, %v1515_v43  ;;  %v4566_v42 = vld [vmem:[#allocation4 + $0x124] ss:$12 sps:$4 sm:$0xff]   ;;  %v4564_v43 = vld [vmem:[#allocation4 + $0x120] ss:$12 sps:$4 sm:$0xff]  }
 0x7bb   :  { %v1524_v47 = vpack.c.bf16 %v1523_v45, %v1522_v44 }
 0x7bd   :  { %1666 = vmatmul.mubr.bf16.vlgmr.msra.gmra.mrb[36].mxu1 %v1524_v47  ;;  %v4568_v47 = vld [vmem:[#allocation4 + $0x138] ss:$12 sps:$4 sm:$0xff]  }
 0x7be   :  { %2112 = vmatprep.mubr.bf16.mxu1 %v4922_v0  ;;  %2081 = vmatpush1.bf16.msra.mxu1 %v4548_v20 }
 0x7bf   :  { %2082 = vmatprep.subr.bf16.mxu1 %v4554_v23 }
 0x7c2   :  { %2083 = vmatpush1.bf16.msra.mxu1 %v4552_v25 }
 0x7c3   :  { %2084 = vmatprep.subr.bf16.mxu1 %v4558_v36 }
 0x7c6   :  { %2085 = vmatpush1.bf16.msra.mxu1 %v4556_v37 }
 0x7c7   :  { %2086 = vmatprep.subr.bf16.mxu1 %v4562_v40 }
 0x7ca   :  { %2087 = vmatpush1.bf16.msra.mxu1 %v4560_v39 }
 0x7cb   :  { %2088 = vmatprep.subr.bf16.mxu1 %v4566_v42 }
 0x7ce   :  { %2089 = vmatpush1.bf16.msra.mxu1 %v4564_v43 }
 0x890   :  { %v1667_v55 = vpop.f32.mrb[36].mxu1 }
 0x891   :  { %v1668_v56 = vadd.f32 %v1667_v55, %v1546_v53  ;;  %v1669_v57 = vpop.f32.mrb[37].mxu1 }
 0x892   :  { %v1670_v58 = vadd.f32 %v1669_v57, %v1550_v54  ;;  %v1671_v59 = vpop.f32.mrb[38].mxu1 }
 0x893   :  { %v1672_v60 = vadd.f32 %v1671_v59, %v1546_v53  ;;  %v1673_v62 = vpop.f32.mrb[39].mxu1  ;;  %v1676_v2 = vmax.f32 %v1668_v56, 0.0  ;;  %v4579_v53 = vld [vmem:[#allocation4 + $0x170] ss:$12 sps:$4 sm:$0xff]  }
 0x894   :  { %v1674_v63 = vadd.f32 %v1673_v62, %v1550_v54  ;;  %v1677_v4 = vmax.f32 %v1670_v58, 0.0  ;;  %v3876_v62 = vld [vmem:[%s5631_s11] ss:$0 sm:$0xff] }
 0x895   :  { %v1678_v3 = vmax.f32 %v1672_v60, 0.0 }
 0x896   :  { %v1679_v5 = vmax.f32 %v1674_v63, 0.0 }
 0x897   :  { %v1680_v6 = vpack.c.bf16 %v1678_v3, %v1676_v2 }
 0x898   :  { %v1681_v7 = vpack.c.bf16 %v1679_v5, %v1677_v4  ;;  %v3877_v5 = vld [vmem:[%s5632_s12] ss:$0 sm:$0xff] }
 0x89a   :  { %1849 = vmatprep.mubr.bf16.mxu0 %v1681_v7 }
 0x89b   :  { %1850 = vmatmul.mubr.bf16.vlgmr.msra.gmra.mrb[40].mxu0 %v1680_v6 }
 0x89c   :  { %4306 = vmatprep.mubr.msk.bf16.mxu0 %vm4924_vm0, %v4923_v1  ;;  %4291 = vmatpush3.bf16.msra.mxu0 %v4551_v22 }
 0x89d   :  { %4292 = vmatprep.subr.bf16.mxu0 %v4923_v1 }
 0x8a0   :  { %4293 = vmatpush3.bf16.msra.mxu0 %v4555_v24 }
 0x8a1   :  { %4294 = vmatprep.subr.bf16.mxu0 %v4923_v1 }
 0x8a4   :  { %4295 = vmatpush3.bf16.msra.mxu0 %v4559_v38 }
 0x8a5   :  { %4296 = vmatprep.subr.bf16.mxu0 %v4923_v1 }
 0x8a8   :  { %4297 = vmatpush3.bf16.msra.mxu0 %v4563_v41 }
 0x8a9   :  { %4298 = vmatprep.subr.bf16.mxu0 %v4923_v1 }
 0x96e   :  { %v4067_v8 = vpop.f32.mrb[40].mxu0 }
 0x96f   :  { %v4068_v11 = vpop.f32.mrb[41].mxu0 }
 0x970   :  { %v4069_v13 = vadd.f32 %v4068_v11, %v4067_v8  ;;  %v4070_v10 = vpop.f32.mrb[42].mxu0  ;;  %v3878_v11 = vld [vmem:[%s5622_s2 + $0x3] sm:$0x7] }
 0x971   :  { %v4071_v12 = vpop.f32.mrb[43].mxu0  ;;  %v1948_v41 = vrot.slane %v3878_v11, %v207_v61 }
 0x972   :  { %v1852_v14 = vadd.f32 %v4069_v13, %v3859_v9  ;;  %v4072_v15 = vadd.f32 %v4071_v12, %v4070_v10  ;;  %v1940_v13 = vrot.slane %v3878_v11, %v5153_v31  ;;  %v1944_v10 = vrot.slane %v3878_v11, %v5159_v33 }
 0x974   :  { %v1855_v16 = vadd.f32 %v4072_v15, %v3859_v9  ;;  %v1858_v17 = vadd.f32 %v1852_v14, %v1522_v44  ;;  %v4567_v44 = vld [vmem:[#allocation4 + $0x128] ss:$12 sps:$4 sm:$0xff]  }
 0x975   :  { %4299 = vmatpush3.bf16.msra.mxu0 %v4567_v44 }
 0x976   :  { %1862 = vadd.xlane.f32.xlu1 %v1858_v17  ;;  %v1859_v18 = vadd.f32 %v1855_v16, %v1523_v45  ;;  %v4570_v45 = vld [vmem:[#allocation4 + $0x13c] ss:$12 sps:$4 sm:$0xff]   ;;  %4300 = vmatprep.subr.bf16.mxu0 %v4923_v1 }
 0x977   :  { %2090 = vmatprep.subr.bf16.mxu1 %v4570_v45 }
 0x978   :  { %1864 = vadd.xlane.f32.xlu0 %v1859_v18  ;;  %2091 = vmatpush1.bf16.msra.mxu1 %v4568_v47 }
 0x979   :  { %4301 = vmatpush3.bf16.msra.mxu0 %v4571_v48  ;;  %2092 = vmatprep.subr.bf16.mxu1 %v4574_v49 }
 0x97a   :  { %4302 = vmatprep.subr.bf16.mxu0 %v4923_v1 }
 0x97c   :  { %2093 = vmatpush1.bf16.msra.mxu1 %v4572_v46 }
 0x97d   :  { %4303 = vmatpush3.bf16.msra.mxu0 %v4575_v50  ;;  %2094 = vmatprep.subr.bf16.mxu1 %v4578_v51 }
 0x97e   :  { %4304 = vmatprep.subr.bf16.mxu0 %v4923_v1 }
 0x980   :  { %2095 = vmatpush1.bf16.msra.mxu1 %v4576_v52 }
 0x981   :  { %4305 = vmatpush3.bf16.msra.mxu0 %v4579_v53  ;;  %4310 = vmatprep.subr.bf16.mxu1 %v4923_v1 }
 0x982   :  { %4334 = vmatprep.subr.bf16.mxu0 %v4923_v1 }
 0xa03   :  { %v1863_v26 = vpop.xlane.xlu1 %1862 }
 0xa04   :  { %v1866_v27 = vmul.f32 0.0078125, %v1863_v26 }
 0xa05   :  { %v1865_v28 = vpop.xlane.xlu0 %1864 }
 0xa06   :  { %v1868_v19 = vsub.f32 %v1858_v17, %v1866_v27  ;;  %v1867_v29 = vmul.f32 0.0078125, %v1865_v28 }
 0xa08   :  { %v1869_v32 = vsub.f32 %v1859_v18, %v1867_v29  ;;  %v1870_v34 = vmul.f32 %v1868_v19, %v1868_v19 }
 0xa0a   :  { %1872 = vadd.xlane.f32.xlu1 %v1870_v34  ;;  %v1871_v35 = vmul.f32 %v1869_v32, %v1869_v32 }
 0xa0c   :  { %1874 = vadd.xlane.f32.xlu0 %v1871_v35 }
 0xa97   :  { %v1873_v54 = vpop.xlane.xlu1 %1872 }
 0xa98   :  { %v1876_v55 = vmul.f32 0.0078125, %v1873_v54 }
 0xa99   :  { %v1875_v56 = vpop.xlane.xlu0 %1874 }
 0xa9a   :  { %v1878_v57 = vadd.f32 1e-06, %v1876_v55  ;;  %v1877_v58 = vmul.f32 0.0078125, %v1875_v56 }
 0xa9c   :  { %4672 = vrsqrt.f32 %v1878_v57  ;;  %v1879_v59 = vadd.f32 1e-06, %v1877_v58 }
 0xa9e   :  { %4674 = vrsqrt.f32 %v1879_v59 }
 0xaa6   :  { %v4673_v60 = vpop.eup %4672 }
 0xaa7   :  { %v1882_v63 = vmul.f32 %v4673_v60, %v1868_v19 }
 0xaa8   :  { %v4675_v2 = vpop.eup %4674 }
 0xaa9   :  { %v1883_v3 = vmul.f32 %v4675_v2, %v1869_v32  ;;  %v1890_v4 = vmul.f32 %v3876_v62, %v1882_v63 }
 0xaab   :  { %v1891_v6 = vmul.f32 %v3876_v62, %v1883_v3  ;;  %v5380_v7 = vadd.f32 %v3877_v5, %v1890_v4 }
 0xaad   :  { %v5382_v8 = vadd.f32 %v3877_v5, %v1891_v6 }
 0xaaf   :  { %v1900_v9 = vpack.c.bf16 %v5382_v8, %v5380_v7 }
 0xab1   :  { %2113 = vmatmul.mubr.bf16.vlgmr.msra.gmra.mrb[40].mxu1 %v1900_v9  ;;  %4307 = vmatmul.mubr.bf16.vlgmr.msra.gmra.mrb[44].mxu0 %v1900_v9 }
 0xab2   :  { %4312 = vmatprep.mubr.msk.bf16.mxu1 %vm4924_vm0, %v4923_v1  ;;  %4336 = vmatprep.mubr.msk.bf16.mxu0 %vm4924_vm0, %v4923_v1 }
 0xb84   :  { %v2114_v12 = vpop.f32.mrb[40].mxu1  ;;  %v2157_v14 = vpop.f32.mrb[44].mxu0 }
 0xb85   :  { %v2115_v15 = vadd.f32 %v2114_v12, %v1940_v13  ;;  %v2116_v16 = vpop.f32.mrb[41].mxu1  ;;  %v4308_v17 = vpop.f32.mrb[45].mxu0  ;;  %v2158_v45 = vadd.f32 %v2157_v14, %v1948_v41 }
 0xb86   :  { %v2117_v18 = vadd.f32 %v2116_v16, %v1944_v10  ;;  %v2118_v20 = vpop.f32.mrb[42].mxu1  ;;  %v5395_v21 = vpop.f32.mrb[46].mxu0 }
 0xb87   :  { %v3995_v22 = vpack.c.bf16 %v2115_v15, %v2115_v15  ;;  %v2120_v23 = vpop.f32.mrb[43].mxu1  ;;  %v4309_v24 = vpop.f32.mrb[47].mxu0  ;;  %v2119_v28 = vadd.f32 %v2118_v20, %v1940_v13  ;;  %v5435_v30 = vpack.c.bf16 %v2158_v45, %v2158_v45  ;;  %v2161_v52 = vadd.f32 %v5395_v21, %v1948_v41 }
 0xb88   :  { %v3997_v25 = vpack.c.bf16 %v2117_v18, %v2117_v18  ;;  %v2121_v26 = vadd.f32 %v2120_v23, %v1944_v10 }
 0xb89   :  { %2172 = vrot.lane.b32.xlu0 %v3995_v22, %s4925_s16  ;;  %v3996_v29 = vpack.c.bf16 %v2119_v28, %v2119_v28  ;;  %v2694_v50 = vsel %vm955_vm2, %v5435_v30, 0  ;;  %v5454_v54 = vpack.c.bf16 %v2161_v52, %v2161_v52 }
 0xb8a   :  { %2189 = vrot.lane.b32.xlu1 %v3997_v25, %s4925_s16  ;;  %v2222_v27 = vsel %vm478_vm1, %v3997_v25, 0  ;;  %v3998_v19 = vpack.c.bf16 %v2121_v26, %v2121_v26 }
 0xb8b   :  { %4311 = vmatpush3.bf16.xpose.msra.mxu1 %v2222_v27  ;;  %v2740_v56 = vsel %vm955_vm2, %v5454_v54, 0 }
 0xb8c   :  { %4316 = vmatprep.subr.bf16.mxu1 %v4923_v1  ;;  %v2268_v32 = vsel %vm478_vm1, %v3998_v19, 0 }
 0xb8d   :  { %2193 = vrot.lane.b32.xlu0 %v3997_v25, %s4912_s18 }
 0xb8e   :  { %2191 = vrot.lane.b32.xlu1 %v3998_v19, %s4925_s16 }
 0xb91   :  { %2176 = vrot.lane.b32.xlu0 %v3995_v22, %s4912_s18 }
 0xb92   :  { %2174 = vrot.lane.b32.xlu1 %v3996_v29, %s4925_s16  ;;  %4313 = vmatmul.mubr.msk.bf16.vlgmr.msra.gmra.mrb[44].mxu1 %vm478_vm1, %v3995_v22 }
 0xb93   :  { %4317 = vmatpush3.bf16.xpose.msra.mxu1 %v2268_v32  ;;  %4318 = vmatprep.mubr.msk.bf16.mxu1 %vm4924_vm0, %v4923_v1 }
 0xb94   :  { %4322 = vmatprep.subr.bf16.mxu1 %v4923_v1 }
 0xb95   :  { %2197 = vrot.lane.b32.xlu0 %v3997_v25, %s4916_s3 }
 0xb96   :  { %2195 = vrot.lane.b32.xlu1 %v3998_v19, %s4912_s18 }
 0xb99   :  { %2180 = vrot.lane.b32.xlu0 %v3995_v22, %s4916_s3 }
 0xb9a   :  { %2178 = vrot.lane.b32.xlu1 %v3996_v29, %s4912_s18  ;;  %4319 = vmatmul.mubr.msk.bf16.vlgmr.msra.gmra.mrb[48].mxu1 %vm478_vm1, %v3996_v29 }
 0xb9b   :  { %4324 = vmatprep.mubr.msk.bf16.mxu1 %vm4924_vm0, %v4923_v1 }
 0xb9e   :  { %2199 = vrot.lane.b32.xlu1 %v3998_v19, %s4916_s3 }
 0xba2   :  { %2182 = vrot.lane.b32.xlu1 %v3996_v29, %s4916_s3 }
 0xbfb   :  { %v2173_v34 = vpop.permute.xlu0 %2172 }
 0xbfc   :  { %v2190_v35 = vpop.permute.xlu1 %2189 }
 0xbfd   :  { %v2314_v36 = vsel %vm478_vm1, %v2190_v35, 0 }
 0xbfe   :  { %4323 = vmatpush3.bf16.xpose.msra.mxu1 %v2314_v36 }
 0xbff   :  { %v2194_v37 = vpop.permute.xlu0 %2193  ;;  %4328 = vmatprep.subr.bf16.mxu1 %v4923_v1 }
 0xc00   :  { %v2406_v38 = vsel %vm478_vm1, %v2194_v37, 0  ;;  %v2192_v40 = vpop.permute.xlu1 %2191 }
 0xc01   :  { %4335 = vmatpush3.bf16.xpose.msra.mxu0 %v2406_v38  ;;  %v2360_v43 = vsel %vm478_vm1, %v2192_v40, 0 }
 0xc02   :  { %4346 = vmatprep.subr.bf16.mxu0 %v4923_v1 }
 0xc03   :  { %v2177_v39 = vpop.permute.xlu0 %2176 }
 0xc04   :  { %v2175_v42 = vpop.permute.xlu1 %2174 }
 0xc05   :  { %4325 = vmatmul.mubr.msk.bf16.vlgmr.msra.gmra.mrb[52].mxu1 %vm478_vm1, %v2173_v34 }
 0xc06   :  { %4329 = vmatpush3.bf16.xpose.msra.mxu1 %v2360_v43  ;;  %4330 = vmatprep.mubr.msk.bf16.mxu1 %vm4924_vm0, %v4923_v1 }
 0xc07   :  { %v2198_v44 = vpop.permute.xlu0 %2197  ;;  %4340 = vmatprep.subr.bf16.mxu1 %v4923_v1 }
 0xc08   :  { %v2498_v47 = vsel %vm478_vm1, %v2198_v44, 0  ;;  %v2196_v48 = vpop.permute.xlu1 %2195  ;;  %4337 = vmatmul.mubr.msk.bf16.vlgmr.msra.gmra.mrb[48].mxu0 %vm478_vm1, %v2177_v39 }
 0xc09   :  { %4347 = vmatpush3.bf16.xpose.msra.mxu0 %v2498_v47  ;;  %4348 = vmatprep.mubr.msk.bf16.mxu0 %vm4924_vm0, %v4923_v1  ;;  %v2452_v49 = vsel %vm478_vm1, %v2196_v48, 0 }
 0xc0a   :  { %4358 = vmatprep.subr.bf16.mxu0 %v4923_v1 }
 0xc0b   :  { %v2181_v46 = vpop.permute.xlu0 %2180 }
 0xc0c   :  { %v2179_v61 = vpop.permute.xlu1 %2178 }
 0xc0d   :  { %4331 = vmatmul.mubr.msk.bf16.vlgmr.msra.gmra.mrb[56].mxu1 %vm478_vm1, %v2175_v42 }
 0xc0e   :  { %4341 = vmatpush3.bf16.xpose.msra.mxu1 %v2452_v49  ;;  %4342 = vmatprep.mubr.msk.bf16.mxu1 %vm4924_vm0, %v4923_v1 }
 0xc0f   :  { %4352 = vmatprep.subr.bf16.mxu1 %v4923_v1 }
 0xc10   :  { %4349 = vmatmul.mubr.msk.bf16.vlgmr.msra.gmra.mrb[52].mxu0 %vm478_vm1, %v2181_v46  ;;  %v2200_v51 = vpop.permute.xlu1 %2199 }
 0xc11   :  { %4359 = vmatpush3.bf16.msra.mxu0 %v2694_v50  ;;  %4360 = vmatprep.mubr.msk.bf16.mxu0 %vm4924_vm0, %v4923_v1  ;;  %v2544_v53 = vsel %vm478_vm1, %v2200_v51, 0 }
 0xc12   :  { %4370 = vmatprep.subr.bf16.mxu0 %v4923_v1 }
 0xc14   :  { %v2183_v55 = vpop.permute.xlu1 %2182 }
 0xc15   :  { %4343 = vmatmul.mubr.msk.bf16.vlgmr.msra.gmra.mrb[60].mxu1 %vm478_vm1, %v2179_v61 }
 0xc16   :  { %4353 = vmatpush3.bf16.xpose.msra.mxu1 %v2544_v53  ;;  %4354 = vmatprep.mubr.msk.bf16.mxu1 %vm4924_vm0, %v4923_v1 }
 0xc17   :  { %4364 = vmatprep.subr.bf16.mxu1 %v4923_v1 }
 0xc1d   :  { %4355 = vmatmul.mubr.msk.bf16.vlgmr.msra.gmra.mrb[64].mxu1 %vm478_vm1, %v2183_v55 }
 0xc1e   :  { %4365 = vmatpush3.bf16.msra.mxu1 %v2740_v56  ;;  %4366 = vmatprep.mubr.msk.bf16.mxu1 %vm4924_vm0, %v4923_v1 }
 0xc1f   :  { %4376 = vmatprep.subr.bf16.mxu1 %v4923_v1 }
 0xc65   :  { %v2258_v57 = vpop.f32.mrb[44].mxu1 }
 0xc66   :  { %v2586_v58 = vmul.f32 0.17677669, %v2258_v57  ;;  %v4314_v59 = vpop.f32.mrb[45].mxu1 }
 0xc67   :  { %v2261_v60 = vpop.f32.mrb[46].mxu1 }
 0xc68   :  { %v4315_v62 = vpop.f32.mrb[47].mxu1  ;;  %v2594_v63 = vsel %vm855_vm3, %v2586_v58, -inf }
 0xc69   :  { %2595 = vmax.xlane.f32.xlu0 %v2594_v63 }
 0xc6d   :  { %v2304_v2 = vpop.f32.mrb[48].mxu1 }
 0xc6e   :  { %v2587_v3 = vmul.f32 0.17677669, %v2304_v2  ;;  %v4320_v4 = vpop.f32.mrb[49].mxu1 }
 0xc6f   :  { %v2307_v5 = vpop.f32.mrb[50].mxu1 }
 0xc70   :  { %v4321_v6 = vpop.f32.mrb[51].mxu1  ;;  %v2597_v9 = vsel %vm855_vm3, %v2587_v3, -inf }
 0xc71   :  { %2598 = vmax.xlane.f32.xlu1 %v2597_v9 }
 0xcd8   :  { %v2350_v11 = vpop.f32.mrb[52].mxu1 }
 0xcd9   :  { %v2588_v13 = vmul.f32 0.17677669, %v2350_v11  ;;  %v4326_v10 = vpop.f32.mrb[53].mxu1 }
 0xcda   :  { %v2353_v12 = vpop.f32.mrb[54].mxu1 }
 0xcdb   :  { %v4327_v14 = vpop.f32.mrb[55].mxu1  ;;  %v2442_v15 = vpop.f32.mrb[48].mxu0  ;;  %v2600_v16 = vsel %vm855_vm3, %v2588_v13, -inf }
 0xcdc   :  { %v2590_v17 = vmul.f32 0.17677669, %v2442_v15  ;;  %v4338_v18 = vpop.f32.mrb[49].mxu0  ;;  %2601 = vmax.xlane.f32.xlu0 %v2600_v16 }
 0xcdd   :  { %v2445_v20 = vpop.f32.mrb[50].mxu0 }
 0xcde   :  { %v4339_v21 = vpop.f32.mrb[51].mxu0  ;;  %v2606_v22 = vsel %vm855_vm3, %v2590_v17, -inf }
 0xcdf   :  { %2607 = vmax.xlane.f32.xlu1 %v2606_v22 }
 0xce0   :  { %v2396_v23 = vpop.f32.mrb[56].mxu1 }
 0xce1   :  { %v2589_v24 = vmul.f32 0.17677669, %v2396_v23  ;;  %v4332_v25 = vpop.f32.mrb[57].mxu1 }
 0xce2   :  { %v2399_v26 = vpop.f32.mrb[58].mxu1 }
 0xce3   :  { %v4333_v27 = vpop.f32.mrb[59].mxu1  ;;  %v2534_v28 = vpop.f32.mrb[52].mxu0  ;;  %v2603_v19 = vsel %vm855_vm3, %v2589_v24, -inf }
 0xce4   :  { %v5467_v29 = vmul.f32 0.17677669, %v2534_v28  ;;  %v4350_v32 = vpop.f32.mrb[53].mxu0  ;;  %2604 = vmax.xlane.f32.xlu0 %v2603_v19 }
 0xce5   :  { %v2537_v34 = vpop.f32.mrb[54].mxu0 }
 0xce6   :  { %v4351_v35 = vpop.f32.mrb[55].mxu0  ;;  %v2612_v36 = vsel %vm855_vm3, %v5467_v29, -inf }
 0xce7   :  { %2613 = vmax.xlane.f32.xlu1 %v2612_v36 }
 0xce8   :  { %v2488_v37 = vpop.f32.mrb[60].mxu1 }
 0xce9   :  { %v2591_v38 = vmul.f32 0.17677669, %v2488_v37  ;;  %v4344_v40 = vpop.f32.mrb[61].mxu1 }
 0xcea   :  { %v2491_v39 = vpop.f32.mrb[62].mxu1 }
 0xceb   :  { %v4345_v41 = vpop.f32.mrb[63].mxu1  ;;  %v2609_v42 = vsel %vm855_vm3, %v2591_v38, -inf }
 0xcec   :  { %2610 = vmax.xlane.f32.xlu0 %v2609_v42 }
 0xcf0   :  { %v2580_v43 = vpop.f32.mrb[64].mxu1 }
 0xcf1   :  { %v2593_v44 = vmul.f32 0.17677669, %v2580_v43  ;;  %v4356_v45 = vpop.f32.mrb[65].mxu1 }
 0xcf2   :  { %v2583_v47 = vpop.f32.mrb[66].mxu1 }
 0xcf3   :  { %v4357_v48 = vpop.f32.mrb[67].mxu1  ;;  %v2615_v61 = vsel %vm855_vm3, %v2593_v44, -inf }
 0xcf4   :  { %2616 = vmax.xlane.f32.xlu0 %v2615_v61 }
 0xcf6   :  { %v2596_v51 = vpop.xlane.xlu0 %2595 }
 0xcf7   :  { %v2618_v52 = vsub.f32 %v2586_v58, %v2596_v51 }
 0xcf8   :  { %2206 = vrot.lane.b32.xlu1 %v5435_v30, %s4925_s16 }
 0xcf9   :  { %v2626_v53 = vmul.f32 1.442695, %v2618_v52 }
 0xcfe   :  { %v2599_v49 = vpop.xlane.xlu1 %2598 }
 0xcff   :  { %v2619_v46 = vsub.f32 %v2587_v3, %v2599_v49 }
 0xd01   :  { %v2628_v50 = vmul.f32 1.442695, %v2619_v46 }
 0xd03   :  { %4676 = vpow2.f32 %v2628_v50 }
 0xd04   :  { %4678 = vpow2.f32 %v2626_v53 }
 0xd0d   :  { %v4677_v55 = vpop.eup %4676 }
 0xd0e   :  { %v2645_v56 = vsel %vm855_vm3, %v4677_v55, 0.0  ;;  %v4679_v57 = vpop.eup %4678 }
 0xd0f   :  { %2646 = vadd.xlane.f32.xlu0 %v2645_v56  ;;  %v2642_v59 = vsel %vm855_vm3, %v4679_v57, 0.0 }
 0xd1c   :  { %2643 = vadd.xlane.f32.xlu1 %v2642_v59 }
 0xd69   :  { %v2602_v60 = vpop.xlane.xlu0 %2601 }
 0xd6a   :  { %v2620_v62 = vsub.f32 %v2588_v13, %v2602_v60 }
 0xd6c   :  { %v2630_v63 = vmul.f32 1.442695, %v2620_v62  ;;  %v2608_v2 = vpop.xlane.xlu1 %2607 }
 0xd6d   :  { %v2622_v4 = vsub.f32 %v2590_v17, %v2608_v2 }
 0xd6e   :  { %4680 = vpow2.f32 %v2630_v63 }
 0xd6f   :  { %v2634_v3 = vmul.f32 1.442695, %v2622_v4 }
 0xd71   :  { %4682 = vpow2.f32 %v2634_v3  ;;  %v2605_v5 = vpop.xlane.xlu0 %2604 }
 0xd72   :  { %v2621_v58 = vsub.f32 %v2589_v24, %v2605_v5 }
 0xd74   :  { %v2632_v6 = vmul.f32 1.442695, %v2621_v58  ;;  %v2614_v18 = vpop.xlane.xlu1 %2613 }
 0xd75   :  { %v2624_v20 = vsub.f32 %v5467_v29, %v2614_v18 }
 0xd76   :  { %4684 = vpow2.f32 %v2632_v6 }
 0xd77   :  { %v2638_v22 = vmul.f32 1.442695, %v2624_v20 }
 0xd78   :  { %v4681_v9 = vpop.eup %4680  ;;  %v2207_v23 = vpop.permute.xlu1 %2206 }
 0xd79   :  { %v2648_v11 = vsel %vm855_vm3, %v4681_v9, 0.0  ;;  %v2611_v15 = vpop.xlane.xlu0 %2610  ;;  %v2786_v41 = vsel %vm955_vm2, %v2207_v23, 0 }
 0xd7a   :  { %2649 = vadd.xlane.f32.xlu1 %v2648_v11  ;;  %v2623_v21 = vsub.f32 %v2591_v38, %v2611_v15 }
 0xd7b   :  { %v5478_v10 = vpop.eup %4682 }
 0xd7c   :  { %v2654_v12 = vsel %vm855_vm3, %v5478_v10, 0.0  ;;  %v2636_v24 = vmul.f32 1.442695, %v2623_v21 }
 0xd7e   :  { %2655 = vadd.xlane.f32.xlu1 %v2654_v12 }
 0xd80   :  { %v5482_v13 = vpop.eup %4684 }
 0xd81   :  { %v2651_v14 = vsel %vm855_vm3, %v5482_v13, 0.0  ;;  %v2617_v16 = vpop.xlane.xlu0 %2616 }
 0xd82   :  { %2652 = vadd.xlane.f32.xlu0 %v2651_v14  ;;  %v2625_v25 = vsub.f32 %v2593_v44, %v2617_v16 }
 0xd84   :  { %v2640_v28 = vmul.f32 1.442695, %v2625_v25  ;;  %v4580_v25 = vld [vmem:[#allocation6 + $0x40] sm:$0xff]  }
 0xd8f   :  { %2210 = vrot.lane.b32.xlu1 %v5435_v30, %s4912_s18 }
 0xd93   :  { %2212 = vrot.lane.b32.xlu1 %v5454_v54, %s4912_s18 }
 0xd98   :  { %2208 = vrot.lane.b32.xlu0 %v5454_v54, %s4925_s16 }
 0xd9c   :  { %v2647_v17 = vpop.xlane.xlu0 %2646 }
 0xd9d   :  { %4686 = vrcp.f32 %v2647_v17 }
 0xd9e   :  { %4688 = vpow2.f32 %v2638_v22 }
 0xd9f   :  { %4690 = vpow2.f32 %v2636_v24 }
 0xda7   :  { %v4687_v26 = vpop.eup %4686 }
 0xda8   :  { %v2675_v27 = vmul.f32 %v4687_v26, %v4677_v55  ;;  %v5496_v29 = vpop.eup %4688 }
 0xda9   :  { %v2644_v19 = vpop.xlane.xlu1 %2643  ;;  %v5498_v34 = vpop.eup %4690  ;;  %v2660_v37 = vsel %vm855_vm3, %v5496_v29, 0.0 }
 0xdaa   :  { %4692 = vrcp.f32 %v2644_v19  ;;  %v2683_v32 = vpack.c.bf16 %v2675_v27, %v2675_v27  ;;  %v2657_v38 = vsel %vm855_vm3, %v5498_v34, 0.0  ;;  %v4581_v27 = vld [vmem:[#allocation6 + $0x48] sm:$0xff]  }
 0xdab   :  { %4694 = vpow2.f32 %v2640_v28 }
 0xdac   :  { %4367 = vmatmul.mubr.msk.bf16.vlgmr.msra.gmra.mrb[68].mxu1 %vm855_vm3, %v2683_v32 }
 0xdad   :  { %4378 = vmatprep.mubr.msk.bf16.mxu1 %vm4924_vm0, %v4923_v1 }
 0xdb4   :  { %v4693_v35 = vpop.eup %4692 }
 0xdb5   :  { %v2674_v36 = vmul.f32 %v4693_v35, %v4679_v57  ;;  %v5504_v40 = vpop.eup %4694 }
 0xdb6   :  { %v2663_v42 = vsel %vm855_vm3, %v5504_v40, 0.0 }
 0xdb7   :  { %2661 = vadd.xlane.f32.xlu1 %v2660_v37  ;;  %2658 = vadd.xlane.f32.xlu0 %v2657_v38  ;;  %v2682_v39 = vpack.c.bf16 %v2674_v36, %v2674_v36  ;;  %v4583_v36 = vld [vmem:[#allocation6 + $0x58] sm:$0xff]  }
 0xdb9   :  { %4361 = vmatmul.mubr.msk.bf16.vlgmr.msra.gmra.mrb[56].mxu0 %vm855_vm3, %v2682_v39 }
 0xdba   :  { %4371 = vmatpush3.bf16.msra.mxu0 %v2786_v41  ;;  %4372 = vmatprep.mubr.msk.bf16.mxu0 %vm4924_vm0, %v4923_v1 }
 0xdbb   :  { %2664 = vadd.xlane.f32.xlu0 %v2663_v42  ;;  %4382 = vmatprep.subr.bf16.mxu0 %v4923_v1 }
 0xdc8   :  { %2216 = vrot.lane.b32.xlu1 %v5454_v54, %s4916_s3 }
 0xdd1   :  { %2214 = vrot.lane.b32.xlu0 %v5435_v30, %s4916_s3 }
 0xe07   :  { %v2650_v43 = vpop.xlane.xlu1 %2649 }
 0xe08   :  { %4696 = vrcp.f32 %v2650_v43 }
 0xe0b   :  { %v2656_v44 = vpop.xlane.xlu1 %2655 }
 0xe0c   :  { %4698 = vrcp.f32 %v2656_v44 }
 0xe0f   :  { %v2653_v45 = vpop.xlane.xlu0 %2652  ;;  %v2211_v49 = vpop.permute.xlu1 %2210 }
 0xe10   :  { %4700 = vrcp.f32 %v2653_v45  ;;  %v2878_v54 = vsel %vm955_vm2, %v2211_v49, 0  ;;  %v4584_v45 = vld [vmem:[#allocation6 + $0x60] sm:$0xff]  }
 0xe12   :  { %v4697_v47 = vpop.eup %4696 }
 0xe13   :  { %v2676_v48 = vmul.f32 %v4697_v47, %v4681_v9  ;;  %v2209_v61 = vpop.permute.xlu0 %2208  ;;  %v2213_v55 = vpop.permute.xlu1 %2212  ;;  %v4585_v47 = vld [vmem:[#allocation6 + $0x68] sm:$0xff]  }
 0xe14   :  { %v2832_v46 = vsel %vm955_vm2, %v2209_v61, 0  ;;  %v2924_v59 = vsel %vm955_vm2, %v2213_v55, 0  ;;  %v4587_v61 = vld [vmem:[#allocation6 + $0x78] sm:$0xff]  }
 0xe15   :  { %4377 = vmatpush3.bf16.msra.mxu1 %v2832_v46  ;;  %v2684_v50 = vpack.c.bf16 %v2676_v48, %v2676_v48  ;;  %v4586_v48 = vld [vmem:[#allocation6 + $0x70] sm:$0xff]  }
 0xe16   :  { %v4699_v51 = vpop.eup %4698  ;;  %4388 = vmatprep.subr.bf16.mxu1 %v4923_v1 }
 0xe17   :  { %4373 = vmatmul.mubr.msk.bf16.vlgmr.msra.gmra.mrb[60].mxu0 %vm855_vm3, %v2684_v50  ;;  %v2678_v30 = vmul.f32 %v4699_v51, %v5478_v10 }
 0xe18   :  { %4383 = vmatpush3.bf16.msra.mxu0 %v2878_v54  ;;  %4384 = vmatprep.mubr.msk.bf16.mxu0 %vm4924_vm0, %v4923_v1 }
 0xe19   :  { %4394 = vmatprep.subr.bf16.mxu0 %v4923_v1  ;;  %v2686_v57 = vpack.c.bf16 %v2678_v30, %v2678_v30 }
 0xe1a   :  { %v4701_v52 = vpop.eup %4700 }
 0xe1b   :  { %v2677_v53 = vmul.f32 %v4701_v52, %v5482_v13 }
 0xe1d   :  { %v2685_v56 = vpack.c.bf16 %v2677_v53, %v2677_v53 }
 0xe1f   :  { %4379 = vmatmul.mubr.msk.bf16.vlgmr.msra.gmra.mrb[72].mxu1 %vm855_vm3, %v2685_v56  ;;  %4385 = vmatmul.mubr.msk.bf16.vlgmr.msra.gmra.mrb[64].mxu0 %vm855_vm3, %v2686_v57 }
 0xe20   :  { %4389 = vmatpush3.bf16.msra.mxu1 %v2924_v59  ;;  %4390 = vmatprep.mubr.msk.bf16.mxu1 %vm4924_vm0, %v4923_v1 }
 0xe21   :  { %4396 = vmatprep.mubr.msk.bf16.mxu0 %vm4924_vm0, %v4923_v1  ;;  %4400 = vmatprep.subr.bf16.mxu1 %v4923_v1 }
 0xe44   :  { %v2662_v60 = vpop.xlane.xlu1 %2661  ;;  %v2659_v62 = vpop.xlane.xlu0 %2658 }
 0xe45   :  { %4702 = vrcp.f32 %v2662_v60 }
 0xe46   :  { %4704 = vrcp.f32 %v2659_v62 }
 0xe48   :  { %v2665_v63 = vpop.xlane.xlu0 %2664  ;;  %v2217_v9 = vpop.permute.xlu1 %2216 }
 0xe49   :  { %4706 = vrcp.f32 %v2665_v63  ;;  %v3016_v13 = vsel %vm955_vm2, %v2217_v9, 0 }
 0xe4c   :  { %v2215_v2 = vpop.permute.xlu0 %2214 }
 0xe4d   :  { %v2970_v4 = vsel %vm955_vm2, %v2215_v2, 0 }
 0xe4e   :  { %4395 = vmatpush3.bf16.msra.mxu0 %v2970_v4 }
 0xe4f   :  { %v4703_v3 = vpop.eup %4702  ;;  %4406 = vmatprep.subr.bf16.mxu0 %v4923_v1 }
 0xe50   :  { %v4705_v5 = vpop.eup %4704  ;;  %v2680_v58 = vmul.f32 %v4703_v3, %v5496_v29  ;;  %v4582_v29 = vld [vmem:[#allocation6 + $0x50] sm:$0xff]  }
 0xe51   :  { %v2679_v6 = vmul.f32 %v4705_v5, %v5498_v34 }
 0xe52   :  { %v2688_v11 = vpack.c.bf16 %v2680_v58, %v2680_v58 }
 0xe53   :  { %v2687_v10 = vpack.c.bf16 %v2679_v6, %v2679_v6  ;;  %v4707_v12 = vpop.eup %4706 }
 0xe54   :  { %4397 = vmatmul.mubr.msk.bf16.vlgmr.msra.gmra.mrb[68].mxu0 %vm855_vm3, %v2688_v11  ;;  %v2681_v14 = vmul.f32 %v4707_v12, %v5504_v40 }
 0xe55   :  { %4391 = vmatmul.mubr.msk.bf16.vlgmr.msra.gmra.mrb[76].mxu1 %vm855_vm3, %v2687_v10  ;;  %4422 = vmatprep.mubr.msk.bf16.mxu0 %vm4924_vm0, %v4923_v1 }
 0xe56   :  { %4401 = vmatpush3.bf16.msra.mxu1 %v3016_v13  ;;  %4402 = vmatprep.mubr.msk.bf16.mxu1 %vm4924_vm0, %v4923_v1  ;;  %v2689_v15 = vpack.c.bf16 %v2681_v14, %v2681_v14 }
 0xe57   :  { %4407 = vmatpush3.bf16.msra.mxu0 %v4580_v25 }
 0xe58   :  { %4408 = vmatprep.subr.bf16.mxu0 %v4923_v1 }
 0xe5b   :  { %4409 = vmatpush3.bf16.msra.mxu0 %v4581_v27 }
 0xe5c   :  { %4410 = vmatprep.subr.bf16.mxu0 %v4923_v1 }
 0xe5d   :  { %4403 = vmatmul.mubr.msk.bf16.vlgmr.msra.gmra.mrb[80].mxu1 %vm855_vm3, %v2689_v15 }
 0xe5e   :  { %3405 = vmatprep.mubr.bf16.mxu1 %v4922_v0 }
 0xe5f   :  { %4411 = vmatpush3.bf16.msra.mxu0 %v4582_v29 }
 0xe60   :  { %4412 = vmatprep.subr.bf16.mxu0 %v4923_v1 }
 0xe63   :  { %4413 = vmatpush3.bf16.msra.mxu0 %v4583_v36 }
 0xe64   :  { %4414 = vmatprep.subr.bf16.mxu0 %v4923_v1 }
 0xe67   :  { %4415 = vmatpush3.bf16.msra.mxu0 %v4584_v45  ;;  %v4605_v45 = vld [vmem:[#allocation7 + $0xd4] ss:$8 sps:$4 sm:$0xff]  }
 0xe68   :  { %4416 = vmatprep.subr.bf16.mxu0 %v4923_v1 }
 0xe6b   :  { %4417 = vmatpush3.bf16.msra.mxu0 %v4585_v47  ;;  %v4603_v47 = vld [vmem:[#allocation7 + $0xd0] ss:$8 sps:$4 sm:$0xff]  }
 0xe6c   :  { %4418 = vmatprep.subr.bf16.mxu0 %v4923_v1 }
 0xe6f   :  { %4419 = vmatpush3.bf16.msra.mxu0 %v4586_v48  ;;  %v4608_v48 = vld [vmem:[#allocation7 + $0xe4] ss:$8 sps:$4 sm:$0xff]  }
 0xe70   :  { %4420 = vmatprep.subr.bf16.mxu0 %v4923_v1 }
 0xe73   :  { %4421 = vmatpush3.bf16.msra.mxu0 %v4587_v61  ;;  %v4606_v61 = vld [vmem:[#allocation7 + $0xe0] ss:$8 sps:$4 sm:$0xff]  }
 0xe7f   :  { %v5548_v16 = vpop.f32.mrb[68].mxu1 }
 0xe80   :  { %v4368_v17 = vpop.f32.mrb[69].mxu1  ;;  %v3059_v58 = vpack.c.bf16 %v5548_v16, %v5548_v16  ;;  %v3926_v16 = vld [vmem:[%s5624_s4 + $0x1] ss:$0 sm:$0xff] }
 0xe81   :  { %v2779_v18 = vpop.f32.mrb[70].mxu1 }
 0xe82   :  { %v4369_v20 = vpop.f32.mrb[71].mxu1 }
 0xe8c   :  { %v5550_v21 = vpop.f32.mrb[56].mxu0 }
 0xe8d   :  { %v4362_v22 = vpop.f32.mrb[57].mxu0  ;;  %v3058_v6 = vpack.c.bf16 %v5550_v21, %v5550_v21 }
 0xe8e   :  { %v2733_v23 = vpop.f32.mrb[58].mxu0 }
 0xe8f   :  { %v4363_v24 = vpop.f32.mrb[59].mxu0 }
 0xeea   :  { %v2822_v26 = vpop.f32.mrb[60].mxu0 }
 0xeeb   :  { %v3060_v28 = vpack.c.bf16 %v2822_v26, %v2822_v26  ;;  %v4374_v19 = vpop.f32.mrb[61].mxu0 }
 0xeec   :  { %v2825_v32 = vpop.f32.mrb[62].mxu0  ;;  %v4590_v19 = vld [vmem:[#allocation7 + $0x84] ss:$8 sps:$4 sm:$0xff]  }
 0xeed   :  { %v4375_v0 = vpop.f32.mrb[63].mxu0  ;;  %3068 = vrot.lane.b32.xlu0 %v3060_v28, %s4916_s3  ;;  %v4588_v28 = vld [vmem:[#allocation7 + $0x80] ss:$8 sps:$4 sm:$0xff]   ;;  %v4593_v32 = vld [vmem:[#allocation7 + $0x94] ss:$8 sps:$4 sm:$0xff]   ;;  %3373 = vmatprep.subr.bf16.mxu1 %v4590_v19 }
 0xeee   :  { %3374 = vmatpush1.bf16.msra.mxu1 %v4588_v28  ;;  %v4591_v0 = vld [vmem:[#allocation7 + $0x90] ss:$8 sps:$4 sm:$0xff]  }
 0xeef   :  { %3375 = vmatprep.subr.bf16.mxu1 %v4593_v32 }
 0xef2   :  { %v2868_v34 = vpop.f32.mrb[72].mxu1  ;;  %v2914_v35 = vpop.f32.mrb[64].mxu0  ;;  %3376 = vmatpush1.bf16.msra.mxu1 %v4591_v0 }
 0xef3   :  { %v3061_v37 = vpack.c.bf16 %v2868_v34, %v2868_v34  ;;  %v3062_v38 = vpack.c.bf16 %v2914_v35, %v2914_v35  ;;  %v4380_v40 = vpop.f32.mrb[73].mxu1  ;;  %v4386_v39 = vpop.f32.mrb[65].mxu0 }
 0xef4   :  { %v2871_v41 = vpop.f32.mrb[74].mxu1  ;;  %v2917_v42 = vpop.f32.mrb[66].mxu0  ;;  %v4596_v40 = vld [vmem:[#allocation7 + $0xa4] ss:$8 sps:$4 sm:$0xff]   ;;  %v4594_v39 = vld [vmem:[#allocation7 + $0xa0] ss:$8 sps:$4 sm:$0xff]  }
 0xef5   :  { %v4387_v43 = vpop.f32.mrb[67].mxu0  ;;  %3074 = vrot.lane.b32.xlu0 %v3062_v38, %s4912_s18  ;;  %3070 = vrot.lane.b32.xlu1 %v3061_v37, %s4916_s3  ;;  %v4381_v44 = vpop.f32.mrb[75].mxu1  ;;  %v4599_v41 = vld [vmem:[#allocation7 + $0xb4] ss:$8 sps:$4 sm:$0xff]   ;;  %v4597_v42 = vld [vmem:[#allocation7 + $0xb0] ss:$8 sps:$4 sm:$0xff]  }
 0xef6   :  { %3377 = vmatprep.subr.bf16.mxu1 %v4596_v40  ;;  %v4602_v43 = vld [vmem:[#allocation7 + $0xc4] ss:$8 sps:$4 sm:$0xff]   ;;  %v4600_v44 = vld [vmem:[#allocation7 + $0xc0] ss:$8 sps:$4 sm:$0xff]  }
 0xef7   :  { %3378 = vmatpush1.bf16.msra.mxu1 %v4594_v39 }
 0xef8   :  { %3379 = vmatprep.subr.bf16.mxu1 %v4599_v41 }
 0xefb   :  { %3380 = vmatpush1.bf16.msra.mxu1 %v4597_v42 }
 0xefc   :  { %3381 = vmatprep.subr.bf16.mxu1 %v4602_v43 }
 0xeff   :  { %3382 = vmatpush1.bf16.msra.mxu1 %v4600_v44 }
 0xf00   :  { %3383 = vmatprep.subr.bf16.mxu1 %v4605_v45 }
 0xf03   :  { %3384 = vmatpush1.bf16.msra.mxu1 %v4603_v47 }
 0xf04   :  { %3385 = vmatprep.subr.bf16.mxu1 %v4608_v48 }
 0xf07   :  { %3386 = vmatpush1.bf16.msra.mxu1 %v4606_v61 }
 0xf27   :  { %v3006_v49 = vpop.f32.mrb[68].mxu0 }
 0xf28   :  { %v2960_v46 = vpop.f32.mrb[76].mxu1  ;;  %v3064_v50 = vpack.c.bf16 %v3006_v49, %v3006_v49  ;;  %v4398_v51 = vpop.f32.mrb[69].mxu0  ;;  %v4611_v49 = vld [vmem:[#allocation7 + $0xf4] ss:$8 sps:$4 sm:$0xff]  }
 0xf29   :  { %v3063_v54 = vpack.c.bf16 %v2960_v46, %v2960_v46  ;;  %v4392_v30 = vpop.f32.mrb[77].mxu1  ;;  %v3009_v52 = vpop.f32.mrb[70].mxu0  ;;  %v4609_v46 = vld [vmem:[#allocation7 + $0xf0] ss:$8 sps:$4 sm:$0xff]   ;;  %3387 = vmatprep.subr.bf16.mxu1 %v4611_v49  ;;  %v4613_v51 = vld [vmem:[#allocation10 + $0x80] sm:$0xff]  }
 0xf2a   :  { %v2963_v53 = vpop.f32.mrb[78].mxu1  ;;  %3080 = vrot.lane.b32.xlu0 %v3064_v50, %s4925_s16  ;;  %v4399_v55 = vpop.f32.mrb[71].mxu0  ;;  %3388 = vmatpush1.bf16.msra.mxu1 %v4609_v46  ;;  %v4612_v50 = vld [vmem:[#allocation10 + $0xc0] sm:$0xff]   ;;  %v4615_v30 = vld [vmem:[#allocation10 + $0x88] sm:$0xff]   ;;  %v4616_v52 = vld [vmem:[#allocation10 + $0xd0] sm:$0xff]  }
 0xf2b   :  { %3076 = vrot.lane.b32.xlu1 %v3063_v54, %s4912_s18  ;;  %v4393_v56 = vpop.f32.mrb[79].mxu1  ;;  %4426 = vmatprep.subr.bf16.mxu1 %v4923_v1  ;;  %v4614_v54 = vld [vmem:[#allocation10 + $0xc8] sm:$0xff]   ;;  %v4617_v53 = vld [vmem:[#allocation10 + $0x90] sm:$0xff]   ;;  %v4618_v55 = vld [vmem:[#allocation10 + $0xd8] sm:$0xff]  }
 0xf2c   :  { %4123 = vmatprep.subr.bf16.mxu0 %v4612_v50  ;;  %v4619_v56 = vld [vmem:[#allocation10 + $0x98] sm:$0xff]  }
 0xf30   :  { %v3052_v57 = vpop.f32.mrb[80].mxu1 }
 0xf31   :  { %v3065_v59 = vpack.c.bf16 %v3052_v57, %v3052_v57  ;;  %v4404_v60 = vpop.f32.mrb[81].mxu1  ;;  %v4620_v57 = vld [vmem:[#allocation10 + $0xe0] sm:$0xff]  }
 0xf32   :  { %v3055_v62 = vpop.f32.mrb[82].mxu1  ;;  %v4622_v60 = vld [vmem:[#allocation10 + $0xe8] sm:$0xff]  }
 0xf33   :  { %3082 = vrot.lane.b32.xlu1 %v3065_v59, %s4925_s16  ;;  %v4405_v63 = vpop.f32.mrb[83].mxu1  ;;  %v4621_v59 = vld [vmem:[#allocation10 + $0xa0] sm:$0xff]  }
 0xf5f   :  { %v3069_v2 = vpop.permute.xlu0 %3068 }
 0xf60   :  { %v3086_v11 = vsel %vm478_vm1, %v3058_v6, %v3069_v2 }
 0xf67   :  { %v3071_v4 = vpop.permute.xlu1 %3070  ;;  %v3075_v3 = vpop.permute.xlu0 %3074 }
 0xf68   :  { %v3089_v10 = vsel %vm478_vm1, %v3059_v58, %v3071_v4  ;;  %v3091_v12 = vsel %vm1353_vm4, %v3086_v11, %v3075_v3 }
 0xf9c   :  { %v3081_v9 = vpop.permute.xlu0 %3080 }
 0xf9d   :  { %v3077_v5 = vpop.permute.xlu1 %3076  ;;  %v3095_v15 = vsel %vm1358_vm5, %v3091_v12, %v3081_v9  ;;  %v3938_v9 = vld [vmem:[%s5625_s5 + $0x1] ss:$0 sm:$0xff] }
 0xf9e   :  { %v3093_v13 = vsel %vm1353_vm4, %v3089_v10, %v3077_v5 }
 0xfa5   :  { %v3083_v14 = vpop.permute.xlu1 %3082 }
 0xfa6   :  { %v3097_v17 = vsel %vm1358_vm5, %v3093_v13, %v3083_v14  ;;  %v3939_v13 = vld [vmem:[%s5626_s6 + $0x1] ss:$0 sm:$0xff] }
 0xfa7   :  { %v3927_v18 = vcombine.low %v3095_v15, %v3097_v17 }
 0xfa9   :  { %4423 = vmatmul.mubr.bf16.vlgmr.msra.gmra.mrb[72].mxu0 %v3927_v18 }
 0xfaa   :  { %4124 = vmatpush3.bf16.msra.mxu0 %v4613_v51 }
 0xfab   :  { %4125 = vmatprep.subr.bf16.mxu0 %v4614_v54 }
 0xfae   :  { %4126 = vmatpush3.bf16.msra.mxu0 %v4615_v30 }
 0xfaf   :  { %4127 = vmatprep.subr.bf16.mxu0 %v4616_v52 }
 0xfb2   :  { %4128 = vmatpush3.bf16.msra.mxu0 %v4617_v53 }
 0xfb3   :  { %4129 = vmatprep.subr.bf16.mxu0 %v4618_v55  ;;  %v4628_v55 = vld [vmem:[#allocation13] sm:$0xff]  }
 0xfb6   :  { %4130 = vmatpush3.bf16.msra.mxu0 %v4619_v56  ;;  %v4629_v56 = vld [vmem:[#allocation13 + $0x8] sm:$0xff]  }
 0xfb7   :  { %4131 = vmatprep.subr.bf16.mxu0 %v4620_v57  ;;  %v4630_v57 = vld [vmem:[#allocation13 + $0x10] sm:$0xff]  }
 0xfba   :  { %4132 = vmatpush3.bf16.msra.mxu0 %v4621_v59  ;;  %v4631_v59 = vld [vmem:[#allocation13 + $0x18] sm:$0xff]  }
 0xfbb   :  { %4133 = vmatprep.subr.bf16.mxu0 %v4622_v60  ;;  %v4632_v60 = vld [vmem:[#allocation13 + $0x20] sm:$0xff]  }
0x107c   :  { %v3211_v20 = vpop.f32.mrb[72].mxu0 }
0x107d   :  { %v3212_v21 = vadd.f32 %v3926_v16, %v3211_v20  ;;  %v4424_v22 = vpop.f32.mrb[73].mxu0  ;;  %v4624_v20 = vld [vmem:[#allocation10 + $0xf0] sm:$0xff]  }
0x107e   :  { %v3214_v23 = vpop.f32.mrb[74].mxu0  ;;  %v4626_v22 = vld [vmem:[#allocation10 + $0xf8] sm:$0xff]  }
0x107f   :  { %v3215_v24 = vadd.f32 %v3926_v16, %v3214_v23  ;;  %v4425_v25 = vpop.f32.mrb[75].mxu0  ;;  %v3218_v26 = vadd.f32 %v3212_v21, %v5380_v7  ;;  %v4623_v16 = vld [vmem:[#allocation10 + $0xa8] sm:$0xff]   ;;  %v4625_v21 = vld [vmem:[#allocation10 + $0xb0] sm:$0xff]   ;;  %v4627_v23 = vld [vmem:[#allocation10 + $0xb8] sm:$0xff]  }
0x1080   :  { %4134 = vmatpush3.bf16.msra.mxu0 %v4623_v16 }
0x1081   :  { %3224 = vadd.xlane.f32.xlu0 %v3218_v26  ;;  %v3219_v27 = vadd.f32 %v3215_v24, %v5382_v8  ;;  %4135 = vmatprep.subr.bf16.mxu0 %v4624_v20  ;;  %v3281_v24 = vld [vmem:[#allocation9 + $0x2] sm:$0x3] }
0x1082   :  { %v3286_v25 = vrot.slane %v3281_v24, %v5153_v31  ;;  %v3956_v31 = vld [vmem:[#allocation12 + $0x1] ss:$0 sm:$0xff] }
0x1083   :  { %3226 = vadd.xlane.f32.xlu1 %v3219_v27 }
0x1084   :  { %4136 = vmatpush3.bf16.msra.mxu0 %v4625_v21 }
0x1085   :  { %4137 = vmatprep.subr.bf16.mxu0 %v4626_v22 }
0x1088   :  { %4138 = vmatpush3.bf16.msra.mxu0 %v4627_v23 }
0x110e   :  { %v3225_v29 = vpop.xlane.xlu0 %3224 }
0x110f   :  { %v3228_v34 = vmul.f32 0.0078125, %v3225_v29 }
0x1110   :  { %v3227_v35 = vpop.xlane.xlu1 %3226 }
0x1111   :  { %v5580_v36 = vsub.f32 %v3218_v26, %v3228_v34  ;;  %v3229_v37 = vmul.f32 0.0078125, %v3227_v35  ;;  %v3290_v26 = vrot.slane %v3281_v24, %v5159_v33 }
0x1113   :  { %v5582_v38 = vsub.f32 %v3219_v27, %v3229_v37  ;;  %v3232_v7 = vmul.f32 %v5580_v36, %v5580_v36 }
0x1115   :  { %3234 = vadd.xlane.f32.xlu0 %v3232_v7  ;;  %v3233_v8 = vmul.f32 %v5582_v38, %v5582_v38 }
0x1119   :  { %3236 = vadd.xlane.f32.xlu0 %v3233_v8 }
0x11a2   :  { %v3235_v62 = vpop.xlane.xlu0 %3234 }
0x11a3   :  { %v3238_v63 = vmul.f32 0.0078125, %v3235_v62  ;;  %v4633_v62 = vld [vmem:[#allocation13 + $0x28] sm:$0xff]  }
0x11a5   :  { %v3240_v2 = vadd.f32 1e-06, %v3238_v63  ;;  %v4634_v63 = vld [vmem:[#allocation13 + $0x30] sm:$0xff]  }
0x11a6   :  { %v3237_v4 = vpop.xlane.xlu0 %3236 }
0x11a7   :  { %4708 = vrsqrt.f32 %v3240_v2  ;;  %v3239_v3 = vmul.f32 0.0078125, %v3237_v4  ;;  %v4635_v2 = vld [vmem:[#allocation13 + $0x38] sm:$0xff]  }
0x11a9   :  { %v3241_v5 = vadd.f32 1e-06, %v3239_v3 }
0x11ab   :  { %4710 = vrsqrt.f32 %v3241_v5 }
0x11b1   :  { %v4709_v58 = vpop.eup %4708 }
0x11b2   :  { %v3244_v6 = vmul.f32 %v4709_v58, %v5580_v36 }
0x11b4   :  { %v3252_v12 = vmul.f32 %v3938_v9, %v3244_v6 }
0x11b5   :  { %v4711_v11 = vpop.eup %4710 }
0x11b6   :  { %v3245_v10 = vmul.f32 %v4711_v11, %v5582_v38  ;;  %v3260_v15 = vadd.f32 %v3939_v13, %v3252_v12 }
0x11b8   :  { %v3253_v14 = vmul.f32 %v3938_v9, %v3245_v10  ;;  %v3975_v10 = vld [vmem:[%s5631_s11 + $0x1] ss:$0 sm:$0xff] }
0x11ba   :  { %v3261_v17 = vadd.f32 %v3939_v13, %v3253_v14 }
0x11bc   :  { %v3262_v18 = vpack.c.bf16 %v3261_v17, %v3260_v15 }
0x11be   :  { %3406 = vmatmul.mubr.bf16.vlgmr.msra.gmra.mrb[84].mxu1 %v3262_v18 }
0x11bf   :  { %4442 = vmatprep.mubr.msk.bf16.mxu1 %vm4924_vm0, %v4923_v1  ;;  %4427 = vmatpush3.bf16.msra.mxu1 %v4628_v55 }
0x11c0   :  { %4428 = vmatprep.subr.bf16.mxu1 %v4923_v1 }
0x11c3   :  { %4429 = vmatpush3.bf16.msra.mxu1 %v4629_v56 }
0x11c4   :  { %4430 = vmatprep.subr.bf16.mxu1 %v4923_v1 }
0x11c7   :  { %4431 = vmatpush3.bf16.msra.mxu1 %v4630_v57 }
0x11c8   :  { %4432 = vmatprep.subr.bf16.mxu1 %v4923_v1 }
0x11cb   :  { %4433 = vmatpush3.bf16.msra.mxu1 %v4631_v59 }
0x11cc   :  { %4434 = vmatprep.subr.bf16.mxu1 %v4923_v1 }
0x11cf   :  { %4435 = vmatpush3.bf16.msra.mxu1 %v4632_v60 }
0x11d0   :  { %4436 = vmatprep.subr.bf16.mxu1 %v4923_v1 }
0x11d3   :  { %4437 = vmatpush3.bf16.msra.mxu1 %v4633_v62 }
0x11d4   :  { %4438 = vmatprep.subr.bf16.mxu1 %v4923_v1 }
0x11d7   :  { %4439 = vmatpush3.bf16.msra.mxu1 %v4634_v63 }
0x11d8   :  { %4440 = vmatprep.subr.bf16.mxu1 %v4923_v1  ;;  %v3976_v1 = vld [vmem:[%s5632_s12 + $0x1] ss:$0 sm:$0xff] }
0x11db   :  { %4441 = vmatpush3.bf16.msra.mxu1 %v4635_v2 }
0x1291   :  { %v3407_v27 = vpop.f32.mrb[84].mxu1 }
0x1292   :  { %v3408_v28 = vadd.f32 %v3407_v27, %v3286_v25  ;;  %v3409_v19 = vpop.f32.mrb[85].mxu1 }
0x1293   :  { %v3410_v32 = vadd.f32 %v3409_v19, %v3290_v26  ;;  %v3411_v0 = vpop.f32.mrb[86].mxu1 }
0x1294   :  { %v3412_v29 = vadd.f32 %v3411_v0, %v3286_v25  ;;  %v3413_v34 = vpop.f32.mrb[87].mxu1  ;;  %v3416_v36 = vmax.f32 %v3408_v28, 0.0 }
0x1295   :  { %v3414_v35 = vadd.f32 %v3413_v34, %v3290_v26  ;;  %v3417_v38 = vmax.f32 %v3410_v32, 0.0 }
0x1296   :  { %v3418_v37 = vmax.f32 %v3412_v29, 0.0 }
0x1297   :  { %v3419_v7 = vmax.f32 %v3414_v35, 0.0  ;;  %v3977_v35 = vld [vmem:[%s5634_s14] ss:$0 sm:$0xff] }
0x1298   :  { %v3420_v8 = vpack.c.bf16 %v3418_v37, %v3416_v36 }
0x1299   :  { %v3421_v40 = vpack.c.bf16 %v3419_v7, %v3417_v38 }
0x129b   :  { %3591 = vmatprep.mubr.bf16.mxu0 %v3421_v40 }
0x129c   :  { %3592 = vmatmul.mubr.bf16.vlgmr.msra.gmra.mrb[76].mxu0 %v3420_v8 }
0x136f   :  { %v4139_v39 = vpop.f32.mrb[76].mxu0 }
0x1370   :  { %v4140_v41 = vpop.f32.mrb[77].mxu0 }
0x1371   :  { %v4141_v33 = vadd.f32 %v4140_v41, %v4139_v39  ;;  %v4142_v42 = vpop.f32.mrb[78].mxu0 }
0x1372   :  { %v4143_v43 = vpop.f32.mrb[79].mxu0 }
0x1373   :  { %v3594_v44 = vadd.f32 %v4141_v33, %v3956_v31  ;;  %v4144_v45 = vadd.f32 %v4143_v43, %v4142_v42 }
0x1375   :  { %v3597_v47 = vadd.f32 %v4144_v45, %v3956_v31  ;;  %v3600_v48 = vadd.f32 %v3594_v44, %v3260_v15 }
0x1377   :  { %3606 = vadd.xlane.f32.xlu1 %v3600_v48  ;;  %v3601_v61 = vadd.f32 %v3597_v47, %v3261_v17 }
0x1379   :  { %3608 = vadd.xlane.f32.xlu0 %v3601_v61 }
0x1404   :  { %v3607_v49 = vpop.xlane.xlu1 %3606 }
0x1405   :  { %v3610_v46 = vmul.f32 0.0078125, %v3607_v49 }
0x1406   :  { %v3609_v50 = vpop.xlane.xlu0 %3608 }
0x1407   :  { %v3612_v51 = vsub.f32 %v3600_v48, %v3610_v46  ;;  %v3611_v54 = vmul.f32 0.0078125, %v3609_v50 }
0x1409   :  { %v3613_v30 = vsub.f32 %v3601_v61, %v3611_v54  ;;  %v3614_v52 = vmul.f32 %v3612_v51, %v3612_v51 }
0x140b   :  { %3616 = vadd.xlane.f32.xlu1 %v3614_v52  ;;  %v3615_v53 = vmul.f32 %v3613_v30, %v3613_v30 }
0x140d   :  { %3618 = vadd.xlane.f32.xlu0 %v3615_v53 }
0x1498   :  { %v3617_v4 = vpop.xlane.xlu1 %3616 }
0x1499   :  { %v3620_v3 = vmul.f32 0.0078125, %v3617_v4 }
0x149a   :  { %v3619_v5 = vpop.xlane.xlu0 %3618 }
0x149b   :  { %v3622_v58 = vadd.f32 1e-06, %v3620_v3  ;;  %v3621_v6 = vmul.f32 0.0078125, %v3619_v5 }
0x149d   :  { %4712 = vrsqrt.f32 %v3622_v58  ;;  %v3623_v9 = vadd.f32 1e-06, %v3621_v6 }
0x149f   :  { %4714 = vrsqrt.f32 %v3623_v9 }
0x14a7   :  { %v4713_v11 = vpop.eup %4712 }
0x14a8   :  { %v3626_v12 = vmul.f32 %v4713_v11, %v3612_v51 }
0x14a9   :  { %v4715_v13 = vpop.eup %4714 }
0x14aa   :  { %v3634_v14 = vmul.f32 %v3975_v10, %v3626_v12  ;;  %v3627_v15 = vmul.f32 %v4715_v13, %v3613_v30 }
0x14ac   :  { %v3642_v17 = vadd.f32 %v3976_v1, %v3634_v14  ;;  %v3635_v18 = vmul.f32 %v3975_v10, %v3627_v15 }
0x14ae   :  { %v3644_v16 = vrot.slane %v3642_v17, 4  ;;  %v3643_v20 = vadd.f32 %v3976_v1, %v3635_v18 }
0x14b0   :  { %v3645_v21 = vadd.f32 %v3644_v16, %v3642_v17  ;;  %v3650_v22 = vrot.slane %v3643_v20, 4 }
0x14b2   :  { %v3646_v23 = vrot.slane %v3645_v21, 2  ;;  %v3651_v24 = vadd.f32 %v3650_v22, %v3643_v20 }
0x14b4   :  { %v3652_v25 = vrot.slane %v3651_v24, 2  ;;  %v3647_v26 = vadd.f32 %v3646_v23, %v3645_v21 }
0x14b6   :  { %v3648_v27 = vrot.slane %v3647_v26, 1  ;;  %v3653_v28 = vadd.f32 %v3652_v25, %v3651_v24 }
0x14b8   :  { %v3654_v19 = vrot.slane %v3653_v28, 1  ;;  %v3649_v32 = vadd.f32 %v3648_v27, %v3647_v26 }
0x14ba   :  { %v3655_v0 = vadd.f32 %v3654_v19, %v3653_v28 }
0x14bc   :  { %v3659_v29 = vsel %vm3658_vm6, %v3655_v0, %v3649_v32 }
0x14bd   :  { %v3987_v34 = vpack.c.bf16 %v3659_v29, %v3659_v29 }
0x14bf   :  { %4443 = vmatmul.mubr.msk.bf16.vlgmr.msra.gmra.mrb[88].mxu1 %vm3986_vm8, %v3987_v34 }
0x1592   :  { %v3769_v36 = vpop.f32.mrb[88].mxu1 }
0x1593   :  { %v3770_v37 = vadd.f32 %v3977_v35, %v3769_v36  ;;  %v4444_v38 = vpop.f32.mrb[89].mxu1 }
0x1594   :  { %v3772_v7 = vpop.f32.mrb[90].mxu1 }
0x1595   :  { %3775 = vst [vmem:[%s5635_s15] sm:$0xff] %v3770_v37  ;;  %v4445_v8 = vpop.f32.mrb[91].mxu1 }
0x1596   :  { %3780 = vsyncpa [#allocation3], 1 }
0x1597   :  { %3781 = vsyncpa [#allocation5], 1 }
0x1598   :  { %3782 = vsyncpa [#allocation8], 1 }
0x1599   :  { %3783 = vsyncpa [#allocation11], 1 }
0x159a   :  { %3784 = vsyncpa [#allocation14], 1 }

</bundles_post_ra>
